<compile_context>
chip_gen: v7x
topology: tpu7x:2x2x1
jax: 0.10.0
libtpu: 0.0.40
codegen_flags: <defaults>
</compile_context>

<pallas_src>
import jax
import jax.numpy as jnp
from jax.experimental import pallas as pl
from jax.experimental.pallas import tpu as pltpu

EPS = 1e-5


def adaattn_kernel(c_ref, cstat_ref, f_ref, g_ref, hh1_ref, o_ref, m_scr, acc_scr):
    """Grid = (batch, q tiles, style tiles); style-tile axis ("arbitrary") is innermost.

    Blocks:
      c_ref    (1, C,    TQ)   content tile (channel-major, f32)
      cstat_ref(1, C,    2)    per-channel [mean, rstd] of content
      f_ref    (1, Ckp,  TQ)   conv_f(content_key) tile (bf16, channel-major)
      g_ref    (1, TS,   Ckp)  conv_g(style_key) tile (bf16, token-major)
      hh1_ref  (1, Racc, TS)   fused [H ; H^2 ; ones ; 0-pad] tile (bf16)
      o_ref    (1, C,    TQ)   output tile (written only on the last style step)
    Scratch (persists across grid steps):
      m_scr   (1, TQ)     running max
      acc_scr (Racc, TQ)  running [S@H ; S@H^2 ; S@1 ; pad]; row 2C is the softmax denom.
    """
    ks = pl.program_id(2)
    c_planes = o_ref.shape[1]

    @pl.when(ks == 0)
    def _init():
        m_scr[...] = jnp.full(m_scr.shape, -jnp.inf, dtype=m_scr.dtype)
        acc_scr[...] = jnp.zeros(acc_scr.shape, dtype=acc_scr.dtype)

    # Attention scores for this (q tile, style tile): (TS, TQ) = (TS, Ckp) @ (Ckp, TQ).
    scores_t = jnp.dot(g_ref[0], f_ref[0], preferred_element_type=jnp.float32)

    # Online softmax over style tokens (sublane axis of scores_t).
    m_prev = m_scr[...]                                                  # (1, TQ)
    m_new = jnp.maximum(m_prev, jnp.max(scores_t, axis=0, keepdims=True))
    alpha = jnp.exp(m_prev - m_new)
    p_t = jnp.exp(scores_t - m_new).astype(jnp.bfloat16)                 # (TS, TQ)
    m_scr[...] = m_new

    # One MXU pass against the precomputed [H ; H^2 ; ones] slab fuses the softmax
    # numerators for the first/second moments AND the denominator (the ones row).
    upd = jnp.dot(hh1_ref[0], p_t, preferred_element_type=jnp.float32)   # (Racc, TQ)
    acc_scr[...] = alpha * acc_scr[...] + upd

    @pl.when(ks == pl.num_programs(2) - 1)
    def _finalize():
        # Exact reciprocal (finalize path, negligible cost; std is cancellation-sensitive).
        inv_l = 1.0 / acc_scr[2 * c_planes:2 * c_planes + 1, :]          # (1, TQ)
        mean_cm = acc_scr[:c_planes, :] * inv_l                          # (C, TQ)
        second_cm = acc_scr[c_planes:2 * c_planes, :] * inv_l
        std_cm = jnp.sqrt(jnp.maximum(second_cm - mean_cm * mean_cm, 0.0))
        cs = cstat_ref[0]                                                # (C, 2)
        c_norm = (c_ref[0] - cs[:, 0:1]) * cs[:, 1:2]                    # (C, TQ)
        o_ref[0] = (std_cm * c_norm + mean_cm).astype(o_ref.dtype)


def _round_up(x, m):
    return ((x + m - 1) // m) * m


def _pick_tile(n, preferred):
    # NOTE: falls back to the full dimension when nothing divides evenly (no ragged-tile
    # masking path); fine for the token counts used here.
    for t in preferred:
        if t <= n and n % t == 0:
            return t
    return n


def _chip_defaults():
    """Per-generation VMEM budget / tile preferences (safe fallback if query fails)."""
    try:
        kind = jax.devices()[0].device_kind.lower()
    except Exception:
        kind = ""
    if "v7" in kind:
        # v7x: 64 MiB VMEM per TC, 2 TCs, 3.2 TB/s HBM -> keep tiles/VMEM conservative.
        return dict(vmem=48 * 1024 * 1024, tq_pref=(256, 128), ts_pref=(512, 256, 128))
    # v5e / v6e (and others with 128 MiB VMEM): grow the style tile, raise the VMEM cap.
    return dict(vmem=64 * 1024 * 1024, tq_pref=(256, 128), ts_pref=(1024, 512, 256, 128))


def init_params(key, in_planes, key_planes):
    """Conv2d-1x1 params: weights (Cout, Cin), biases (Cout,).

    Init matches PyTorch Conv2d defaults: U(-1/sqrt(fan_in), 1/sqrt(fan_in)).
    """
    ks = jax.random.split(key, 6)

    def uni(k, shape, fan_in):
        bound = 1.0 / float(fan_in) ** 0.5
        return jax.random.uniform(k, shape, jnp.float32, -bound, bound)

    wf = uni(ks[0], (key_planes, key_planes), key_planes)
    bf = uni(ks[1], (key_planes,), key_planes)
    wg = uni(ks[2], (key_planes, key_planes), key_planes)
    bg = uni(ks[3], (key_planes,), key_planes)
    wh = uni(ks[4], (in_planes, in_planes), in_planes)
    bh = uni(ks[5], (in_planes,), in_planes)
    return wf, bf, wg, bg, wh, bh


def ada_attn(content, style, content_key, style_key, params):
    """AdaAttN forward.  NCHW float32 in, NCHW float32 out."""
    b, C, h, w = content.shape
    Ck = content_key.shape[1]
    hs, ws = style.shape[2], style.shape[3]
    Nq, Ns = h * w, hs * ws

    wf, bf, wg, bg, wh, bh = params
    hp = jax.lax.Precision.HIGHEST  # cheap (computed once per call), protects accuracy

    # ---- Hoisted 1x1 convs (once per call; was per style step x per q tile in v2) ------
    ck_cm = content_key.reshape(b, Ck, Nq)
    sk_cm = style_key.reshape(b, Ck, Ns)
    s_cm = style.reshape(b, C, Ns)

    f_cm = jnp.einsum('oc,bcn->bon', wf, ck_cm, precision=hp) + bf.reshape(1, -1, 1)
    g_cm = jnp.einsum('oc,bcn->bon', wg, sk_cm, precision=hp) + bg.reshape(1, -1, 1)
    h_cm = jnp.einsum('oc,bcn->bon', wh, s_cm, precision=hp) + bh.reshape(1, -1, 1)

    # Zero-pad key channels to a multiple of 128: lane-dense DMA + full MXU K dim.
    Ckp = _round_up(max(Ck, 128), 128)
    if Ckp != Ck:
        f_cm = jnp.pad(f_cm, ((0, 0), (0, Ckp - Ck), (0, 0)))
        g_cm = jnp.pad(g_cm, ((0, 0), (0, Ckp - Ck), (0, 0)))
    f_bf = f_cm.astype(jnp.bfloat16)                        # (b, Ckp, Nq) channel-major
    g_tm = g_cm.transpose(0, 2, 1).astype(jnp.bfloat16)     # (b, Ns, Ckp) token-major

    # Fused [H ; H^2 ; ones ; 0-pad] slab -> one MXU pass per style step yields the
    # attention-weighted first/second moments AND the softmax denominator (ones row 2C).
    Racc = _round_up(2 * C + 1, 16)
    hh1 = jnp.concatenate(
        [h_cm, h_cm * h_cm,
         jnp.ones((b, 1, Ns), h_cm.dtype),
         jnp.zeros((b, Racc - 2 * C - 1, Ns), h_cm.dtype)],
        axis=1).astype(jnp.bfloat16)                        # (b, Racc, Ns)

    # mean_variance_norm statistics of `content` (unbiased var + eps, like torch),
    # merged into one (b, C, 2) input: [:, :, 0] = mean, [:, :, 1] = 1/std.
    c_cm = content.reshape(b, C, Nq)
    c_mean = jnp.mean(c_cm, axis=2, keepdims=True)
    c_rstd = jax.lax.rsqrt(jnp.var(c_cm, axis=2, ddof=1, keepdims=True) + EPS)
    cstat = jnp.concatenate([c_mean, c_rstd], axis=2)       # (b, C, 2)

    cfg = _chip_defaults()
    tq = _pick_tile(Nq, cfg['tq_pref'])
    ts = _pick_tile(Ns, cfg['ts_pref'])
    grid = (b, Nq // tq, Ns // ts)

    out = pl.pallas_call(
        adaattn_kernel,
        out_shape=jax.ShapeDtypeStruct((b, C, Nq), jnp.float32),
        grid_spec=pltpu.PrefetchScalarGridSpec(
            num_scalar_prefetch=0,
            grid=grid,
            in_specs=[
                pl.BlockSpec((1, C, tq), lambda ib, iq, ks: (ib, 0, iq)),     # content
                pl.BlockSpec((1, C, 2), lambda ib, iq, ks: (ib, 0, 0)),       # [mean, rstd]
                pl.BlockSpec((1, Ckp, tq), lambda ib, iq, ks: (ib, 0, iq)),   # F (bf16)
                pl.BlockSpec((1, ts, Ckp), lambda ib, iq, ks: (ib, ks, 0)),   # G (bf16, tok-major)
                pl.BlockSpec((1, Racc, ts), lambda ib, iq, ks: (ib, 0, ks)),  # [H;H^2;1] (bf16)
            ],
            out_specs=pl.BlockSpec((1, C, tq), lambda ib, iq, ks: (ib, 0, iq)),
            scratch_shapes=[
                pltpu.VMEM((1, tq), jnp.float32),        # running max
                pltpu.VMEM((Racc, tq), jnp.float32),     # running [S@H ; S@H^2 ; S@1]
            ],
        ),
        compiler_params=pltpu.CompilerParams(
            dimension_semantics=("parallel", "parallel", "arbitrary"),
            vmem_limit_bytes=cfg['vmem']),
    )(c_cm, cstat, f_bf, g_tm, hh1)

    return out.reshape(b, C, h, w)


def ada_attn_reference(content, style, content_key, style_key, params):
    """Pure-JAX reference reproducing the PyTorch forward (f32, HIGHEST precision)."""
    wf, bf, wg, bg, wh, bh = params
    b, C, h, w = content.shape
    Ck = content_key.shape[1]
    hs, ws = style.shape[2], style.shape[3]
    Nq, Ns = h * w, hs * ws
    p = jax.lax.Precision.HIGHEST

    ck_f = content_key.reshape(b, Ck, Nq)
    sk_f = style_key.reshape(b, Ck, Ns)
    s_f = style.reshape(b, C, Ns)

    F = jnp.einsum('oc,bcn->bon', wf, ck_f, precision=p) + bf.reshape(1, -1, 1)
    G = jnp.einsum('oc,bcn->bon', wg, sk_f, precision=p) + bg.reshape(1, -1, 1)
    H = jnp.einsum('oc,bcn->bon', wh, s_f, precision=p) + bh.reshape(1, -1, 1)

    Ff = F.transpose(0, 2, 1)            # (b, Nq, Ck)
    style_flat = H.transpose(0, 2, 1)    # (b, Ns, C)

    S = jnp.einsum('bqc,bcs->bqs', Ff, G, precision=p)
    S = jax.nn.softmax(S, axis=-1)
    mean = jnp.einsum('bqs,bsc->bqc', S, style_flat, precision=p)
    second = jnp.einsum('bqs,bsc->bqc', S, style_flat ** 2, precision=p)
    std = jnp.sqrt(jnp.maximum(second - mean ** 2, 0.0))
    mean = mean.transpose(0, 2, 1).reshape(b, C, h, w)
    std = std.transpose(0, 2, 1).reshape(b, C, h, w)

    cf = content.reshape(b, C, Nq)
    c_mean = cf.mean(axis=2).reshape(b, C, 1, 1)
    c_std = jnp.sqrt(cf.var(axis=2, ddof=1) + EPS).reshape(b, C, 1, 1)
    c_norm = (content - c_mean) / c_std
    return std * c_norm + mean


if __name__ == "__main__":
    key = jax.random.PRNGKey(0)
    k_params, k_c, k_s, k_ck, k_sk = jax.random.split(key, 5)

    batch, in_planes, key_planes = 2, 32, 32
    h, w = 16, 32      # content: Nq = 512 -> two 256-token q tiles
    hs, ws = 32, 32    # style:   Ns = 1024 -> streamed style tiles (flash-style)

    content = jax.random.normal(k_c, (batch, in_planes, h, w), jnp.float32)
    style = jax.random.normal(k_s, (batch, in_planes, hs, ws), jnp.float32)
    content_key = jax.random.normal(k_ck, (batch, key_planes, h, w), jnp.float32)
    style_key = jax.random.normal(k_sk, (batch, key_planes, hs, ws), jnp.float32)

    params = init_params(k_params, in_planes, key_planes)

    out = jax.block_until_ready(
        jax.jit(ada_attn)(content, style, content_key, style_key, params))

    ref = jax.block_until_ready(
        ada_attn_reference(content, style, content_key, style_key, params))

    assert out.shape == (batch, in_planes, h, w), out.shape
    max_err = float(jnp.max(jnp.abs(out - ref)))
    # bf16 MXU operands (f32 accumulation) vs the HIGHEST-precision f32 reference.
    assert jnp.allclose(out, ref, atol=5e-2, rtol=5e-2), max_err

    print("KERNEL_OK")
</pallas_src>

<mosaic_0001>
module attributes {stable_mosaic.version = 11 : i64} {
  func.func @adaattn_kernel(%arg0: i32, %arg1: i32, %arg2: i32, %arg3: memref<1x32x256xf32, #tpu.memory_space<vmem>>, %arg4: memref<1x32x2xf32, #tpu.memory_space<vmem>>, %arg5: memref<1x128x256xbf16, #tpu.memory_space<vmem>>, %arg6: memref<1x1024x128xbf16, #tpu.memory_space<vmem>>, %arg7: memref<1x80x1024xbf16, #tpu.memory_space<vmem>>, %arg8: memref<1x32x256xf32, #tpu.memory_space<vmem>>, %arg9: memref<1x256xf32, #tpu.memory_space<vmem>>, %arg10: memref<80x256xf32, #tpu.memory_space<vmem>>) attributes {dimension_semantics = [#tpu.dimension_semantics<parallel>, #tpu.dimension_semantics<parallel>, #tpu.dimension_semantics<arbitrary>], iteration_bounds = array<i64: 2, 2, 1>, scalar_prefetch = 0 : i64, scratch_operands = 2 : i64, tpu.core_type = #tpu.core_type<tc>, window_params = [{transform_indices = @transform_0, window_bounds = array<i64: 1, 32, 256>}, {transform_indices = @transform_1, window_bounds = array<i64: 1, 32, 2>}, {transform_indices = @transform_2, window_bounds = array<i64: 1, 128, 256>}, {transform_indices = @transform_3, window_bounds = array<i64: 1, 1024, 128>}, {transform_indices = @transform_4, window_bounds = array<i64: 1, 80, 1024>}, {transform_indices = @transform_5, window_bounds = array<i64: 1, 32, 256>}]} {
    %c0_i32 = arith.constant 0 : i32
    %0 = arith.cmpi eq, %arg2, %c0_i32 : i32
    %1 = arith.extui %0 : i1 to i32
    %c0_i32_0 = arith.constant 0 : i32
    %2 = arith.cmpi ne, %1, %c0_i32_0 : i32
    scf.if %2 {
      %cst_21 = arith.constant 0xFF800000 : f32
      %30 = vector.broadcast %cst_21 : f32 to vector<1x256xf32>
      %c0_22 = arith.constant 0 : index
      %c0_23 = arith.constant 0 : index
      %31 = vector.load %arg9[%c0_22, %c0_23] : memref<1x256xf32, #tpu.memory_space<vmem>>, vector<1x256xf32>
      tpu.vector_store %arg9[%c0_22, %c0_23], %30 {strides = array<i32>} : memref<1x256xf32, #tpu.memory_space<vmem>>, vector<1x256xf32>,
      %cst_24 = arith.constant 0.000000e+00 : f32
      %32 = vector.broadcast %cst_24 : f32 to vector<80x256xf32>
      %c0_25 = arith.constant 0 : index
      %c0_26 = arith.constant 0 : index
      %33 = vector.load %arg10[%c0_25, %c0_26] : memref<80x256xf32, #tpu.memory_space<vmem>>, vector<80x256xf32>
      tpu.vector_store %arg10[%c0_25, %c0_26], %32 {strides = array<i32>} : memref<80x256xf32, #tpu.memory_space<vmem>>, vector<80x256xf32>,
    } else {
    }
    %c0 = arith.constant 0 : index
    %c0_1 = arith.constant 0 : index
    %c0_2 = arith.constant 0 : index
    %3 = vector.load %arg6[%c0, %c0_1, %c0_2] : memref<1x1024x128xbf16, #tpu.memory_space<vmem>>, vector<1x1024x128xbf16>
    %4 = vector.shape_cast %3 : vector<1x1024x128xbf16> to vector<1024x128xbf16>
    %c0_3 = arith.constant 0 : index
    %c0_4 = arith.constant 0 : index
    %c0_5 = arith.constant 0 : index
    %5 = vector.load %arg5[%c0_3, %c0_4, %c0_5] : memref<1x128x256xbf16, #tpu.memory_space<vmem>>, vector<1x128x256xbf16>
    %6 = vector.shape_cast %5 : vector<1x128x256xbf16> to vector<128x256xbf16>
    %cst = arith.constant dense<0.000000e+00> : vector<1024x256xf32>
    %7 = tpu.matmul %4, %6, %cst {dimension_numbers = #tpu.dot_dimension_numbers<[1], [0], [0], [1], [0, 0, 1, 1], [], []>} : vector<1024x128xbf16>, vector<128x256xbf16>, vector<1024x256xf32> -> vector<1024x256xf32>
    %c0_6 = arith.constant 0 : index
    %c0_7 = arith.constant 0 : index
    %8 = vector.load %arg9[%c0_6, %c0_7] : memref<1x256xf32, #tpu.memory_space<vmem>>, vector<1x256xf32>
    %cst_8 = arith.constant dense<0xFF800000> : vector<256xf32>
    %9 = vector.multi_reduction <maximumf>, %7, %cst_8 [0] : vector<1024x256xf32> to vector<256xf32>
    %10 = vector.shape_cast %9 : vector<256xf32> to vector<1x256xf32>
    %11 = arith.maximumf %8, %10 : vector<1x256xf32>
    %12 = arith.subf %8, %11 : vector<1x256xf32>
    %13 = math.exp %12 : vector<1x256xf32>
    %14 = vector.broadcast %11 : vector<1x256xf32> to vector<1024x256xf32>
    %15 = arith.subf %7, %14 : vector<1024x256xf32>
    %16 = math.exp %15 : vector<1024x256xf32>
    %17 = arith.truncf %16 : vector<1024x256xf32> to vector<1024x256xbf16>
    %c0_9 = arith.constant 0 : index
    %c0_10 = arith.constant 0 : index
    %18 = vector.load %arg9[%c0_9, %c0_10] : memref<1x256xf32, #tpu.memory_space<vmem>>, vector<1x256xf32>
    tpu.vector_store %arg9[%c0_9, %c0_10], %11 {strides = array<i32>} : memref<1x256xf32, #tpu.memory_space<vmem>>, vector<1x256xf32>,
    %c0_11 = arith.constant 0 : index
    %c0_12 = arith.constant 0 : index
    %c0_13 = arith.constant 0 : index
    %19 = vector.load %arg7[%c0_11, %c0_12, %c0_13] : memref<1x80x1024xbf16, #tpu.memory_space<vmem>>, vector<1x80x1024xbf16>
    %20 = vector.shape_cast %19 : vector<1x80x1024xbf16> to vector<80x1024xbf16>
    %cst_14 = arith.constant dense<0.000000e+00> : vector<80x256xf32>
    %21 = tpu.matmul %20, %17, %cst_14 {dimension_numbers = #tpu.dot_dimension_numbers<[1], [0], [0], [1], [0, 0, 1, 1], [], []>} : vector<80x1024xbf16>, vector<1024x256xbf16>, vector<80x256xf32> -> vector<80x256xf32>
    %c0_15 = arith.constant 0 : index
    %c0_16 = arith.constant 0 : index
    %22 = vector.load %arg10[%c0_15, %c0_16] : memref<80x256xf32, #tpu.memory_space<vmem>>, vector<80x256xf32>
    %23 = vector.broadcast %13 : vector<1x256xf32> to vector<80x256xf32>
    %24 = arith.mulf %23, %22 : vector<80x256xf32>
    %25 = arith.addf %24, %21 : vector<80x256xf32>
    %c0_17 = arith.constant 0 : index
    %c0_18 = arith.constant 0 : index
    %26 = vector.load %arg10[%c0_17, %c0_18] : memref<80x256xf32, #tpu.memory_space<vmem>>, vector<80x256xf32>
    tpu.vector_store %arg10[%c0_17, %c0_18], %25 {strides = array<i32>} : memref<80x256xf32, #tpu.memory_space<vmem>>, vector<80x256xf32>,
    %c0_i32_19 = arith.constant 0 : i32
    %27 = arith.cmpi eq, %arg2, %c0_i32_19 : i32
    %28 = arith.extui %27 : i1 to i32
    %c0_i32_20 = arith.constant 0 : i32
    %29 = arith.cmpi ne, %28, %c0_i32_20 : i32
    scf.if %29 {
      %c64 = arith.constant 64 : index
      %c0_21 = arith.constant 0 : index
      %30 = vector.load %arg10[%c64, %c0_21] : memref<80x256xf32, #tpu.memory_space<vmem>>, vector<1x256xf32>
      %cst_22 = arith.constant 1.000000e+00 : f32
      %31 = vector.broadcast %cst_22 : f32 to vector<1x256xf32>
      %32 = arith.divf %31, %30 : vector<1x256xf32>
      %c0_23 = arith.constant 0 : index
      %c0_24 = arith.constant 0 : index
      %33 = vector.load %arg10[%c0_23, %c0_24] : memref<80x256xf32, #tpu.memory_space<vmem>>, vector<32x256xf32>
      %34 = vector.broadcast %32 : vector<1x256xf32> to vector<32x256xf32>
      %35 = arith.mulf %33, %34 : vector<32x256xf32>
      %c32 = arith.constant 32 : index
      %c0_25 = arith.constant 0 : index
      %36 = vector.load %arg10[%c32, %c0_25] : memref<80x256xf32, #tpu.memory_space<vmem>>, vector<32x256xf32>
      %37 = vector.broadcast %32 : vector<1x256xf32> to vector<32x256xf32>
      %38 = arith.mulf %36, %37 : vector<32x256xf32>
      %39 = arith.mulf %35, %35 : vector<32x256xf32>
      %40 = arith.subf %38, %39 : vector<32x256xf32>
      %cst_26 = arith.constant 0.000000e+00 : f32
      %41 = vector.broadcast %cst_26 : f32 to vector<32x256xf32>
      %42 = arith.maximumf %40, %41 : vector<32x256xf32>
      %43 = math.sqrt %42 : vector<32x256xf32>
      %c0_27 = arith.constant 0 : index
      %c0_28 = arith.constant 0 : index
      %c0_29 = arith.constant 0 : index
      %44 = vector.load %arg4[%c0_27, %c0_28, %c0_29] : memref<1x32x2xf32, #tpu.memory_space<vmem>>, vector<1x32x2xf32>
      %45 = vector.shape_cast %44 : vector<1x32x2xf32> to vector<32x2xf32>
      %c0_30 = arith.constant 0 : index
      %c0_31 = arith.constant 0 : index
      %c0_32 = arith.constant 0 : index
      %46 = vector.load %arg3[%c0_30, %c0_31, %c0_32] : memref<1x32x256xf32, #tpu.memory_space<vmem>>, vector<1x32x256xf32>
      %47 = vector.shape_cast %46 : vector<1x32x256xf32> to vector<32x256xf32>
      %48 = vector.extract_strided_slice %45 {offsets = [0, 0], sizes = [32, 1], strides = [1, 1]} : vector<32x2xf32> to vector<32x1xf32>
      %49 = vector.broadcast %48 : vector<32x1xf32> to vector<32x256xf32>
      %50 = arith.subf %47, %49 : vector<32x256xf32>
      %51 = vector.extract_strided_slice %45 {offsets = [0, 1], sizes = [32, 1], strides = [1, 1]} : vector<32x2xf32> to vector<32x1xf32>
      %52 = vector.broadcast %51 : vector<32x1xf32> to vector<32x256xf32>
      %53 = arith.mulf %50, %52 : vector<32x256xf32>
      %54 = arith.mulf %43, %53 : vector<32x256xf32>
      %55 = arith.addf %54, %35 : vector<32x256xf32>
      %c0_33 = arith.constant 0 : index
      %c0_34 = arith.constant 0 : index
      %c0_35 = arith.constant 0 : index
      %56 = vector.load %arg8[%c0_33, %c0_34, %c0_35] : memref<1x32x256xf32, #tpu.memory_space<vmem>>, vector<1x32x256xf32>
      %57 = vector.shape_cast %56 : vector<1x32x256xf32> to vector<32x256xf32>
      %58 = vector.shape_cast %55 : vector<32x256xf32> to vector<1x32x256xf32>
      tpu.vector_store %arg8[%c0_33, %c0_34, %c0_35], %58 {strides = array<i32>} : memref<1x32x256xf32, #tpu.memory_space<vmem>>, vector<1x32x256xf32>,
    } else {
    }
    return
  }
  func.func @transform_0(%arg0: i32, %arg1: i32, %arg2: i32) -> (i32, i32, i32) {
    %c0_i32 = arith.constant 0 : i32
    %c0_i32_0 = arith.constant 0 : i32
    return %arg0, %c0_i32, %arg1 : i32, i32, i32
  }
  func.func @transform_1(%arg0: i32, %arg1: i32, %arg2: i32) -> (i32, i32, i32) {
    %c0_i32 = arith.constant 0 : i32
    %c0_i32_0 = arith.constant 0 : i32
    %c0_i32_1 = arith.constant 0 : i32
    return %arg0, %c0_i32, %c0_i32_0 : i32, i32, i32
  }
  func.func @transform_2(%arg0: i32, %arg1: i32, %arg2: i32) -> (i32, i32, i32) {
    %c0_i32 = arith.constant 0 : i32
    %c0_i32_0 = arith.constant 0 : i32
    return %arg0, %c0_i32, %arg1 : i32, i32, i32
  }
  func.func @transform_3(%arg0: i32, %arg1: i32, %arg2: i32) -> (i32, i32, i32) {
    %c0_i32 = arith.constant 0 : i32
    %c0_i32_0 = arith.constant 0 : i32
    return %arg0, %arg2, %c0_i32 : i32, i32, i32
  }
  func.func @transform_4(%arg0: i32, %arg1: i32, %arg2: i32) -> (i32, i32, i32) {
    %c0_i32 = arith.constant 0 : i32
    %c0_i32_0 = arith.constant 0 : i32
    return %arg0, %c0_i32, %arg2 : i32, i32, i32
  }
  func.func @transform_5(%arg0: i32, %arg1: i32, %arg2: i32) -> (i32, i32, i32) {
    %c0_i32 = arith.constant 0 : i32
    %c0_i32_0 = arith.constant 0 : i32
    return %arg0, %c0_i32, %arg1 : i32, i32, i32
  }
}

</mosaic_0001>

<bundles_post_ra>
// kernel: ada_attn.1
= control target key start
LH: loop header
LB: loop body
LE: loop exit
PB: predicated region body
PF: predicated region fallthrough
CT: control target
= control target key end

     0   :  { %s8890_s0 = inlined_call_operand.hbm [shape: f32[2,32,512], index: 0, kind: input, shape index: {}]   ;;  %s8891_s1 = inlined_call_operand.hbm [shape: f32[2,32,2], index: 1, kind: input, shape index: {}]   ;;  %s8892_s2 = inlined_call_operand.hbm [shape: bf16[2,128,512], index: 2, kind: input, shape index: {}]   ;;  %s8893_s3 = inlined_call_operand.hbm [shape: bf16[2,1024,128], index: 3, kind: input, shape index: {}]   ;;  %s8894_s4 = inlined_call_operand.hbm [shape: bf16[2,80,1024], index: 4, kind: input, shape index: {}]   ;;  %s8895_s5 = inlined_call_operand.hbm [shape: f32[2,32,512], index: 5, kind: output, shape index: {}]  }
   0x1   :  { %9396 = sst [smem:[#allocation267_spill]] %s8890_s0 }
   0x2   :  { %9397 = sst [smem:[#allocation268_spill]] %s8891_s1 }
   0x3   :  { %9398 = sst [smem:[#allocation269_spill]] %s8893_s3 }
   0x4   :  { %9399 = sst [smem:[#allocation270_spill]] %s8895_s5 }
   0x5   :  { %10 = vsyncpa [#allocation5], 0 }
   0x6   :  { %12 = vsyncpa [#allocation5 + $0x1], 0 }
   0x7   :  { %13 = vsyncpa [#allocation8], 0 }
   0x8   :  { %15 = vsyncpa [#allocation8 + $0x1], 0 }
   0x9   :  { %16 = vsyncpa [#allocation11], 0 }
   0xa   :  { %18 = vsyncpa [#allocation11 + $0x1], 0 }
   0xb   :  { %19 = vsyncpa [#allocation6], 0 }
   0xc   :  { %21 = vsyncpa [#allocation6 + $0x1], 0  ;;  %s5367_s18 = smov 0   ;;  %s5369_s19 = smov 0  }
   0xd   :  { %s5371_s20 = smov 0   ;;  %s5373_s21 = smov 0  }
   0xe   :  { %s5375_s22 = smov 0   ;;  %s5377_s23 = smov 0  }
   0xf   :  { %s5379_s24 = smov 0   ;;  %s5381_s25 = smov 0  }
  0x10   :  { %s5383_s26 = smov 0   ;;  %s5385_s27 = smov 0  }
  0x11   :  { %s5387_s28 = smov 0  }
  0x12 LB: > { %9400 = sst [smem:[#allocation19_spill]] %s5278_s19  ;;  %s5421_s29 = sadd.s32 4294967295, %s5314_s28   ;;  %s5314_s28 = sphi %s5387_s28, %s27_s28   ;;  %s5310_s27 = sphi %s5385_s27, %s10554_s27   ;;  %s5306_s26 = sphi %s5383_s26, %s10553_s26   ;;  %s5302_s25 = sphi %s5381_s25, %s10552_s25   ;;  %s5298_s24 = sphi %s5379_s24, %s10551_s24   ;;  %s5294_s23 = sphi %s5377_s23, %s10546_s23   ;;  %s5290_s22 = sphi %s5375_s22, %s10545_s22   ;;  %s5286_s21 = sphi %s5373_s21, %s10544_s21   ;;  %s5282_s20 = sphi %s5371_s20, %s10550_s20   ;;  %s5278_s19 = sphi %s5369_s19, %s10549_s19   ;;  %s5274_s18 = sphi %s5367_s18, %s10543_s18  }
  0x13   : > { %9401 = sst [smem:[#allocation20_spill]] %s5286_s21  ;;  %p8899_p0 = scmp.eq.s32.totalorder %s5314_s28, 0 }
  0x14   : > { %9402 = sst [smem:[#allocation21_spill]] %s5290_s22  ;;  %p8897_p1 = scmp.eq.s32.totalorder %s5421_s29, 0 }
  0x15   : > { %9403 = sst [smem:[#allocation22_spill]] %s5294_s23  ;;  %p88_p2 = scmp.ne.s32.totalorder %s5282_s20, %s5278_s19 }
  0x16   : > { %9404 = sst [smem:[#allocation23_spill]] %s5298_s24  ;;  %p94_p3 = scmp.ne.s32.totalorder %s5278_s19, %s5274_s18 }
  0x17   : > { %9405 = sst [smem:[#allocation24_spill]] %s5302_s25  ;;  %p8896_p4 = scmp.lt.s32.totalorder %s5314_s28, 4 }
  0x18   : > { %9406 = sst [smem:[#allocation25_spill]] %s5421_s29  ;;  %p90_p5 = por %p88_p2, %p8899_p0 }
  0x19   : > { %p5434_p6 = por %p94_p3, %p8897_p1  ;;  %s8898_s7 = sand.u32 1, %s5314_s28  }
  0x1a   : > { %s5440_s8 = sand.u32 1, %s5282_s20   ;;  %s4187_s10 = sshll.u32 %s5310_s27, 9 }
  0x1b   : > { %s9407_s6 = scalar_select %p5434_p6, 1, 0 }
  0x1c   : > { %s4044_s9 = sshll.u32 %s5440_s8, 5  ;;  %s9409_s1 = sld [smem:[#allocation268_spill]] }
  0x1d   : > { %9408 = sst [smem:[#allocation26_spill]] %s9407_s6  ;;  %s257_s14 = scalar_lea.vmem [#allocation7], %s4044_s9 }
  0x1e   : > { %s264_s15 = sshll.u32 %s257_s14, 4  ;;  %p5453_p7 = pnand %p8896_p4, %p90_p5  ;;  %s5449_s15 = int_to_ptr.vmem [resolvable:$true] %s264_s15 }
  0x1f   : > { %s5460_s17 = scalar_lea.sflag [#allocation8], %s8898_s7 }
  0x20   : > { %s9410_s16 = scalar_select %p5453_p7, 1, 0 }
  0x21   : > { %p5466_p10 = pneg %p5453_p7 }
  0x22   : > { %s5447_s13 = scalar_lea.hbm %s9409_s1, %s4187_s10  ;;  %s5035_s12 = scalar_lea.hbm %s9409_s1, 1024 }
  0x23   : > { %s5030_s18 = scalar_lea.hbm %s5447_s13, 512  ;;  %p5036_p13 = scmp.lt.u32.totalorder %s5447_s13, %s9409_s1 }
  0x24   : > { %p5031_p9 = scmp.ne.s32.totalorder %s5447_s13, %s5030_s18  ;;  %p5037_p2 = scmp.lt.u32.totalorder %s5035_s12, %s5030_s18 }
  0x25   : > { %p5039_p5 = scmp.lt.u32.totalorder %s5030_s18, %s5447_s13 }
  0x26   : > { %p5033_p11 = pnand %p5466_p10, %p5031_p9  ;;  %p5038_p3 = por %p5037_p2, %p5036_p13 }
  0x28   : > { %p5034_p12 = pneg %p5033_p11  ;;  %p5040_p4 = por %p5039_p5, %p5038_p3 }
  0x2a   : > { %p5041_p1 = pnand %p5040_p4, %p5034_p12 }
  0x2c   : > { %5044 = shalt.err (!%p5041_p1)
}
  0x2d   : > { %s5045_s7 = scalar_lea.vmem %s5449_s15, 512  ;;  %s5316_s9 = smov [#allocation7]  }
  0x2e   : > { %p5046_p9 = scmp.ne.s32.totalorder %s5449_s15, %s5045_s7  ;;  %s5050_s11 = sshll.u32 %s5316_s9, 4  ;;  %s5051_s11 = int_to_ptr.vmem [resolvable:$false] %s5050_s11 }
  0x2f   : > { %s5052_s30 = scalar_lea.vmem %s5051_s11, 1024  ;;  %p5053_p8 = scmp.lt.s32.totalorder %s5449_s15, %s5051_s11 }
  0x30   : > { %p5048_p11 = pnand %p5046_p9, %p5466_p10  ;;  %p5054_p6 = scmp.lt.s32.totalorder %s5052_s30, %s5045_s7 }
  0x32   : > { %p5049_p0 = pneg %p5048_p11  ;;  %p5055_p13 = por %p5054_p6, %p5053_p8 }
  0x34   : > { %p5056_p2 = pnand %p5055_p13, %p5049_p0 }
  0x36   : > { %5059 = shalt.err (!%p5056_p2)
}
  0x37   : > { %s8902_s18 = smov 128   ;;  %s8903_s12 = smov 8  }
  0x38   : > { %4286 = dma.hbm_to_vmem [thread:$0]  (!%p5453_p7), %s5447_s13, 512, %s5449_s15, %s5460_s17, %s8902_s18, %s8902_s18, %s8903_s12  }
  0x39   : > { %p341_p1 = scmp.lt.s32.totalorder %s5314_s28, 5  ;;  %s4051_s7 = sshll.u32 %s5440_s8, 9 }
  0x3a   : > { %s4188_s14 = sshll.u32 %s5310_s27, 13  ;;  %p9412_p0 = scmp.ge.s32.totalorder %s5314_s28, 1 }
  0x3b   : > { %s9415_s3 = sld [smem:[#allocation269_spill]]  ;;  %s301_s5 = scalar_lea.vmem [#allocation10], %s4051_s7 }
  0x3c   : > { %p5498_p4 = pnand %p9412_p0, %p341_p1  ;;  %s310_s25 = sshll.u32 %s301_s5, 4  ;;  %s5507_s25 = int_to_ptr.vmem [resolvable:$true] %s310_s25 }
  0x3d   : > { %s9416_s13 = sand.u32 1, %s5314_s28  }
  0x3e   : > { %s9413_s9 = scalar_select %p5498_p4, 1, 0 }
  0x3f   : > { %s5511_s15 = scalar_lea.sflag [#allocation11], %s9416_s13 }
  0x40   : > { %9414 = sst [smem:[#allocation27_spill]] %s9413_s9 }
  0x41   : > { %s5505_s1 = scalar_lea.hbm %s9415_s3, %s4188_s14  ;;  %s5065_s14 = scalar_lea.hbm %s9415_s3, 16384 }
  0x42   : > { %s5060_s18 = scalar_lea.hbm %s5505_s1, 8192  ;;  %p5066_p3 = scmp.lt.u32.totalorder %s5505_s1, %s9415_s3 }
  0x43   : > { %p5061_p6 = scmp.ne.s32.totalorder %s5505_s1, %s5060_s18  ;;  %p5067_p5 = scmp.lt.u32.totalorder %s5065_s14, %s5060_s18 }
  0x44   : > { %p5069_p11 = scmp.lt.u32.totalorder %s5060_s18, %s5505_s1 }
  0x45   : > { %p5063_p8 = pnand %p5061_p6, %p5466_p10  ;;  %p5068_p9 = por %p5067_p5, %p5066_p3 }
  0x47   : > { %p5064_p12 = pneg %p5063_p8  ;;  %p5070_p13 = por %p5069_p11, %p5068_p9 }
  0x49   : > { %p5071_p2 = pnand %p5070_p13, %p5064_p12 }
  0x4b   : > { %5074 = shalt.err (!%p5071_p2)
}
  0x4c   : > { %s5075_s5 = scalar_lea.vmem %s5507_s25, 8192  ;;  %s5319_s12 = smov [#allocation10]  }
  0x4d   : > { %p5076_p1 = scmp.ne.s32.totalorder %s5507_s25, %s5075_s5  ;;  %s5080_s7 = sshll.u32 %s5319_s12, 4  ;;  %s5081_s7 = int_to_ptr.vmem [resolvable:$false] %s5080_s7 }
  0x4e   : > { %s5082_s24 = scalar_lea.vmem %s5081_s7, 16384  ;;  %p5083_p8 = scmp.lt.s32.totalorder %s5507_s25, %s5081_s7 }
  0x4f   : > { %p5078_p0 = pnand %p5076_p1, %p5466_p10  ;;  %p5084_p4 = scmp.lt.s32.totalorder %s5082_s24, %s5075_s5 }
  0x51   : > { %p5079_p6 = pneg %p5078_p0  ;;  %p5085_p3 = por %p5084_p4, %p5083_p8 }
  0x53   : > { %p5086_p5 = pnand %p5085_p3, %p5079_p6 }
  0x55   : > { %5089 = shalt.err (!%p5086_p5)
}
  0x56   : > { %s5320_s18 = smov 64   ;;  %s5321_s13 = smov 4  }
  0x57   : > { %4292 = dma.hbm_to_vmem [thread:$0]  (!%p5453_p7), %s5505_s1, 8192, %s5507_s25, %s5511_s15, %s5320_s18, %s5320_s18, %s5321_s13  }
  0x58   : > { %s4037_s11 = sadd.s32 4294967294, %s5314_s28   ;;  %s42_s14 = sadd.s32 1, %s5306_s26 }
  0x59   : > { %s46_s30 = sadd.s32 1, %s5310_s27  ;;  %p44_p4 = scmp.ge.s32.totalorder %s42_s14, 2 }
  0x5a   : > { %s55_s5 = sadd.s32 1, %s5294_s23  ;;  %p62_p12 = scmp.ne.s32.totalorder %s5294_s23, %s5290_s22 }
  0x5b   : > { %p68_p9 = scmp.ne.s32.totalorder %s5290_s22, %s5286_s21  ;;  %s10556_s14 = smov (%p44_p4, %s42_s14), 0 }
  0x5c   : > { %9417 = sst [smem:[#allocation28_spill]] %s10556_s14  ;;  %s10558_s30 = smov (!%p44_p4, %s46_s30), %s5310_s27 }
  0x5d   : > { %s51_s12 = ssub.s32 %s5306_s26, %s10556_s14  ;;  %p9418_p11 = scmp.eq.s32.totalorder %s5314_s28, 0 }
  0x5e   : > { %p48_p2 = scmp.ge.s32.totalorder %s10558_s30, 2  ;;  %p9420_p1 = scmp.eq.s32.totalorder %s5421_s29, 0 }
  0x5f   : > { %p5550_p13 = por %p9418_p11, %p62_p12  ;;  %p204_p6 = scmp.eq.s32.totalorder %s5421_s29, 3 }
  0x60   : > { %p5556_p0 = por %p9420_p1, %p68_p9  ;;  %p210_p8 = scmp.eq.s32.totalorder %s4037_s11, 3 }
  0x61   : > { %s10560_s30 = smov (%p48_p2, %s10558_s30), 0  ;;  %p5563_p3 = por %p204_p6, %p62_p12 }
  0x62   : > { %s9421_s25 = scalar_select %p5556_p0, 1, 0 }
  0x63   : > { %9423 = sst [smem:[#allocation30_spill]] %s10560_s30  ;;  %p5567_p5 = por %p210_p8, %p68_p9 }
  0x64   : > { %9422 = sst [smem:[#allocation29_spill]] %s9421_s25  ;;  %s50_s18 = ssub.s32 %s5310_s27, %s10560_s30 }
  0x65   : > { %s9424_s7 = scalar_select %p5563_p3, 1, 0 }
  0x66   : > { %s9426_s24 = scalar_select %p5567_p5, 1, 0 }
  0x67   : > { %9425 = sst [smem:[#allocation31_spill]] %s9424_s7  ;;  %s5574_s13 = sand.u32 1, %s5294_s23  }
  0x68   : > { %9427 = sst [smem:[#allocation32_spill]] %s9426_s24  ;;  %s52_s3 = sor.u32 %s51_s12, %s50_s18 }
  0x69   : > { %p79_p4 = scmp.eq.s32.totalorder %s50_s18, 0  ;;  %p53_p11 = scmp.eq.s32.totalorder %s52_s3, 0 }
  0x6a   : > { %s9428_s11 = sadd.s32 1, %s5282_s20  ;;  %s4040_s7 = sshll.u32 %s5574_s13, 6 }
  0x6b   : > { %s5579_s14 = scalar_select %p79_p4, %s5282_s20, %s9428_s11  }
  0x6c   : > { %s5582_s21 = scalar_select %p53_p11, %s5294_s23, %s55_s5  }
  0x6d   : > { %s4041_s6 = sshll.u32 %s5306_s26, 1  ;;  %s4042_s19 = sshll.u32 %s5310_s27, 4 }
  0x6e   : > { %9429 = sst [smem:[#allocation33_spill]] %s5582_s21  ;;  %s240_s24 = sadd.s32 %s4042_s19, %s4041_s6 }
  0x6f   : > { %s234_s30 = scalar_lea.vmem [#allocation4], %s4040_s7  ;;  %s4043_s25 = sshll.u32 %s240_s24, 7 }
  0x70   : > { %s243_s29 = sshll.u32 %s234_s30, 4  ;;  %s9430_s0 = sld [smem:[#allocation267_spill]]  ;;  %s5589_s29 = int_to_ptr.vmem [resolvable:$true] %s243_s29 }
  0x71   : > { %p9431_p12 = scmp.lt.s32.totalorder %s5314_s28, 4  ;;  %s231_s19 = scalar_lea.sflag [#allocation5], %s5574_s13 }
  0x73   : > { %p5600_p9 = pnand %p9431_p12, %p5550_p13 }
  0x75   : > { %p5092_p1 = pneg %p5600_p9 }
  0x76   : > { %s5594_s12 = scalar_lea.hbm %s9430_s0, %s4043_s25  ;;  %s5095_s5 = scalar_lea.hbm %s9430_s0, 4096 }
  0x77   : > { %s5090_s30 = scalar_lea.hbm %s5594_s12, 1024  ;;  %p5096_p13 = scmp.lt.u32.totalorder %s5594_s12, %s9430_s0 }
  0x78   : > { %p5091_p2 = scmp.ne.s32.totalorder %s5594_s12, %s5090_s30  ;;  %p5097_p4 = scmp.lt.u32.totalorder %s5095_s5, %s5090_s30 }
  0x79   : > { %p5099_p12 = scmp.lt.u32.totalorder %s5090_s30, %s5594_s12 }
  0x7a   : > { %p5093_p6 = pnand %p5092_p1, %p5091_p2  ;;  %p5098_p11 = por %p5097_p4, %p5096_p13 }
  0x7c   : > { %p5094_p8 = pneg %p5093_p6  ;;  %p5100_p5 = por %p5099_p12, %p5098_p11 }
  0x7e   : > { %p5101_p3 = pnand %p5100_p5, %p5094_p8 }
  0x80   : > { %5104 = shalt.err (!%p5101_p3)
}
  0x81   : > { %s5105_s7 = scalar_lea.vmem %s5589_s29, 1024  ;;  %s5322_s24 = smov [#allocation4]  }
  0x82   : > { %p5106_p2 = scmp.ne.s32.totalorder %s5589_s29, %s5105_s7  ;;  %s5110_s18 = sshll.u32 %s5322_s24, 4  ;;  %s5111_s18 = int_to_ptr.vmem [resolvable:$false] %s5110_s18 }
  0x83   : > { %s5112_s11 = scalar_lea.vmem %s5111_s18, 2048  ;;  %p5113_p7 = scmp.lt.s32.totalorder %s5589_s29, %s5111_s18 }
  0x84   : > { %p5108_p6 = pnand %p5106_p2, %p5092_p1  ;;  %p5114_p13 = scmp.lt.s32.totalorder %s5112_s11, %s5105_s7 }
  0x86   : > { %p5109_p0 = pneg %p5108_p6  ;;  %p5115_p4 = por %p5114_p13, %p5113_p7 }
  0x88   : > { %p5116_p11 = pnand %p5115_p4, %p5109_p0 }
  0x8a   : > { %5119 = shalt.err (!%p5116_p11)
}
  0x8b   : > { %s5323_s30 = smov 512   ;;  %s5324_s22 = smov 256  }
  0x8c   : > { %s5325_s9 = smov 16   ;;  %s4049_s5 = sshll.u32 %s5310_s27, 6 }
  0x8d   : > { %4283 = dma.hbm_to_vmem [thread:$0]  (!%p5600_p9), %s5594_s12, 1024, %s5589_s29, %s231_s19, %s5323_s30, %s5324_s22, %s5325_s9  }
  0x8e   : > { %s4047_s1 = sshll.u32 %s5574_s13, 7  ;;  %s284_s25 = sadd.s32 %s4049_s5, %s4041_s6 }
  0x8f   : > { %s4050_s7 = sshll.u32 %s284_s25, 6  ;;  %s278_s24 = scalar_lea.vmem [#allocation9], %s4047_s1 }
  0x90   : > { %s287_s18 = sshll.u32 %s278_s24, 4  ;;  %s5641_s21 = scalar_lea.hbm %s8892_s2, %s4050_s7  ;;  %s5643_s18 = int_to_ptr.vmem [resolvable:$true] %s287_s18 }
  0x91   : > { %s5120_s23 = scalar_lea.hbm %s5641_s21, 2048  ;;  %s5125_s13 = scalar_lea.hbm %s8892_s2, 8192 }
  0x92   : > { %p5121_p7 = scmp.ne.s32.totalorder %s5641_s21, %s5120_s23  ;;  %p5126_p5 = scmp.lt.u32.totalorder %s5641_s21, %s8892_s2 }
  0x93   : > { %p5127_p8 = scmp.lt.u32.totalorder %s5125_s13, %s5120_s23  ;;  %p5129_p2 = scmp.lt.u32.totalorder %s5120_s23, %s5641_s21 }
  0x94   : > { %p5123_p0 = pnand %p5121_p7, %p5092_p1 }
  0x95   : > { %p5128_p12 = por %p5127_p8, %p5126_p5 }
  0x96   : > { %p5124_p3 = pneg %p5123_p0 }
  0x97   : > { %p5130_p6 = por %p5129_p2, %p5128_p12 }
  0x99   : > { %p5131_p13 = pnand %p5130_p6, %p5124_p3 }
  0x9b   : > { %5134 = shalt.err (!%p5131_p13)
}
  0x9c   : > { %s5135_s19 = scalar_lea.vmem %s5643_s18, 2048  ;;  %s5326_s9 = smov [#allocation9]  }
  0x9d   : > { %p5136_p4 = scmp.ne.s32.totalorder %s5643_s18, %s5135_s19  ;;  %s5140_s5 = sshll.u32 %s5326_s9, 4  ;;  %s5141_s5 = int_to_ptr.vmem [resolvable:$false] %s5140_s5 }
  0x9e   : > { %s5142_s1 = scalar_lea.vmem %s5141_s5, 4096  ;;  %p5143_p0 = scmp.lt.s32.totalorder %s5643_s18, %s5141_s5 }
  0x9f   : > { %p5138_p11 = pnand %p5136_p4, %p5092_p1  ;;  %p5144_p5 = scmp.lt.s32.totalorder %s5142_s1, %s5135_s19 }
  0xa1   : > { %p5139_p7 = pneg %p5138_p11  ;;  %p5145_p8 = por %p5144_p5, %p5143_p0 }
  0xa3   : > { %p5146_p12 = pnand %p5145_p8, %p5139_p7 }
  0xa5   : > { %5149 = shalt.err (!%p5146_p12)
}
  0xa6   : > { %s9433_s23 = smov 8   ;;  %s9434_s25 = smov 128  }
  0xa7   : > { %4289 = dma.hbm_to_vmem [thread:$0]  (!%p5600_p9), %s5641_s21, 2048, %s5643_s18, %s5460_s17, %s5324_s22, %s9434_s25, %s9433_s23  }
  0xa8   : > { %s4265_s7 = smul.u32 320, %s5440_s8  ;;  %s5155_s17 = scalar_lea.hbm %s8894_s4, 10240 }
  0xa9   : > { %s4266_s24 = smul.u32 5120, %s5310_s27 }
  0xaa   : > { %s324_s3 = scalar_lea.vmem [#allocation12], %s4265_s7 }
  0xab   : > { %s5677_s6 = scalar_lea.hbm %s8894_s4, %s4266_s24  ;;  %s333_s13 = sshll.u32 %s324_s3, 4  ;;  %s5679_s13 = int_to_ptr.vmem [resolvable:$true] %s333_s13 }
  0xac   : > { %s5150_s12 = scalar_lea.hbm %s5677_s6, 5120  ;;  %p5156_p2 = scmp.lt.u32.totalorder %s5677_s6, %s8894_s4 }
  0xad   : > { %p5151_p1 = scmp.ne.s32.totalorder %s5677_s6, %s5150_s12  ;;  %p5157_p6 = scmp.lt.u32.totalorder %s5155_s17, %s5150_s12 }
  0xae   : > { %p5159_p4 = scmp.lt.u32.totalorder %s5150_s12, %s5677_s6 }
  0xaf   : > { %p5153_p3 = pnand %p5151_p1, %p5466_p10  ;;  %p5158_p13 = por %p5157_p6, %p5156_p2 }
  0xb1   : > { %p5154_p9 = pneg %p5153_p3  ;;  %p5160_p11 = por %p5159_p4, %p5158_p13 }
  0xb3   : > { %p5161_p7 = pnand %p5160_p11, %p5154_p9 }
  0xb5   : > { %5164 = shalt.err (!%p5161_p7)
}
  0xb6   : > { %s5165_s0 = scalar_lea.vmem %s5679_s13, 5120  ;;  %s5327_s19 = smov [#allocation12]  }
  0xb7   : > { %p5166_p0 = scmp.ne.s32.totalorder %s5679_s13, %s5165_s0  ;;  %s5170_s9 = sshll.u32 %s5327_s19, 4  ;;  %s5171_s9 = int_to_ptr.vmem [resolvable:$false] %s5170_s9 }
  0xb8   : > { %s5172_s5 = scalar_lea.vmem %s5171_s9, 10240  ;;  %p5173_p12 = scmp.lt.s32.totalorder %s5679_s13, %s5171_s9 }
  0xb9   : > { %p5168_p5 = pnand %p5166_p0, %p5466_p10  ;;  %p5174_p1 = scmp.lt.s32.totalorder %s5172_s5, %s5165_s0 }
  0xbb   : > { %p5169_p8 = pneg %p5168_p5  ;;  %p5175_p3 = por %p5174_p1, %p5173_p12 }
  0xbd   : > { %p5176_p2 = pnand %p5175_p3, %p5169_p8 }
  0xbf   : > { %5179 = shalt.err (!%p5176_p2)
}
  0xc0   : > { %s5328_s1 = smov 32   ;;  %p9435_p9 = scmp.ne.s32.totalorder %s9410_s16, 0 }
  0xc1   : > { %s9436_s10 = sld [smem:[#allocation27_spill]] }
  0xc2   : > { %4295 = dma.hbm_to_vmem [thread:$0]  (!%p9435_p9), %s5677_s6, 5120, %s5679_s13, %s5511_s15, %s5323_s30, %s5323_s30, %s5328_s1  }
  0xc7   : > { %p9437_p10 = scmp.ne.s32.totalorder %s9436_s10, 0 }
  0xc9   : > { %345 = sbr.rel (%p9437_p10) target bundleno = 1613 (0x64d), region = 40 }
  0xd0   : > { %s9438_s23 = sld [smem:[#allocation21_spill]]  ;;  %s9439_s25 = sld [smem:[#allocation29_spill]] }
  0xd6   : > { %s5708_s7 = sand.u32 1, %s9438_s23   ;;  %p9440_p6 = scmp.ne.s32.totalorder %s9439_s25, 0 }
  0xd7   : > { %s4056_s24 = sshll.u32 %s5708_s7, 6  ;;  %s348_s11 = scalar_lea.sflag [#allocation5], %s5708_s7 }
  0xd8   : > { %s5714_s16 = scalar_lea.vmem [#allocation4], %s4056_s24 }
  0xd9   : > { %5253 = dma.done.wait (%p9440_p6), %s348_s11, 1024  }
  0xda   : > { %5255 = vsyncadd (%p9440_p6), %s348_s11, 4294966272  ;;  %s9441_s15 = sld [smem:[#allocation25_spill]]  ;;  %s9442_s30 = sld [smem:[#allocation19_spill]] }
  0xdb   : > { %s9443_s29 = sld [smem:[#allocation26_spill]] }
  0xe0   : > { %s356_s6 = sand.u32 1, %s9441_s15   ;;  %s5722_s3 = sand.u32 1, %s9442_s30  }
  0xe1   : > { %s4057_s13 = sshll.u32 %s5722_s3, 5  ;;  %s357_s12 = scalar_lea.sflag [#allocation8], %s356_s6 }
  0xe2   : > { %s5725_s21 = scalar_lea.vmem [#allocation7], %s4057_s13  ;;  %p9444_p13 = scmp.ne.s32.totalorder %s9443_s29, 0 }
  0xe4   : > { %5257 = dma.done.wait (%p9444_p13), %s357_s12, 512  }
  0xe5   : > { %5259 = vsyncadd (%p9444_p13), %s357_s12, 4294966784  ;;  %s4058_s8 = sshll.u32 %s5708_s7, 7 }
  0xe6   : > { %s5732_s17 = scalar_lea.vmem [#allocation9], %s4058_s8 }
  0xe7   : > { %5261 = dma.done.wait (%p9440_p6), %s357_s12, 2048  }
  0xe8   : > { %5263 = vsyncadd (%p9440_p6), %s357_s12, 4294965248  ;;  %s4059_s22 = sshll.u32 %s5722_s3, 9  ;;  %s375_s18 = scalar_lea.sflag [#allocation11], %s356_s6 }
  0xe9   : > { %s5739_s0 = scalar_lea.vmem [#allocation10], %s4059_s22 }
  0xea   : > { %5265 = dma.done.wait (%p9444_p13), %s375_s18, 13312  }
  0xeb   : > { %5267 = vsyncadd (%p9444_p13), %s375_s18, 4294953984  ;;  %v8937_v0 = vmov 0   ;;  %v4410_v1 = vld [vmem:[%s5732_s17 + $0x4] ss:$8 sps:$4 sm:$0xff]   ;;  %v4412_v2 = vld [vmem:[%s5732_s17] ss:$8 sps:$4 sm:$0xff]  }
  0xec   : > { %1109 = vmatprep.mubr.bf16.mxu0 %v8937_v0  ;;  %1579 = vmatprep.mubr.bf16.mxu1 %v8937_v0  ;;  %v4413_v3 = vld [vmem:[%s5732_s17 + $0x14] ss:$8 sps:$4 sm:$0xff]   ;;  %v4415_v4 = vld [vmem:[%s5732_s17 + $0x10] ss:$8 sps:$4 sm:$0xff]   ;;  %v4416_v5 = vld [vmem:[%s5732_s17 + $0x24] ss:$8 sps:$4 sm:$0xff]  }
  0xed   : > { %4407 = vset.pattern.permute.xlu1 %v8937_v0  ;;  %4406 = vset.pattern.permute.xlu0 %v8937_v0  ;;  %v4418_v6 = vld [vmem:[%s5732_s17 + $0x20] ss:$8 sps:$4 sm:$0xff]   ;;  %v4419_v7 = vld [vmem:[%s5732_s17 + $0x34] ss:$8 sps:$4 sm:$0xff]   ;;  %v4421_v8 = vld [vmem:[%s5732_s17 + $0x30] ss:$8 sps:$4 sm:$0xff]  }
  0xee   : > { %1077 = vmatprep.subr.bf16.mxu0 %v4410_v1  ;;  %4189 = vmatprep.subr.bf16.mxu1 %v4410_v1  ;;  %v4422_v9 = vld [vmem:[%s5732_s17 + $0x44] ss:$8 sps:$4 sm:$0xff]   ;;  %v4424_v10 = vld [vmem:[%s5732_s17 + $0x40] ss:$8 sps:$4 sm:$0xff]   ;;  %v4425_v11 = vld [vmem:[%s5732_s17 + $0x54] ss:$8 sps:$4 sm:$0xff]  }
  0xef   : > { %1078 = vmatpush1.bf16.msra.mxu0 %v4412_v2  ;;  %4197 = vmatpush1.bf16.msra.mxu1 %v4412_v2  ;;  %v4427_v12 = vld [vmem:[%s5732_s17 + $0x50] ss:$8 sps:$4 sm:$0xff]   ;;  %v4428_v13 = vld [vmem:[%s5732_s17 + $0x64] ss:$8 sps:$4 sm:$0xff]   ;;  %v4430_v14 = vld [vmem:[%s5732_s17 + $0x60] ss:$8 sps:$4 sm:$0xff]  }
  0xf0   : > { %1079 = vmatprep.subr.bf16.mxu0 %v4413_v3  ;;  %4190 = vmatprep.subr.bf16.mxu1 %v4413_v3  ;;  %v4431_v15 = vld [vmem:[%s5732_s17 + $0x74] ss:$8 sps:$4 sm:$0xff]   ;;  %v4433_v16 = vld [vmem:[%s5732_s17 + $0x70] ss:$8 sps:$4 sm:$0xff]   ;;  %v4434_v17 = vld [vmem:[%s5739_s0] sm:$0xff]   ;;  %s4267_s19 = smul.u32 320, %s5722_s3 }
  0xf1   : > { %v4435_v18 = vld [vmem:[%s5739_s0 + $0x8] sm:$0xff]   ;;  %v4436_v19 = vld [vmem:[%s5739_s0 + $0x10] sm:$0xff]   ;;  %v4437_v20 = vld [vmem:[%s5739_s0 + $0x18] sm:$0xff]   ;;  %s10535_s5 = sld [smem:[#allocation23_spill]]  ;;  %s8778_s1 = scalar_lea.vmem [#allocation13], %s4056_s24 }
  0xf2   : > { %v4438_v21 = vld [vmem:[%s5739_s0 + $0x20] sm:$0xff]   ;;  %v4439_v22 = vld [vmem:[%s5739_s0 + $0x28] sm:$0xff]   ;;  %v4440_v23 = vld [vmem:[%s5739_s0 + $0x30] sm:$0xff]   ;;  %s7472_s9 = scalar_lea.vmem [#allocation12], %s4267_s19  ;;  %s10536_s10 = sld [smem:[#allocation24_spill]] }
  0xf3   : > { %1080 = vmatpush1.bf16.msra.mxu0 %v4415_v4  ;;  %4198 = vmatpush1.bf16.msra.mxu1 %v4415_v4  ;;  %v4441_v24 = vld [vmem:[%s5739_s0 + $0x38] sm:$0xff]   ;;  %v4442_v25 = vld [vmem:[%s5739_s0 + $0x40] sm:$0xff]   ;;  %v4443_v26 = vld [vmem:[%s5739_s0 + $0x48] sm:$0xff]   ;;  %s3848_s11 = sshll.u32 %s8778_s1, 4  ;;  %s10538_s6 = sld [smem:[#allocation270_spill]]  ;;  %s8818_s11 = int_to_ptr.vmem [resolvable:$true] %s3848_s11 }
  0xf4   : > { %1081 = vmatprep.subr.bf16.mxu0 %v4416_v5  ;;  %4191 = vmatprep.subr.bf16.mxu1 %v4416_v5  ;;  %v4444_v27 = vld [vmem:[%s5739_s0 + $0x50] sm:$0xff]   ;;  %v4468_v28 = vld [vmem:[%s5739_s0 + $0x178] sm:$0xff]   ;;  %v4470_v30 = vld [vmem:[%s5739_s0 + $0x180] sm:$0xff]   ;;  %s3833_s13 = scalar_lea.sflag [#allocation6], %s5708_s7  ;;  %s5180_s12 = scalar_lea.vmem %s8818_s11, 1024 }
  0xf5   : > { %v4445_v29 = vld [vmem:[%s5739_s0 + $0x58] sm:$0xff]   ;;  %v4446_v31 = vld [vmem:[%s5739_s0 + $0x60] sm:$0xff]   ;;  %v4472_v32 = vld [vmem:[%s5739_s0 + $0x188] sm:$0xff]   ;;  %p5181_p4 = scmp.ne.s32.totalorder %s8818_s11, %s5180_s12 }
  0xf6   : > { %v4447_v33 = vld [vmem:[%s5739_s0 + $0x68] sm:$0xff]   ;;  %v4474_v34 = vld [vmem:[%s5739_s0 + $0x190] sm:$0xff]   ;;  %v4476_v36 = vld [vmem:[%s5739_s0 + $0x198] sm:$0xff]  }
  0xf7   : > { %1082 = vmatpush1.bf16.msra.mxu0 %v4418_v6  ;;  %4199 = vmatpush1.bf16.msra.mxu1 %v4418_v6  ;;  %v4448_v35 = vld [vmem:[%s5739_s0 + $0x70] sm:$0xff]   ;;  %v4449_v37 = vld [vmem:[%s5739_s0 + $0x78] sm:$0xff]   ;;  %v4478_v38 = vld [vmem:[%s5739_s0 + $0x1a0] sm:$0xff]   ;;  %s4182_s23 = sshll.u32 %s10535_s5, 1 }
  0xf8   : > { %1083 = vmatprep.subr.bf16.mxu0 %v4419_v7  ;;  %4192 = vmatprep.subr.bf16.mxu1 %v4419_v7  ;;  %v4450_v39 = vld [vmem:[%s5739_s0 + $0x80] sm:$0xff]   ;;  %v4480_v40 = vld [vmem:[%s5739_s0 + $0x1a8] sm:$0xff]   ;;  %v4482_v42 = vld [vmem:[%s5739_s0 + $0x1b0] sm:$0xff]   ;;  %s4183_s25 = sshll.u32 %s10536_s10, 4 }
  0xf9   : > { %v4451_v41 = vld [vmem:[%s5739_s0 + $0x88] sm:$0xff]   ;;  %v4452_v43 = vld [vmem:[%s5739_s0 + $0x90] sm:$0xff]   ;;  %v4484_v44 = vld [vmem:[%s5739_s0 + $0x1b8] sm:$0xff]   ;;  %s3845_s24 = sadd.s32 %s4183_s25, %s4182_s23 }
  0xfa   : > { %v4453_v45 = vld [vmem:[%s5739_s0 + $0x98] sm:$0xff]   ;;  %v4486_v46 = vld [vmem:[%s5739_s0 + $0x1c0] sm:$0xff]   ;;  %v4488_v48 = vld [vmem:[%s5739_s0 + $0x1c8] sm:$0xff]   ;;  %s4184_s15 = sshll.u32 %s3845_s24, 7 }
  0xfb   : > { %1084 = vmatpush1.bf16.msra.mxu0 %v4421_v8  ;;  %4200 = vmatpush1.bf16.msra.mxu1 %v4421_v8  ;;  %v4454_v47 = vld [vmem:[%s5739_s0 + $0xa0] sm:$0xff]   ;;  %v4455_v49 = vld [vmem:[%s5739_s0 + $0xa8] sm:$0xff]   ;;  %v4490_v50 = vld [vmem:[%s5739_s0 + $0x1d0] sm:$0xff]   ;;  %s8825_s3 = scalar_lea.hbm %s10538_s6, %s4184_s15 }
  0xfc   : > { %1085 = vmatprep.subr.bf16.mxu0 %v4422_v9  ;;  %4193 = vmatprep.subr.bf16.mxu1 %v4422_v9  ;;  %v4456_v51 = vld [vmem:[%s5739_s0 + $0xb0] sm:$0xff]   ;;  %v4492_v52 = vld [vmem:[%s5739_s0 + $0x1d8] sm:$0xff]   ;;  %v4458_v54 = vld [vmem:[%s5739_s0 + $0xc0] sm:$0xff]  }
  0xfd   : > { %v4457_v53 = vld [vmem:[%s5739_s0 + $0xb8] sm:$0xff]   ;;  %v4459_v55 = vld [vmem:[%s5739_s0 + $0xc8] sm:$0xff]   ;;  %v4460_v56 = vld [vmem:[%s5739_s0 + $0xd0] sm:$0xff]  }
  0xfe   : > { %v4461_v59 = vld [vmem:[%s5739_s0 + $0xd8] sm:$0xff]   ;;  %v4462_v2 = vld [vmem:[%s5739_s0 + $0xe0] sm:$0xff]  }
  0xff   : > { %1086 = vmatpush1.bf16.msra.mxu0 %v4424_v10  ;;  %4201 = vmatpush1.bf16.msra.mxu1 %v4424_v10 }
 0x100   : > { %1087 = vmatprep.subr.bf16.mxu0 %v4425_v11  ;;  %4194 = vmatprep.subr.bf16.mxu1 %v4425_v11  ;;  %v4463_v11 = vld [vmem:[%s5739_s0 + $0xe8] sm:$0xff]  }
 0x103   : > { %1088 = vmatpush1.bf16.msra.mxu0 %v4427_v12  ;;  %4202 = vmatpush1.bf16.msra.mxu1 %v4427_v12 }
 0x104   : > { %1089 = vmatprep.subr.bf16.mxu0 %v4428_v13  ;;  %4195 = vmatprep.subr.bf16.mxu1 %v4428_v13 }
 0x107   : > { %1090 = vmatpush1.bf16.msra.mxu0 %v4430_v14  ;;  %4203 = vmatpush1.bf16.msra.mxu1 %v4430_v14 }
 0x108   : > { %1091 = vmatprep.subr.bf16.mxu0 %v4431_v15  ;;  %4196 = vmatprep.subr.bf16.mxu1 %v4431_v15 }
 0x10b   : > { %1092 = vmatpush1.bf16.msra.mxu0 %v4433_v16  ;;  %4204 = vmatpush1.bf16.msra.mxu1 %v4433_v16 }
 0x10e   : > { %1110 = vmatmul.mubr.bf16.vlgmr.msra.gmra.mrb[0].mxu0 %v4434_v17  ;;  %1580 = vmatmul.mubr.bf16.vlgmr.msra.gmra.mrb[0].mxu1 %v4468_v28  ;;  %v4494_v17 = vld [vmem:[%s5739_s0 + $0x1e0] sm:$0xff]  }
 0x10f   : > { %1119 = vmatprep.mubr.bf16.mxu0 %v8937_v0  ;;  %1589 = vmatprep.mubr.bf16.mxu1 %v8937_v0 }
 0x116   : > { %1120 = vmatmul.mubr.bf16.gmra.mrb[4].mxu0 %v4435_v18  ;;  %1590 = vmatmul.mubr.bf16.gmra.mrb[4].mxu1 %v4470_v30 }
 0x117   : > { %1129 = vmatprep.mubr.bf16.mxu0 %v8937_v0  ;;  %1599 = vmatprep.mubr.bf16.mxu1 %v8937_v0 }
 0x11e   : > { %1130 = vmatmul.mubr.bf16.gmra.mrb[8].mxu0 %v4436_v19  ;;  %1600 = vmatmul.mubr.bf16.gmra.mrb[8].mxu1 %v4472_v32 }
 0x11f   : > { %1139 = vmatprep.mubr.bf16.mxu0 %v8937_v0  ;;  %1609 = vmatprep.mubr.bf16.mxu1 %v8937_v0 }
 0x126   : > { %1140 = vmatmul.mubr.bf16.gmra.mrb[12].mxu0 %v4437_v20  ;;  %1610 = vmatmul.mubr.bf16.gmra.mrb[12].mxu1 %v4474_v34 }
 0x127   : > { %1149 = vmatprep.mubr.bf16.mxu0 %v8937_v0  ;;  %1619 = vmatprep.mubr.bf16.mxu1 %v8937_v0 }
 0x12e   : > { %1150 = vmatmul.mubr.bf16.gmra.mrb[16].mxu0 %v4438_v21  ;;  %1620 = vmatmul.mubr.bf16.gmra.mrb[16].mxu1 %v4476_v36  ;;  %v4464_v21 = vld [vmem:[%s5739_s0 + $0xf0] sm:$0xff]  }
 0x12f   : > { %1159 = vmatprep.mubr.bf16.mxu0 %v8937_v0  ;;  %1629 = vmatprep.mubr.bf16.mxu1 %v8937_v0 }
 0x136   : > { %1160 = vmatmul.mubr.bf16.gmra.mrb[20].mxu0 %v4439_v22  ;;  %1630 = vmatmul.mubr.bf16.gmra.mrb[20].mxu1 %v4478_v38 }
 0x137   : > { %1169 = vmatprep.mubr.bf16.mxu0 %v8937_v0  ;;  %1639 = vmatprep.mubr.bf16.mxu1 %v8937_v0 }
 0x13e   : > { %1170 = vmatmul.mubr.bf16.gmra.mrb[24].mxu0 %v4440_v23  ;;  %1640 = vmatmul.mubr.bf16.gmra.mrb[24].mxu1 %v4480_v40 }
 0x13f   : > { %1179 = vmatprep.mubr.bf16.mxu0 %v8937_v0  ;;  %1649 = vmatprep.mubr.bf16.mxu1 %v8937_v0 }
 0x146   : > { %1180 = vmatmul.mubr.bf16.gmra.mrb[28].mxu0 %v4441_v24  ;;  %1650 = vmatmul.mubr.bf16.gmra.mrb[28].mxu1 %v4482_v42 }
 0x147   : > { %1189 = vmatprep.mubr.bf16.mxu0 %v8937_v0  ;;  %1659 = vmatprep.mubr.bf16.mxu1 %v8937_v0 }
 0x14e   : > { %1190 = vmatmul.mubr.bf16.gmra.mrb[32].mxu0 %v4442_v25  ;;  %1660 = vmatmul.mubr.bf16.gmra.mrb[32].mxu1 %v4484_v44 }
 0x14f   : > { %1199 = vmatprep.mubr.bf16.mxu0 %v8937_v0  ;;  %1669 = vmatprep.mubr.bf16.mxu1 %v8937_v0 }
 0x156   : > { %1200 = vmatmul.mubr.bf16.gmra.mrb[36].mxu0 %v4443_v26  ;;  %1670 = vmatmul.mubr.bf16.gmra.mrb[36].mxu1 %v4486_v46 }
 0x157   : > { %1209 = vmatprep.mubr.bf16.mxu0 %v8937_v0  ;;  %1679 = vmatprep.mubr.bf16.mxu1 %v8937_v0 }
 0x15e   : > { %1210 = vmatmul.mubr.bf16.gmra.mrb[40].mxu0 %v4444_v27  ;;  %1680 = vmatmul.mubr.bf16.gmra.mrb[40].mxu1 %v4488_v48  ;;  %v4495_v27 = vld [vmem:[%s5739_s0 + $0x1e8] sm:$0xff]  }
 0x15f   : > { %1219 = vmatprep.mubr.bf16.mxu0 %v8937_v0  ;;  %1689 = vmatprep.mubr.bf16.mxu1 %v8937_v0 }
 0x166   : > { %1220 = vmatmul.mubr.bf16.gmra.mrb[44].mxu0 %v4445_v29  ;;  %1690 = vmatmul.mubr.bf16.gmra.mrb[44].mxu1 %v4490_v50 }
 0x167   : > { %1229 = vmatprep.mubr.bf16.mxu0 %v8937_v0  ;;  %1699 = vmatprep.mubr.bf16.mxu1 %v8937_v0 }
 0x16e   : > { %1230 = vmatmul.mubr.bf16.gmra.mrb[48].mxu0 %v4446_v31  ;;  %1700 = vmatmul.mubr.bf16.gmra.mrb[48].mxu1 %v4492_v52  ;;  %v4465_v31 = vld [vmem:[%s5739_s0 + $0xf8] sm:$0xff]  }
 0x16f   : > { %1239 = vmatprep.mubr.bf16.mxu0 %v8937_v0  ;;  %1709 = vmatprep.mubr.bf16.mxu1 %v8937_v0 }
 0x176   : > { %1240 = vmatmul.mubr.bf16.gmra.mrb[52].mxu0 %v4447_v33  ;;  %1710 = vmatmul.mubr.bf16.gmra.mrb[52].mxu1 %v4494_v17 }
 0x177   : > { %1249 = vmatprep.mubr.bf16.mxu0 %v8937_v0  ;;  %1719 = vmatprep.mubr.bf16.mxu1 %v8937_v0 }
 0x17e   : > { %1250 = vmatmul.mubr.bf16.gmra.mrb[56].mxu0 %v4448_v35  ;;  %1720 = vmatmul.mubr.bf16.gmra.mrb[56].mxu1 %v4495_v27 }
 0x17f   : > { %1259 = vmatprep.mubr.bf16.mxu0 %v8937_v0  ;;  %1729 = vmatprep.mubr.bf16.mxu1 %v8937_v0 }
 0x186   : > { %1260 = vmatmul.mubr.bf16.gmra.mrb[60].mxu0 %v4449_v37  ;;  %v4496_v37 = vld [vmem:[%s5739_s0 + $0x1f0] sm:$0xff]  }
 0x187   : > { %1269 = vmatprep.mubr.bf16.mxu0 %v8937_v0  ;;  %1730 = vmatmul.mubr.bf16.gmra.mrb[60].mxu1 %v4496_v37 }
 0x188   : > { %1739 = vmatprep.mubr.bf16.mxu1 %v8937_v0 }
 0x18e   : > { %1270 = vmatmul.mubr.bf16.gmra.mrb[64].mxu0 %v4450_v39 }
 0x18f   : > { %1279 = vmatprep.mubr.bf16.mxu0 %v8937_v0 }
 0x196   : > { %1280 = vmatmul.mubr.bf16.gmra.mrb[68].mxu0 %v4451_v41  ;;  %v4466_v41 = vld [vmem:[%s5739_s0 + $0x100] sm:$0xff]  }
 0x197   : > { %1289 = vmatprep.mubr.bf16.mxu0 %v8937_v0 }
 0x19e   : > { %1290 = vmatmul.mubr.bf16.gmra.mrb[72].mxu0 %v4452_v43 }
 0x19f   : > { %1299 = vmatprep.mubr.bf16.mxu0 %v8937_v0 }
 0x1a6   : > { %1300 = vmatmul.mubr.bf16.gmra.mrb[76].mxu0 %v4453_v45 }
 0x1a7   : > { %1309 = vmatprep.mubr.bf16.mxu0 %v8937_v0 }
 0x1ae   : > { %1310 = vmatmul.mubr.bf16.gmra.mrb[80].mxu0 %v4454_v47  ;;  %v4497_v47 = vld [vmem:[%s5739_s0 + $0x1f8] sm:$0xff]  }
 0x1af   : > { %1319 = vmatprep.mubr.bf16.mxu0 %v8937_v0  ;;  %1740 = vmatmul.mubr.bf16.gmra.mrb[64].mxu1 %v4497_v47 }
 0x1b6   : > { %1320 = vmatmul.mubr.bf16.gmra.mrb[84].mxu0 %v4455_v49 }
 0x1b7   : > { %1329 = vmatprep.mubr.bf16.mxu0 %v8937_v0 }
 0x1be   : > { %1330 = vmatmul.mubr.bf16.gmra.mrb[88].mxu0 %v4456_v51  ;;  %v4467_v51 = vld [vmem:[%s5739_s0 + $0x108] sm:$0xff]  }
 0x1bf   : > { %1339 = vmatprep.mubr.bf16.mxu0 %v8937_v0 }
 0x1c6   : > { %1340 = vmatmul.mubr.bf16.gmra.mrb[92].mxu0 %v4457_v53 }
 0x1c7   : > { %1349 = vmatprep.mubr.bf16.mxu0 %v8937_v0 }
 0x1ce   : > { %1350 = vmatmul.mubr.bf16.gmra.mrb[96].mxu0 %v4458_v54 }
 0x1cf   : > { %1359 = vmatprep.mubr.bf16.mxu0 %v8937_v0 }
 0x1d6   : > { %1360 = vmatmul.mubr.bf16.gmra.mrb[100].mxu0 %v4459_v55 }
 0x1d7   : > { %1369 = vmatprep.mubr.bf16.mxu0 %v8937_v0 }
 0x1de   : > { %1370 = vmatmul.mubr.bf16.gmra.mrb[104].mxu0 %v4460_v56 }
 0x1df   : > { %1379 = vmatprep.mubr.bf16.mxu0 %v8937_v0 }
 0x1e1   : > { %v5845_v57 = vpop.f32.mrb[0].mxu0 }
 0x1e2   : > { %v5847_v58 = vpop.f32.mrb[1].mxu0 }
 0x1e3   : > { %v5850_v60 = vpop.f32.mrb[2].mxu0 }
 0x1e4   : > { %v5852_v61 = vpop.f32.mrb[3].mxu0 }
 0x1e6   : > { %1380 = vmatmul.mubr.bf16.gmra.mrb[108].mxu0 %v4461_v59 }
 0x1e7   : > { %1389 = vmatprep.mubr.bf16.mxu0 %v8937_v0 }
 0x1e9   : > { %v5855_v62 = vpop.f32.mrb[4].mxu0 }
 0x1ea   : > { %v1751_v63 = vmax.f32 %v5845_v57, %v5855_v62  ;;  %v5859_v1 = vpop.f32.mrb[5].mxu0 }
 0x1eb   : > { %v1884_v3 = vmax.f32 %v5847_v58, %v5859_v1  ;;  %v5864_v4 = vpop.f32.mrb[6].mxu0 }
 0x1ec   : > { %v1752_v5 = vmax.f32 %v5850_v60, %v5864_v4  ;;  %v5868_v6 = vpop.f32.mrb[7].mxu0 }
 0x1ed   : > { %v1885_v7 = vmax.f32 %v5852_v61, %v5868_v6 }
 0x1ee   : > { %1390 = vmatmul.mubr.bf16.gmra.mrb[112].mxu0 %v4462_v2 }
 0x1ef   : > { %1399 = vmatprep.mubr.bf16.mxu0 %v8937_v0 }
 0x1f1   : > { %v5873_v8 = vpop.f32.mrb[8].mxu0 }
 0x1f2   : > { %v1753_v9 = vmax.f32 %v1751_v63, %v5873_v8  ;;  %v5876_v10 = vpop.f32.mrb[9].mxu0 }
 0x1f3   : > { %v1886_v12 = vmax.f32 %v1884_v3, %v5876_v10  ;;  %v5880_v13 = vpop.f32.mrb[10].mxu0  ;;  %v4469_v3 = vld [vmem:[%s5739_s0 + $0x110] sm:$0xff]  }
 0x1f4   : > { %v1754_v14 = vmax.f32 %v1752_v5, %v5880_v13  ;;  %v5883_v15 = vpop.f32.mrb[11].mxu0 }
 0x1f5   : > { %v1887_v16 = vmax.f32 %v1885_v7, %v5883_v15 }
 0x1f6   : > { %1400 = vmatmul.mubr.bf16.gmra.mrb[116].mxu0 %v4463_v11 }
 0x1f7   : > { %1409 = vmatprep.mubr.bf16.mxu0 %v8937_v0 }
 0x1f9   : > { %v5889_v18 = vpop.f32.mrb[12].mxu0 }
 0x1fa   : > { %v1755_v19 = vmax.f32 %v1753_v9, %v5889_v18  ;;  %v5892_v20 = vpop.f32.mrb[13].mxu0 }
 0x1fb   : > { %v1888_v22 = vmax.f32 %v1886_v12, %v5892_v20  ;;  %v5896_v23 = vpop.f32.mrb[14].mxu0 }
 0x1fc   : > { %v1756_v24 = vmax.f32 %v1754_v14, %v5896_v23  ;;  %v5899_v25 = vpop.f32.mrb[15].mxu0 }
 0x1fd   : > { %v1889_v26 = vmax.f32 %v1887_v16, %v5899_v25 }
 0x1fe   : > { %1410 = vmatmul.mubr.bf16.gmra.mrb[120].mxu0 %v4464_v21 }
 0x1ff   : > { %1419 = vmatprep.mubr.bf16.mxu0 %v8937_v0 }
 0x201   : > { %v5905_v28 = vpop.f32.mrb[16].mxu0 }
 0x202   : > { %v1757_v29 = vmax.f32 %v1755_v19, %v5905_v28  ;;  %v5908_v30 = vpop.f32.mrb[17].mxu0  ;;  %v4471_v19 = vld [vmem:[%s5739_s0 + $0x118] sm:$0xff]  }
 0x203   : > { %v1890_v32 = vmax.f32 %v1888_v22, %v5908_v30  ;;  %v5912_v33 = vpop.f32.mrb[18].mxu0 }
 0x204   : > { %v1758_v34 = vmax.f32 %v1756_v24, %v5912_v33  ;;  %v5915_v35 = vpop.f32.mrb[19].mxu0 }
 0x205   : > { %v1891_v36 = vmax.f32 %v1889_v26, %v5915_v35 }
 0x206   : > { %1420 = vmatmul.mubr.bf16.gmra.mrb[124].mxu0 %v4465_v31 }
 0x207   : > { %1429 = vmatprep.mubr.bf16.mxu0 %v8937_v0 }
 0x209   : > { %v5921_v38 = vpop.f32.mrb[20].mxu0 }
 0x20a   : > { %v1759_v39 = vmax.f32 %v1757_v29, %v5921_v38  ;;  %v5924_v40 = vpop.f32.mrb[21].mxu0 }
 0x20b   : > { %v1892_v42 = vmax.f32 %v1890_v32, %v5924_v40  ;;  %v5928_v43 = vpop.f32.mrb[22].mxu0 }
 0x20c   : > { %v1760_v44 = vmax.f32 %v1758_v34, %v5928_v43  ;;  %v5931_v45 = vpop.f32.mrb[23].mxu0  ;;  %v4473_v34 = vld [vmem:[%s5739_s0 + $0x120] sm:$0xff]  }
 0x20d   : > { %v1893_v46 = vmax.f32 %v1891_v36, %v5931_v45 }
 0x20e   : > { %1430 = vmatmul.mubr.bf16.gmra.mrb[128].mxu0 %v4466_v41 }
 0x20f   : > { %1439 = vmatprep.mubr.bf16.mxu0 %v8937_v0 }
 0x211   : > { %v5936_v48 = vpop.f32.mrb[24].mxu0 }
 0x212   : > { %v1761_v49 = vmax.f32 %v1759_v39, %v5936_v48  ;;  %v5939_v50 = vpop.f32.mrb[25].mxu0 }
 0x213   : > { %v1894_v52 = vmax.f32 %v1892_v42, %v5939_v50  ;;  %v5943_v53 = vpop.f32.mrb[26].mxu0 }
 0x214   : > { %v1762_v54 = vmax.f32 %v1760_v44, %v5943_v53  ;;  %v5946_v55 = vpop.f32.mrb[27].mxu0 }
 0x215   : > { %9445 = vst [vmem:[#allocation34_spill] sm:$0xff] %v5946_v55  ;;  %v1895_v56 = vmax.f32 %v1893_v46, %v5946_v55 }
 0x216   : > { %1440 = vmatmul.mubr.bf16.gmra.mrb[132].mxu0 %v4467_v51 }
 0x217   : > { %1449 = vmatprep.mubr.bf16.mxu0 %v8937_v0 }
 0x219   : > { %v5950_v59 = vpop.f32.mrb[28].mxu0 }
 0x21a   : > { %9446 = vst [vmem:[#allocation35_spill] sm:$0xff] %v5950_v59  ;;  %v1763_v63 = vmax.f32 %v1761_v49, %v5950_v59  ;;  %v5953_v2 = vpop.f32.mrb[29].mxu0  ;;  %v4475_v49 = vld [vmem:[%s5739_s0 + $0x128] sm:$0xff]   ;;  %v9113_v59 = vlaneseq }
 0x21b   : > { %9447 = vst [vmem:[#allocation36_spill] sm:$0xff] %v5953_v2  ;;  %v1896_v5 = vmax.f32 %v1894_v52, %v5953_v2  ;;  %v5957_v7 = vpop.f32.mrb[30].mxu0 }
 0x21c   : > { %9448 = vst [vmem:[#allocation37_spill] sm:$0xff] %v5957_v7  ;;  %v1764_v9 = vmax.f32 %v1762_v54, %v5957_v7  ;;  %v5960_v11 = vpop.f32.mrb[31].mxu0  ;;  %vm6501_vm0 = vcmp.lt.s32.totalorder %v9113_v59, 256 }
 0x21d   : > { %9449 = vst [vmem:[#allocation38_spill] sm:$0xff] %v5960_v11  ;;  %v1897_v12 = vmax.f32 %v1895_v56, %v5960_v11 }
 0x21e   : > { %1450 = vmatmul.mubr.bf16.gmra.mrb[136].mxu0 %v4469_v3 }
 0x21f   : > { %1459 = vmatprep.mubr.bf16.mxu0 %v8937_v0 }
 0x221   : > { %v5964_v14 = vpop.f32.mrb[32].mxu0 }
 0x222   : > { %9450 = vst [vmem:[#allocation39_spill] sm:$0xff] %v5964_v14  ;;  %v1765_v16 = vmax.f32 %v1763_v63, %v5964_v14  ;;  %v5967_v17 = vpop.f32.mrb[33].mxu0 }
 0x223   : > { %9451 = vst [vmem:[#allocation40_spill] sm:$0xff] %v5967_v17  ;;  %v1898_v21 = vmax.f32 %v1896_v5, %v5967_v17  ;;  %v5971_v22 = vpop.f32.mrb[34].mxu0 }
 0x224   : > { %9452 = vst [vmem:[#allocation41_spill] sm:$0xff] %v5971_v22  ;;  %v1766_v24 = vmax.f32 %v1764_v9, %v5971_v22  ;;  %v5974_v26 = vpop.f32.mrb[35].mxu0 }
 0x225   : > { %9453 = vst [vmem:[#allocation42_spill] sm:$0xff] %v5974_v26  ;;  %v1899_v27 = vmax.f32 %v1897_v12, %v5974_v26  ;;  %v4477_v12 = vld [vmem:[%s5739_s0 + $0x130] sm:$0xff]  }
 0x226   : > { %1460 = vmatmul.mubr.bf16.gmra.mrb[140].mxu0 %v4471_v19 }
 0x227   : > { %1469 = vmatprep.mubr.bf16.mxu0 %v8937_v0 }
 0x229   : > { %v5978_v29 = vpop.f32.mrb[36].mxu0 }
 0x22a   : > { %9454 = vst [vmem:[#allocation43_spill] sm:$0xff] %v5978_v29  ;;  %v1767_v31 = vmax.f32 %v1765_v16, %v5978_v29  ;;  %v5981_v32 = vpop.f32.mrb[37].mxu0 }
 0x22b   : > { %9455 = vst [vmem:[#allocation44_spill] sm:$0xff] %v5981_v32  ;;  %v1900_v36 = vmax.f32 %v1898_v21, %v5981_v32  ;;  %v5985_v37 = vpop.f32.mrb[38].mxu0 }
 0x22c   : > { %9456 = vst [vmem:[#allocation45_spill] sm:$0xff] %v5985_v37  ;;  %v1768_v39 = vmax.f32 %v1766_v24, %v5985_v37  ;;  %v5988_v41 = vpop.f32.mrb[39].mxu0 }
 0x22d   : > { %9457 = vst [vmem:[#allocation46_spill] sm:$0xff] %v5988_v41  ;;  %v1901_v42 = vmax.f32 %v1899_v27, %v5988_v41 }
 0x22e   : > { %1470 = vmatmul.mubr.bf16.gmra.mrb[144].mxu0 %v4473_v34 }
 0x22f   : > { %1479 = vmatprep.mubr.bf16.mxu0 %v8937_v0 }
 0x231   : > { %v5992_v44 = vpop.f32.mrb[40].mxu0 }
 0x232   : > { %9458 = vst [vmem:[#allocation47_spill] sm:$0xff] %v5992_v44  ;;  %v1769_v46 = vmax.f32 %v1767_v31, %v5992_v44  ;;  %v5995_v47 = vpop.f32.mrb[41].mxu0 }
 0x233   : > { %9459 = vst [vmem:[#allocation48_spill] sm:$0xff] %v5995_v47  ;;  %v1902_v51 = vmax.f32 %v1900_v36, %v5995_v47  ;;  %v5999_v52 = vpop.f32.mrb[42].mxu0 }
 0x234   : > { %9460 = vst [vmem:[#allocation49_spill] sm:$0xff] %v5999_v52  ;;  %v1770_v54 = vmax.f32 %v1768_v39, %v5999_v52  ;;  %v6002_v56 = vpop.f32.mrb[43].mxu0  ;;  %v4479_v39 = vld [vmem:[%s5739_s0 + $0x138] sm:$0xff]  }
 0x235   : > { %9461 = vst [vmem:[#allocation50_spill] sm:$0xff] %v6002_v56  ;;  %v1903_v63 = vmax.f32 %v1901_v42, %v6002_v56 }
 0x236   : > { %1480 = vmatmul.mubr.bf16.gmra.mrb[148].mxu0 %v4475_v49 }
 0x237   : > { %1489 = vmatprep.mubr.bf16.mxu0 %v8937_v0 }
 0x239   : > { %v6006_v3 = vpop.f32.mrb[44].mxu0 }
 0x23a   : > { %9462 = vst [vmem:[#allocation51_spill] sm:$0xff] %v6006_v3  ;;  %v1771_v5 = vmax.f32 %v1769_v46, %v6006_v3  ;;  %v6009_v9 = vpop.f32.mrb[45].mxu0 }
 0x23b   : > { %9463 = vst [vmem:[#allocation52_spill] sm:$0xff] %v6009_v9  ;;  %v1904_v16 = vmax.f32 %v1902_v51, %v6009_v9  ;;  %v6013_v19 = vpop.f32.mrb[46].mxu0 }
 0x23c   : > { %9464 = vst [vmem:[#allocation53_spill] sm:$0xff] %v6013_v19  ;;  %v1772_v21 = vmax.f32 %v1770_v54, %v6013_v19  ;;  %v6016_v24 = vpop.f32.mrb[47].mxu0 }
 0x23d   : > { %9465 = vst [vmem:[#allocation54_spill] sm:$0xff] %v6016_v24  ;;  %v1905_v27 = vmax.f32 %v1903_v63, %v6016_v24  ;;  %v6082_v24 = vpop.f32.mrb[0].mxu1 }
 0x23e   : > { %1490 = vmatmul.mubr.bf16.gmra.mrb[152].mxu0 %v4477_v12  ;;  %9484 = vst [vmem:[#allocation73_spill] sm:$0xff] %v6082_v24 }
 0x23f   : > { %1499 = vmatprep.mubr.bf16.mxu0 %v8937_v0 }
 0x241   : > { %v6020_v31 = vpop.f32.mrb[48].mxu0 }
 0x242   : > { %9466 = vst [vmem:[#allocation55_spill] sm:$0xff] %v6020_v31  ;;  %v1773_v34 = vmax.f32 %v1771_v5, %v6020_v31  ;;  %v6023_v36 = vpop.f32.mrb[49].mxu0  ;;  %v4481_v31 = vld [vmem:[%s5739_s0 + $0x140] sm:$0xff]  }
 0x243   : > { %9467 = vst [vmem:[#allocation56_spill] sm:$0xff] %v6023_v36  ;;  %v1906_v42 = vmax.f32 %v1904_v16, %v6023_v36  ;;  %v6027_v46 = vpop.f32.mrb[50].mxu0 }
 0x244   : > { %9468 = vst [vmem:[#allocation57_spill] sm:$0xff] %v6027_v46  ;;  %v1774_v49 = vmax.f32 %v1772_v21, %v6027_v46  ;;  %v6030_v51 = vpop.f32.mrb[51].mxu0 }
 0x245   : > { %9469 = vst [vmem:[#allocation58_spill] sm:$0xff] %v6030_v51  ;;  %v1907_v54 = vmax.f32 %v1905_v27, %v6030_v51  ;;  %v4483_v51 = vld [vmem:[%s5739_s0 + $0x148] sm:$0xff]  }
 0x246   : > { %1500 = vmatmul.mubr.bf16.gmra.mrb[156].mxu0 %v4479_v39 }
 0x247   : > { %1509 = vmatprep.mubr.bf16.mxu0 %v8937_v0 }
 0x249   : > { %v6034_v63 = vpop.f32.mrb[52].mxu0 }
 0x24a   : > { %9470 = vst [vmem:[#allocation59_spill] sm:$0xff] %v6034_v63  ;;  %v1775_v5 = vmax.f32 %v1773_v34, %v6034_v63  ;;  %v6037_v12 = vpop.f32.mrb[53].mxu0 }
 0x24b   : > { %9471 = vst [vmem:[#allocation60_spill] sm:$0xff] %v6037_v12  ;;  %v1908_v16 = vmax.f32 %v1906_v42, %v6037_v12  ;;  %v6041_v36 = vpop.f32.mrb[54].mxu0 }
 0x24c   : > { %9472 = vst [vmem:[#allocation61_spill] sm:$0xff] %v6041_v36  ;;  %v1776_v21 = vmax.f32 %v1774_v49, %v6041_v36  ;;  %v6044_v46 = vpop.f32.mrb[55].mxu0 }
 0x24d   : > { %9473 = vst [vmem:[#allocation62_spill] sm:$0xff] %v6044_v46  ;;  %v1909_v27 = vmax.f32 %v1907_v54, %v6044_v46  ;;  %v4485_v46 = vld [vmem:[%s5739_s0 + $0x150] sm:$0xff]  }
 0x24e   : > { %1510 = vmatmul.mubr.bf16.gmra.mrb[160].mxu0 %v4481_v31 }
 0x24f   : > { %1519 = vmatprep.mubr.bf16.mxu0 %v8937_v0 }
 0x251   : > { %v6048_v39 = vpop.f32.mrb[56].mxu0 }
 0x252   : > { %9474 = vst [vmem:[#allocation63_spill] sm:$0xff] %v6048_v39  ;;  %v1777_v34 = vmax.f32 %v1775_v5, %v6048_v39  ;;  %v6051_v63 = vpop.f32.mrb[57].mxu0 }
 0x253   : > { %9475 = vst [vmem:[#allocation64_spill] sm:$0xff] %v6051_v63  ;;  %v1910_v42 = vmax.f32 %v1908_v16, %v6051_v63  ;;  %v6055_v12 = vpop.f32.mrb[58].mxu0 }
 0x254   : > { %9476 = vst [vmem:[#allocation65_spill] sm:$0xff] %v6055_v12  ;;  %v1778_v49 = vmax.f32 %v1776_v21, %v6055_v12  ;;  %v6058_v36 = vpop.f32.mrb[59].mxu0 }
 0x255   : > { %9477 = vst [vmem:[#allocation66_spill] sm:$0xff] %v6058_v36  ;;  %v1911_v31 = vmax.f32 %v1909_v27, %v6058_v36  ;;  %v4487_v36 = vld [vmem:[%s5739_s0 + $0x158] sm:$0xff]  }
 0x256   : > { %1520 = vmatmul.mubr.bf16.gmra.mrb[164].mxu0 %v4483_v51 }
 0x257   : > { %1529 = vmatprep.mubr.bf16.mxu0 %v8937_v0 }
 0x259   : > { %v6062_v54 = vpop.f32.mrb[60].mxu0 }
 0x25a   : > { %9478 = vst [vmem:[#allocation67_spill] sm:$0xff] %v6062_v54  ;;  %v1779_v5 = vmax.f32 %v1777_v34, %v6062_v54  ;;  %v6065_v39 = vpop.f32.mrb[61].mxu0 }
 0x25b   : > { %9479 = vst [vmem:[#allocation68_spill] sm:$0xff] %v6065_v39  ;;  %v1912_v16 = vmax.f32 %v1910_v42, %v6065_v39  ;;  %v6069_v63 = vpop.f32.mrb[62].mxu0 }
 0x25c   : > { %9480 = vst [vmem:[#allocation69_spill] sm:$0xff] %v6069_v63  ;;  %v1780_v21 = vmax.f32 %v1778_v49, %v6069_v63  ;;  %v6072_v12 = vpop.f32.mrb[63].mxu0  ;;  %v6087_v49 = vpop.f32.mrb[1].mxu1  ;;  %v9491_v63 = vmov 0  }
 0x25d   : > { %9481 = vst [vmem:[#allocation70_spill] sm:$0xff] %v6072_v12  ;;  %v1913_v51 = vmax.f32 %v1911_v31, %v6072_v12  ;;  %9486 = vst [vmem:[#allocation75_spill] sm:$0xff] %v6087_v49 }
 0x25e   : > { %1530 = vmatmul.mubr.bf16.gmra.mrb[168].mxu0 %v4485_v46 }
 0x25f   : > { %1539 = vmatprep.mubr.bf16.mxu0 %v8937_v0  ;;  %v6092_v0 = vpop.f32.mrb[2].mxu1 }
 0x260   : > { %9488 = vst [vmem:[#allocation77_spill] sm:$0xff] %v6092_v0  ;;  %v1843_v12 = vmax.f32 %v6092_v0, %v6082_v24 }
 0x261   : > { %v6076_v27 = vpop.f32.mrb[64].mxu0 }
 0x262   : > { %9482 = vst [vmem:[#allocation71_spill] sm:$0xff] %v6076_v27  ;;  %v1781_v34 = vmax.f32 %v1779_v5, %v6076_v27  ;;  %v6079_v54 = vpop.f32.mrb[65].mxu0  ;;  %v6095_v27 = vpop.f32.mrb[3].mxu1 }
 0x263   : > { %9483 = vst [vmem:[#allocation72_spill] sm:$0xff] %v6079_v54  ;;  %v1914_v42 = vmax.f32 %v1912_v16, %v6079_v54  ;;  %v6085_v39 = vpop.f32.mrb[66].mxu0  ;;  %9489 = vst [vmem:[#allocation78_spill] sm:$0xff] %v6095_v27  ;;  %v1976_v16 = vmax.f32 %v6095_v27, %v6087_v49  ;;  %v6101_v54 = vpop.f32.mrb[4].mxu1  ;;  %v4489_v27 = vld [vmem:[%s5739_s0 + $0x160] sm:$0xff]  }
 0x264   : > { %9485 = vst [vmem:[#allocation74_spill] sm:$0xff] %v6085_v39  ;;  %v1782_v31 = vmax.f32 %v1780_v21, %v6085_v39  ;;  %v6090_v46 = vpop.f32.mrb[67].mxu0  ;;  %9490 = vst [vmem:[#allocation79_spill] sm:$0xff] %v6101_v54  ;;  %v6104_v21 = vpop.f32.mrb[5].mxu1  ;;  %v1845_v39 = vmax.f32 %v1843_v12, %v6101_v54 }
 0x265   : > { %9487 = vst [vmem:[#allocation76_spill] sm:$0xff] %v6090_v46  ;;  %v1915_v5 = vmax.f32 %v1913_v51, %v6090_v46  ;;  %9492 = vst [vmem:[#allocation80_spill] sm:$0xff] %v6104_v21  ;;  %v1978_v19 = vmax.f32 %v1976_v16, %v6104_v21  ;;  %v6108_v51 = vpop.f32.mrb[6].mxu1 }
 0x266   : > { %1540 = vmatmul.mubr.bf16.gmra.mrb[172].mxu0 %v4487_v36  ;;  %9493 = vst [vmem:[#allocation81_spill] sm:$0xff] %v6108_v51  ;;  %v6112_v36 = vpop.f32.mrb[7].mxu1  ;;  %v1847_v49 = vmax.f32 %v1845_v39, %v6108_v51 }
 0x267   : > { %1549 = vmatprep.mubr.bf16.mxu0 %v9491_v63  ;;  %9495 = vst [vmem:[#allocation83_spill] sm:$0xff] %v6112_v36  ;;  %v1980_v9 = vmax.f32 %v1978_v19, %v6112_v36  ;;  %v6120_v3 = vpop.f32.mrb[8].mxu1 }
 0x268   : > { %9497 = vst [vmem:[#allocation85_spill] sm:$0xff] %v6120_v3  ;;  %v6125_v21 = vpop.f32.mrb[9].mxu1 }
 0x269   : > { %v6110_v46 = vpop.f32.mrb[68].mxu0  ;;  %9499 = vst [vmem:[#allocation87_spill] sm:$0xff] %v6125_v21  ;;  %v6132_v52 = vpop.f32.mrb[10].mxu1 }
 0x26a   : > { %9494 = vst [vmem:[#allocation82_spill] sm:$0xff] %v6110_v46  ;;  %v1783_v0 = vmax.f32 %v1781_v34, %v6110_v46  ;;  %v6115_v24 = vpop.f32.mrb[69].mxu0  ;;  %v1849_v34 = vmax.f32 %v1847_v49, %v6120_v3  ;;  %v1982_v46 = vmax.f32 %v1980_v9, %v6125_v21  ;;  %9501 = vst [vmem:[#allocation89_spill] sm:$0xff] %v6132_v52  ;;  %v6135_v39 = vpop.f32.mrb[11].mxu1 }
 0x26b   : > { %9496 = vst [vmem:[#allocation84_spill] sm:$0xff] %v6115_v24  ;;  %v1916_v12 = vmax.f32 %v1914_v42, %v6115_v24  ;;  %v6123_v16 = vpop.f32.mrb[70].mxu0  ;;  %9502 = vst [vmem:[#allocation90_spill] sm:$0xff] %v6135_v39  ;;  %v6139_v51 = vpop.f32.mrb[12].mxu1 }
 0x26c   : > { %9498 = vst [vmem:[#allocation86_spill] sm:$0xff] %v6123_v16  ;;  %v1784_v54 = vmax.f32 %v1782_v31, %v6123_v16  ;;  %v6128_v56 = vpop.f32.mrb[71].mxu0  ;;  %v1851_v42 = vmax.f32 %v1849_v34, %v6132_v52  ;;  %v1984_v36 = vmax.f32 %v1982_v46, %v6135_v39  ;;  %9503 = vst [vmem:[#allocation91_spill] sm:$0xff] %v6139_v51  ;;  %v6142_v31 = vpop.f32.mrb[13].mxu1  ;;  %v4491_v46 = vld [vmem:[%s5739_s0 + $0x168] sm:$0xff]  }
 0x26d   : > { %9500 = vst [vmem:[#allocation88_spill] sm:$0xff] %v6128_v56  ;;  %v1917_v19 = vmax.f32 %v1915_v5, %v6128_v56  ;;  %9504 = vst [vmem:[#allocation92_spill] sm:$0xff] %v6142_v31  ;;  %v6146_v21 = vpop.f32.mrb[14].mxu1 }
 0x26e   : > { %1550 = vmatmul.mubr.bf16.gmra.mrb[176].mxu0 %v4489_v27  ;;  %v1853_v9 = vmax.f32 %v1851_v42, %v6139_v51  ;;  %v1986_v49 = vmax.f32 %v1984_v36, %v6142_v31  ;;  %9505 = vst [vmem:[#allocation93_spill] sm:$0xff] %v6146_v21  ;;  %v6150_v3 = vpop.f32.mrb[15].mxu1 }
 0x26f   : > { %1559 = vmatprep.mubr.bf16.mxu0 %v9491_v63  ;;  %9507 = vst [vmem:[#allocation95_spill] sm:$0xff] %v6150_v3  ;;  %v6158_v56 = vpop.f32.mrb[16].mxu1 }
 0x270   : > { %v1844_v39 = vmax.f32 %v6146_v21, %v1853_v9  ;;  %v1977_v52 = vmax.f32 %v6150_v3, %v1986_v49  ;;  %9509 = vst [vmem:[#allocation97_spill] sm:$0xff] %v6158_v56  ;;  %v6163_v31 = vpop.f32.mrb[17].mxu1 }
 0x271   : > { %v6148_v5 = vpop.f32.mrb[72].mxu0  ;;  %9511 = vst [vmem:[#allocation99_spill] sm:$0xff] %v6163_v31  ;;  %v6170_v24 = vpop.f32.mrb[18].mxu1 }
 0x272   : > { %9506 = vst [vmem:[#allocation94_spill] sm:$0xff] %v6148_v5  ;;  %v1785_v27 = vmax.f32 %v1783_v0, %v6148_v5  ;;  %v6153_v34 = vpop.f32.mrb[73].mxu0  ;;  %v1846_v0 = vmax.f32 %v1844_v39, %v6158_v56  ;;  %v1979_v5 = vmax.f32 %v1977_v52, %v6163_v31  ;;  %9513 = vst [vmem:[#allocation101_spill] sm:$0xff] %v6170_v24  ;;  %v6173_v49 = vpop.f32.mrb[19].mxu1 }
 0x273   : > { %9508 = vst [vmem:[#allocation96_spill] sm:$0xff] %v6153_v34  ;;  %v1918_v42 = vmax.f32 %v1916_v12, %v6153_v34  ;;  %v6161_v36 = vpop.f32.mrb[74].mxu0  ;;  %9514 = vst [vmem:[#allocation102_spill] sm:$0xff] %v6173_v49  ;;  %v6177_v21 = vpop.f32.mrb[20].mxu1 }
 0x274   : > { %9510 = vst [vmem:[#allocation98_spill] sm:$0xff] %v6161_v36  ;;  %v1786_v51 = vmax.f32 %v1784_v54, %v6161_v36  ;;  %v6166_v16 = vpop.f32.mrb[75].mxu0  ;;  %v1848_v12 = vmax.f32 %v1846_v0, %v6170_v24  ;;  %v1981_v3 = vmax.f32 %v1979_v5, %v6173_v49  ;;  %9515 = vst [vmem:[#allocation103_spill] sm:$0xff] %v6177_v21  ;;  %v6180_v54 = vpop.f32.mrb[21].mxu1  ;;  %v4493_v5 = vld [vmem:[%s5739_s0 + $0x170] sm:$0xff]  }
 0x275   : > { %9512 = vst [vmem:[#allocation100_spill] sm:$0xff] %v6166_v16  ;;  %v1919_v9 = vmax.f32 %v1917_v19, %v6166_v16  ;;  %9516 = vst [vmem:[#allocation104_spill] sm:$0xff] %v6180_v54  ;;  %v6184_v31 = vpop.f32.mrb[22].mxu1 }
 0x276   : > { %1560 = vmatmul.mubr.bf16.gmra.mrb[180].mxu0 %v4491_v46  ;;  %v1850_v52 = vmax.f32 %v1848_v12, %v6177_v21  ;;  %v1983_v39 = vmax.f32 %v1981_v3, %v6180_v54  ;;  %9517 = vst [vmem:[#allocation105_spill] sm:$0xff] %v6184_v31  ;;  %v6188_v56 = vpop.f32.mrb[23].mxu1 }
 0x277   : > { %1569 = vmatprep.mubr.bf16.mxu0 %v9491_v63  ;;  %9519 = vst [vmem:[#allocation107_spill] sm:$0xff] %v6188_v56  ;;  %v6196_v24 = vpop.f32.mrb[24].mxu1 }
 0x278   : > { %v1852_v49 = vmax.f32 %v1850_v52, %v6184_v31  ;;  %v1985_v63 = vmax.f32 %v1983_v39, %v6188_v56  ;;  %9521 = vst [vmem:[#allocation109_spill] sm:$0xff] %v6196_v24  ;;  %v6201_v54 = vpop.f32.mrb[25].mxu1 }
 0x279   : > { %v6186_v19 = vpop.f32.mrb[76].mxu0  ;;  %9523 = vst [vmem:[#allocation111_spill] sm:$0xff] %v6201_v54  ;;  %v6208_v36 = vpop.f32.mrb[26].mxu1 }
 0x27a   : > { %9518 = vst [vmem:[#allocation106_spill] sm:$0xff] %v6186_v19  ;;  %v1787_v46 = vmax.f32 %v1785_v27, %v6186_v19  ;;  %v6191_v0 = vpop.f32.mrb[77].mxu0  ;;  %v1854_v27 = vmax.f32 %v1852_v49, %v6196_v24  ;;  %v1987_v19 = vmax.f32 %v1985_v63, %v6201_v54  ;;  %9525 = vst [vmem:[#allocation113_spill] sm:$0xff] %v6208_v36  ;;  %v6211_v39 = vpop.f32.mrb[27].mxu1 }
 0x27b   : > { %9520 = vst [vmem:[#allocation108_spill] sm:$0xff] %v6191_v0  ;;  %v1920_v12 = vmax.f32 %v1918_v42, %v6191_v0  ;;  %v6199_v3 = vpop.f32.mrb[78].mxu0  ;;  %9526 = vst [vmem:[#allocation114_spill] sm:$0xff] %v6211_v39  ;;  %v6215_v31 = vpop.f32.mrb[28].mxu1 }
 0x27c   : > { %9522 = vst [vmem:[#allocation110_spill] sm:$0xff] %v6199_v3  ;;  %v1788_v21 = vmax.f32 %v1786_v51, %v6199_v3  ;;  %v6204_v16 = vpop.f32.mrb[79].mxu0  ;;  %v1855_v42 = vmax.f32 %v6208_v36, %v1854_v27  ;;  %v1989_v56 = vmax.f32 %v1987_v19, %v6211_v39  ;;  %9527 = vst [vmem:[#allocation115_spill] sm:$0xff] %v6215_v31  ;;  %v6217_v51 = vpop.f32.mrb[29].mxu1 }
 0x27d   : > { %9524 = vst [vmem:[#allocation112_spill] sm:$0xff] %v6204_v16  ;;  %v1921_v52 = vmax.f32 %v1919_v9, %v6204_v16  ;;  %9528 = vst [vmem:[#allocation116_spill] sm:$0xff] %v6217_v51  ;;  %v6221_v63 = vpop.f32.mrb[30].mxu1 }
 0x27e   : > { %1570 = vmatmul.mubr.bf16.gmra.mrb[184].mxu0 %v4493_v5  ;;  %v1857_v3 = vmax.f32 %v1855_v42, %v6215_v31  ;;  %v1988_v49 = vmax.f32 %v6217_v51, %v1989_v56  ;;  %9529 = vst [vmem:[#allocation117_spill] sm:$0xff] %v6221_v63  ;;  %v6225_v9 = vpop.f32.mrb[31].mxu1 }
 0x27f   : > { %9531 = vst [vmem:[#allocation119_spill] sm:$0xff] %v6225_v9  ;;  %v6232_v39 = vpop.f32.mrb[32].mxu1 }
 0x280   : > { %v1859_v19 = vmax.f32 %v1857_v3, %v6221_v63  ;;  %v1990_v27 = vmax.f32 %v1988_v49, %v6225_v9  ;;  %9533 = vst [vmem:[#allocation121_spill] sm:$0xff] %v6232_v39  ;;  %v6237_v56 = vpop.f32.mrb[33].mxu1 }
 0x281   : > { %v6223_v54 = vpop.f32.mrb[80].mxu0  ;;  %9535 = vst [vmem:[#allocation123_spill] sm:$0xff] %v6237_v56  ;;  %v6244_v16 = vpop.f32.mrb[34].mxu1 }
 0x282   : > { %9530 = vst [vmem:[#allocation118_spill] sm:$0xff] %v6223_v54  ;;  %v1789_v5 = vmax.f32 %v1787_v46, %v6223_v54  ;;  %v6228_v24 = vpop.f32.mrb[81].mxu0  ;;  %v1861_v46 = vmax.f32 %v1859_v19, %v6232_v39  ;;  %v1992_v54 = vmax.f32 %v1990_v27, %v6237_v56  ;;  %9537 = vst [vmem:[#allocation125_spill] sm:$0xff] %v6244_v16  ;;  %v6247_v49 = vpop.f32.mrb[35].mxu1 }
 0x283   : > { %9532 = vst [vmem:[#allocation120_spill] sm:$0xff] %v6228_v24  ;;  %v1922_v42 = vmax.f32 %v1920_v12, %v6228_v24  ;;  %v6235_v31 = vpop.f32.mrb[82].mxu0  ;;  %9538 = vst [vmem:[#allocation126_spill] sm:$0xff] %v6247_v49  ;;  %v6251_v63 = vpop.f32.mrb[36].mxu1 }
 0x284   : > { %9534 = vst [vmem:[#allocation122_spill] sm:$0xff] %v6235_v31  ;;  %v1790_v51 = vmax.f32 %v1788_v21, %v6235_v31  ;;  %v6240_v36 = vpop.f32.mrb[83].mxu0  ;;  %v1863_v12 = vmax.f32 %v1861_v46, %v6244_v16  ;;  %v1994_v9 = vmax.f32 %v1992_v54, %v6247_v49  ;;  %9539 = vst [vmem:[#allocation127_spill] sm:$0xff] %v6251_v63  ;;  %v6253_v24 = vpop.f32.mrb[37].mxu1 }
 0x285   : > { %9536 = vst [vmem:[#allocation124_spill] sm:$0xff] %v6240_v36  ;;  %v1923_v3 = vmax.f32 %v1921_v52, %v6240_v36  ;;  %9540 = vst [vmem:[#allocation128_spill] sm:$0xff] %v6253_v24  ;;  %v6257_v39 = vpop.f32.mrb[38].mxu1 }
 0x286   : > { %v1865_v21 = vmax.f32 %v1863_v12, %v6251_v63  ;;  %v1996_v19 = vmax.f32 %v1994_v9, %v6253_v24  ;;  %9541 = vst [vmem:[#allocation129_spill] sm:$0xff] %v6257_v39  ;;  %v6261_v56 = vpop.f32.mrb[39].mxu1 }
 0x287   : > { %9543 = vst [vmem:[#allocation131_spill] sm:$0xff] %v6261_v56  ;;  %v6268_v49 = vpop.f32.mrb[40].mxu1 }
 0x288   : > { %v1867_v54 = vmax.f32 %v1865_v21, %v6257_v39  ;;  %v1998_v46 = vmax.f32 %v1996_v19, %v6261_v56  ;;  %9545 = vst [vmem:[#allocation133_spill] sm:$0xff] %v6268_v49  ;;  %v6273_v9 = vpop.f32.mrb[41].mxu1 }
 0x289   : > { %v6259_v27 = vpop.f32.mrb[84].mxu0  ;;  %9547 = vst [vmem:[#allocation135_spill] sm:$0xff] %v6273_v9  ;;  %v6280_v31 = vpop.f32.mrb[42].mxu1 }
 0x28a   : > { %9542 = vst [vmem:[#allocation130_spill] sm:$0xff] %v6259_v27  ;;  %v1791_v52 = vmax.f32 %v1789_v5, %v6259_v27  ;;  %v6264_v36 = vpop.f32.mrb[85].mxu0  ;;  %v1869_v5 = vmax.f32 %v1867_v54, %v6268_v49  ;;  %v2000_v27 = vmax.f32 %v1998_v46, %v6273_v9  ;;  %9549 = vst [vmem:[#allocation137_spill] sm:$0xff] %v6280_v31  ;;  %v6283_v19 = vpop.f32.mrb[43].mxu1 }
 0x28b   : > { %9544 = vst [vmem:[#allocation132_spill] sm:$0xff] %v6264_v36  ;;  %v1924_v12 = vmax.f32 %v1922_v42, %v6264_v36  ;;  %v6271_v63 = vpop.f32.mrb[86].mxu0  ;;  %9550 = vst [vmem:[#allocation138_spill] sm:$0xff] %v6283_v19  ;;  %v6287_v39 = vpop.f32.mrb[44].mxu1 }
 0x28c   : > { %9546 = vst [vmem:[#allocation134_spill] sm:$0xff] %v6271_v63  ;;  %v1792_v24 = vmax.f32 %v1790_v51, %v6271_v63  ;;  %v6276_v16 = vpop.f32.mrb[87].mxu0  ;;  %v1856_v42 = vmax.f32 %v6280_v31, %v1869_v5  ;;  %v2002_v56 = vmax.f32 %v2000_v27, %v6283_v19  ;;  %9551 = vst [vmem:[#allocation139_spill] sm:$0xff] %v6287_v39  ;;  %v6289_v36 = vpop.f32.mrb[45].mxu1 }
 0x28d   : > { %9548 = vst [vmem:[#allocation136_spill] sm:$0xff] %v6276_v16  ;;  %v1925_v21 = vmax.f32 %v1923_v3, %v6276_v16  ;;  %9552 = vst [vmem:[#allocation140_spill] sm:$0xff] %v6289_v36  ;;  %v6293_v49 = vpop.f32.mrb[46].mxu1 }
 0x28e   : > { %v1858_v51 = vmax.f32 %v1856_v42, %v6287_v39  ;;  %v1991_v54 = vmax.f32 %v6289_v36, %v2002_v56  ;;  %9553 = vst [vmem:[#allocation141_spill] sm:$0xff] %v6293_v49  ;;  %v6297_v9 = vpop.f32.mrb[47].mxu1 }
 0x28f   : > { %9555 = vst [vmem:[#allocation143_spill] sm:$0xff] %v6297_v9  ;;  %v6304_v19 = vpop.f32.mrb[48].mxu1 }
 0x290   : > { %v1860_v27 = vmax.f32 %v1858_v51, %v6293_v49  ;;  %v1993_v5 = vmax.f32 %v1991_v54, %v6297_v9  ;;  %9557 = vst [vmem:[#allocation145_spill] sm:$0xff] %v6304_v19  ;;  %v6309_v56 = vpop.f32.mrb[49].mxu1 }
 0x291   : > { %v6295_v46 = vpop.f32.mrb[88].mxu0  ;;  %9559 = vst [vmem:[#allocation147_spill] sm:$0xff] %v6309_v56 }
 0x292   : > { %9554 = vst [vmem:[#allocation142_spill] sm:$0xff] %v6295_v46  ;;  %v1793_v3 = vmax.f32 %v1791_v52, %v6295_v46  ;;  %v6300_v16 = vpop.f32.mrb[89].mxu0  ;;  %v6315_v52 = vmax.f32 %v1860_v27, %v6304_v19  ;;  %v6318_v46 = vmax.f32 %v1993_v5, %v6309_v56 }
 0x293   : > { %9556 = vst [vmem:[#allocation144_spill] sm:$0xff] %v6300_v16  ;;  %v1926_v42 = vmax.f32 %v1924_v12, %v6300_v16  ;;  %v6307_v39 = vpop.f32.mrb[90].mxu0 }
 0x294   : > { %9558 = vst [vmem:[#allocation146_spill] sm:$0xff] %v6307_v39  ;;  %v1794_v36 = vmax.f32 %v1792_v24, %v6307_v39  ;;  %v6312_v31 = vpop.f32.mrb[91].mxu0 }
 0x295   : > { %9560 = vst [vmem:[#allocation148_spill] sm:$0xff] %v6312_v31  ;;  %v1927_v51 = vmax.f32 %v1925_v21, %v6312_v31 }
 0x299   : > { %v6321_v54 = vpop.f32.mrb[92].mxu0 }
 0x29a   : > { %9561 = vst [vmem:[#allocation149_spill] sm:$0xff] %v6321_v54  ;;  %v1795_v12 = vmax.f32 %v1793_v3, %v6321_v54  ;;  %v6324_v9 = vpop.f32.mrb[93].mxu0  ;;  %v6392_v54 = vpop.f32.mrb[50].mxu1 }
 0x29b   : > { %9562 = vst [vmem:[#allocation150_spill] sm:$0xff] %v6324_v9  ;;  %v1928_v49 = vmax.f32 %v1926_v42, %v6324_v9  ;;  %v6327_v16 = vpop.f32.mrb[94].mxu0  ;;  %9585 = vst [vmem:[#allocation173_spill] sm:$0xff] %v6392_v54 }
 0x29c   : > { %9563 = vst [vmem:[#allocation151_spill] sm:$0xff] %v6327_v16  ;;  %v1796_v24 = vmax.f32 %v1794_v36, %v6327_v16  ;;  %v6330_v39 = vpop.f32.mrb[95].mxu0 }
 0x29d   : > { %9564 = vst [vmem:[#allocation152_spill] sm:$0xff] %v6330_v39  ;;  %v1929_v27 = vmax.f32 %v1927_v51, %v6330_v39 }
 0x2a1   : > { %v6333_v5 = vpop.f32.mrb[96].mxu0 }
 0x2a2   : > { %9565 = vst [vmem:[#allocation153_spill] sm:$0xff] %v6333_v5  ;;  %v1797_v21 = vmax.f32 %v1795_v12, %v6333_v5  ;;  %v6336_v56 = vpop.f32.mrb[97].mxu0 }
 0x2a3   : > { %9566 = vst [vmem:[#allocation154_spill] sm:$0xff] %v6336_v56  ;;  %v1930_v3 = vmax.f32 %v1928_v49, %v6336_v56  ;;  %v6339_v19 = vpop.f32.mrb[98].mxu0 }
 0x2a4   : > { %9567 = vst [vmem:[#allocation155_spill] sm:$0xff] %v6339_v19  ;;  %v1798_v42 = vmax.f32 %v1796_v24, %v6339_v19  ;;  %v6342_v9 = vpop.f32.mrb[99].mxu0 }
 0x2a5   : > { %9568 = vst [vmem:[#allocation156_spill] sm:$0xff] %v6342_v9  ;;  %v1931_v36 = vmax.f32 %v1929_v27, %v6342_v9 }
 0x2a9   : > { %v6345_v16 = vpop.f32.mrb[100].mxu0 }
 0x2aa   : > { %9569 = vst [vmem:[#allocation157_spill] sm:$0xff] %v6345_v16  ;;  %v1799_v51 = vmax.f32 %v1797_v21, %v6345_v16  ;;  %v6348_v39 = vpop.f32.mrb[101].mxu0 }
 0x2ab   : > { %9570 = vst [vmem:[#allocation158_spill] sm:$0xff] %v6348_v39  ;;  %v1932_v12 = vmax.f32 %v1930_v3, %v6348_v39  ;;  %v6351_v5 = vpop.f32.mrb[102].mxu0 }
 0x2ac   : > { %9571 = vst [vmem:[#allocation159_spill] sm:$0xff] %v6351_v5  ;;  %v1800_v49 = vmax.f32 %v1798_v42, %v6351_v5  ;;  %v6354_v56 = vpop.f32.mrb[103].mxu0 }
 0x2ad   : > { %9572 = vst [vmem:[#allocation160_spill] sm:$0xff] %v6354_v56  ;;  %v1933_v24 = vmax.f32 %v1931_v36, %v6354_v56 }
 0x2b1   : > { %v6357_v19 = vpop.f32.mrb[104].mxu0 }
 0x2b2   : > { %9573 = vst [vmem:[#allocation161_spill] sm:$0xff] %v6357_v19  ;;  %v1801_v27 = vmax.f32 %v1799_v51, %v6357_v19  ;;  %v6360_v9 = vpop.f32.mrb[105].mxu0 }
 0x2b3   : > { %9574 = vst [vmem:[#allocation162_spill] sm:$0xff] %v6360_v9  ;;  %v1934_v21 = vmax.f32 %v1932_v12, %v6360_v9  ;;  %v6363_v16 = vpop.f32.mrb[106].mxu0 }
 0x2b4   : > { %9575 = vst [vmem:[#allocation163_spill] sm:$0xff] %v6363_v16  ;;  %v1802_v3 = vmax.f32 %v1800_v49, %v6363_v16  ;;  %v6366_v39 = vpop.f32.mrb[107].mxu0 }
 0x2b5   : > { %9576 = vst [vmem:[#allocation164_spill] sm:$0xff] %v6366_v39  ;;  %v1935_v42 = vmax.f32 %v1933_v24, %v6366_v39 }
 0x2b9   : > { %v6369_v5 = vpop.f32.mrb[108].mxu0 }
 0x2ba   : > { %9577 = vst [vmem:[#allocation165_spill] sm:$0xff] %v6369_v5  ;;  %v1803_v36 = vmax.f32 %v1801_v27, %v6369_v5  ;;  %v6372_v56 = vpop.f32.mrb[109].mxu0 }
 0x2bb   : > { %9578 = vst [vmem:[#allocation166_spill] sm:$0xff] %v6372_v56  ;;  %v1936_v51 = vmax.f32 %v1934_v21, %v6372_v56  ;;  %v6375_v19 = vpop.f32.mrb[110].mxu0 }
 0x2bc   : > { %9579 = vst [vmem:[#allocation167_spill] sm:$0xff] %v6375_v19  ;;  %v1804_v12 = vmax.f32 %v1802_v3, %v6375_v19  ;;  %v6378_v9 = vpop.f32.mrb[111].mxu0  ;;  %v6395_v19 = vpop.f32.mrb[51].mxu1 }
 0x2bd   : > { %9580 = vst [vmem:[#allocation168_spill] sm:$0xff] %v6378_v9  ;;  %v1937_v49 = vmax.f32 %v1935_v42, %v6378_v9  ;;  %9586 = vst [vmem:[#allocation174_spill] sm:$0xff] %v6395_v19  ;;  %v6402_v9 = vpop.f32.mrb[52].mxu1 }
 0x2be   : > { %9589 = vst [vmem:[#allocation177_spill] sm:$0xff] %v6402_v9 }
 0x2c1   : > { %v6381_v16 = vpop.f32.mrb[112].mxu0 }
 0x2c2   : > { %9581 = vst [vmem:[#allocation169_spill] sm:$0xff] %v6381_v16  ;;  %v1805_v24 = vmax.f32 %v1803_v36, %v6381_v16  ;;  %v6384_v39 = vpop.f32.mrb[113].mxu0 }
 0x2c3   : > { %9582 = vst [vmem:[#allocation170_spill] sm:$0xff] %v6384_v39  ;;  %v1938_v27 = vmax.f32 %v1936_v51, %v6384_v39  ;;  %v6387_v5 = vpop.f32.mrb[114].mxu0 }
 0x2c4   : > { %9583 = vst [vmem:[#allocation171_spill] sm:$0xff] %v6387_v5  ;;  %v1806_v21 = vmax.f32 %v1804_v12, %v6387_v5  ;;  %v6390_v56 = vpop.f32.mrb[115].mxu0  ;;  %v6407_v12 = vpop.f32.mrb[53].mxu1 }
 0x2c5   : > { %9584 = vst [vmem:[#allocation172_spill] sm:$0xff] %v6390_v56  ;;  %v1939_v3 = vmax.f32 %v1937_v49, %v6390_v56  ;;  %9591 = vst [vmem:[#allocation179_spill] sm:$0xff] %v6407_v12  ;;  %v6412_v49 = vpop.f32.mrb[54].mxu1 }
 0x2c6   : > { %9593 = vst [vmem:[#allocation181_spill] sm:$0xff] %v6412_v49  ;;  %v6415_v63 = vpop.f32.mrb[55].mxu1 }
 0x2c7   : > { %9594 = vst [vmem:[#allocation182_spill] sm:$0xff] %v6415_v63 }
 0x2c9   : > { %v6397_v42 = vpop.f32.mrb[116].mxu0 }
 0x2ca   : > { %9587 = vst [vmem:[#allocation175_spill] sm:$0xff] %v6397_v42  ;;  %v1807_v36 = vmax.f32 %v1805_v24, %v6397_v42  ;;  %v6400_v16 = vpop.f32.mrb[117].mxu0 }
 0x2cb   : > { %9588 = vst [vmem:[#allocation176_spill] sm:$0xff] %v6400_v16  ;;  %v1940_v51 = vmax.f32 %v1938_v27, %v6400_v16  ;;  %v6405_v39 = vpop.f32.mrb[118].mxu0  ;;  %v6422_v27 = vpop.f32.mrb[56].mxu1 }
 0x2cc   : > { %9590 = vst [vmem:[#allocation178_spill] sm:$0xff] %v6405_v39  ;;  %v1808_v5 = vmax.f32 %v1806_v21, %v6405_v39  ;;  %v6410_v31 = vpop.f32.mrb[119].mxu0  ;;  %9597 = vst [vmem:[#allocation185_spill] sm:$0xff] %v6422_v27  ;;  %v6427_v21 = vpop.f32.mrb[57].mxu1 }
 0x2cd   : > { %9592 = vst [vmem:[#allocation180_spill] sm:$0xff] %v6410_v31  ;;  %v1941_v56 = vmax.f32 %v1939_v3, %v6410_v31  ;;  %9599 = vst [vmem:[#allocation187_spill] sm:$0xff] %v6427_v21  ;;  %v6432_v3 = vpop.f32.mrb[58].mxu1 }
 0x2ce   : > { %9601 = vst [vmem:[#allocation189_spill] sm:$0xff] %v6432_v3  ;;  %v6435_v44 = vpop.f32.mrb[59].mxu1 }
 0x2cf   : > { %9602 = vst [vmem:[#allocation190_spill] sm:$0xff] %v6435_v44 }
 0x2d1   : > { %v6417_v24 = vpop.f32.mrb[120].mxu0 }
 0x2d2   : > { %9595 = vst [vmem:[#allocation183_spill] sm:$0xff] %v6417_v24  ;;  %v1809_v42 = vmax.f32 %v1807_v36, %v6417_v24  ;;  %v6420_v0 = vpop.f32.mrb[121].mxu0 }
 0x2d3   : > { %9596 = vst [vmem:[#allocation184_spill] sm:$0xff] %v6420_v0  ;;  %v1942_v16 = vmax.f32 %v1940_v51, %v6420_v0  ;;  %v6425_v34 = vpop.f32.mrb[122].mxu0  ;;  %v6442_v51 = vpop.f32.mrb[60].mxu1 }
 0x2d4   : > { %9598 = vst [vmem:[#allocation186_spill] sm:$0xff] %v6425_v34  ;;  %v1810_v39 = vmax.f32 %v1808_v5, %v6425_v34  ;;  %v6430_v47 = vpop.f32.mrb[123].mxu0  ;;  %9605 = vst [vmem:[#allocation193_spill] sm:$0xff] %v6442_v51  ;;  %v6447_v5 = vpop.f32.mrb[61].mxu1 }
 0x2d5   : > { %9600 = vst [vmem:[#allocation188_spill] sm:$0xff] %v6430_v47  ;;  %v1943_v31 = vmax.f32 %v1941_v56, %v6430_v47  ;;  %9607 = vst [vmem:[#allocation195_spill] sm:$0xff] %v6447_v5  ;;  %v6452_v56 = vpop.f32.mrb[62].mxu1 }
 0x2d6   : > { %9609 = vst [vmem:[#allocation197_spill] sm:$0xff] %v6452_v56  ;;  %v6455_v29 = vpop.f32.mrb[63].mxu1 }
 0x2d7   : > { %9610 = vst [vmem:[#allocation198_spill] sm:$0xff] %v6455_v29 }
 0x2d9   : > { %v6437_v36 = vpop.f32.mrb[124].mxu0 }
 0x2da   : > { %9603 = vst [vmem:[#allocation191_spill] sm:$0xff] %v6437_v36  ;;  %v1811_v24 = vmax.f32 %v1809_v42, %v6437_v36  ;;  %v6440_v41 = vpop.f32.mrb[125].mxu0 }
 0x2db   : > { %9604 = vst [vmem:[#allocation192_spill] sm:$0xff] %v6440_v41  ;;  %v1944_v0 = vmax.f32 %v1942_v16, %v6440_v41  ;;  %v6445_v37 = vpop.f32.mrb[126].mxu0  ;;  %v6462_v16 = vpop.f32.mrb[64].mxu1 }
 0x2dc   : > { %9606 = vst [vmem:[#allocation194_spill] sm:$0xff] %v6445_v37  ;;  %v1812_v34 = vmax.f32 %v1810_v39, %v6445_v37  ;;  %v6450_v32 = vpop.f32.mrb[127].mxu0  ;;  %9613 = vst [vmem:[#allocation201_spill] sm:$0xff] %v6462_v16  ;;  %v6467_v39 = vpop.f32.mrb[65].mxu1 }
 0x2dd   : > { %9608 = vst [vmem:[#allocation196_spill] sm:$0xff] %v6450_v32  ;;  %v1945_v47 = vmax.f32 %v1943_v31, %v6450_v32  ;;  %9615 = vst [vmem:[#allocation203_spill] sm:$0xff] %v6467_v39  ;;  %v6472_v31 = vpop.f32.mrb[66].mxu1 }
 0x2de   : > { %9617 = vst [vmem:[#allocation205_spill] sm:$0xff] %v6472_v31  ;;  %v6475_v14 = vpop.f32.mrb[67].mxu1 }
 0x2e1   : > { %v6457_v42 = vpop.f32.mrb[128].mxu0 }
 0x2e2   : > { %9611 = vst [vmem:[#allocation199_spill] sm:$0xff] %v6457_v42  ;;  %v1813_v36 = vmax.f32 %v1811_v24, %v6457_v42  ;;  %v6460_v26 = vpop.f32.mrb[129].mxu0 }
 0x2e3   : > { %9612 = vst [vmem:[#allocation200_spill] sm:$0xff] %v6460_v26  ;;  %v1946_v41 = vmax.f32 %v1944_v0, %v6460_v26  ;;  %v6465_v22 = vpop.f32.mrb[130].mxu0 }
 0x2e4   : > { %9614 = vst [vmem:[#allocation202_spill] sm:$0xff] %v6465_v22  ;;  %v1814_v37 = vmax.f32 %v1812_v34, %v6465_v22  ;;  %v6470_v17 = vpop.f32.mrb[131].mxu0 }
 0x2e5   : > { %9616 = vst [vmem:[#allocation204_spill] sm:$0xff] %v6470_v17  ;;  %v1947_v32 = vmax.f32 %v1945_v47, %v6470_v17 }
 0x2e9   : > { %v6477_v24 = vpop.f32.mrb[132].mxu0 }
 0x2ea   : > { %9618 = vst [vmem:[#allocation206_spill] sm:$0xff] %v6477_v24  ;;  %v1815_v42 = vmax.f32 %v1813_v36, %v6477_v24  ;;  %v6480_v11 = vpop.f32.mrb[133].mxu0 }
 0x2eb   : > { %9619 = vst [vmem:[#allocation207_spill] sm:$0xff] %v6480_v11  ;;  %v1948_v0 = vmax.f32 %v1946_v41, %v6480_v11  ;;  %v6483_v26 = vpop.f32.mrb[134].mxu0 }
 0x2ec   : > { %9620 = vst [vmem:[#allocation208_spill] sm:$0xff] %v6483_v26  ;;  %v1816_v34 = vmax.f32 %v1814_v37, %v6483_v26  ;;  %v6486_v22 = vpop.f32.mrb[135].mxu0 }
 0x2ed   : > { %9621 = vst [vmem:[#allocation209_spill] sm:$0xff] %v6486_v22  ;;  %v1949_v7 = vmax.f32 %v1947_v32, %v6486_v22  ;;  %v5330_v22 = vmov -inf  }
 0x2ee   : > { %448 = vst.msk [vmem:[#allocation2] sm:$0x3] %vm6501_vm0, %v5330_v22 }
 0x2f1   : > { %v6489_v2 = vpop.f32.mrb[136].mxu0 }
 0x2f2   : > { %9622 = vst [vmem:[#allocation210_spill] sm:$0xff] %v6489_v2  ;;  %v1817_v47 = vmax.f32 %v1815_v42, %v6489_v2  ;;  %v6492_v17 = vpop.f32.mrb[137].mxu0 }
 0x2f3   : > { %9623 = vst [vmem:[#allocation211_spill] sm:$0xff] %v6492_v17  ;;  %v1950_v36 = vmax.f32 %v1948_v0, %v6492_v17  ;;  %v6495_v24 = vpop.f32.mrb[138].mxu0 }
 0x2f4   : > { %9624 = vst [vmem:[#allocation212_spill] sm:$0xff] %v6495_v24  ;;  %v1818_v41 = vmax.f32 %v1816_v34, %v6495_v24  ;;  %v6498_v11 = vpop.f32.mrb[139].mxu0 }
 0x2f5   : > { %9625 = vst [vmem:[#allocation213_spill] sm:$0xff] %v6498_v11  ;;  %v1951_v32 = vmax.f32 %v1949_v7, %v6498_v11 }
 0x2f9   : > { %v6508_v42 = vpop.f32.mrb[140].mxu0 }
 0x2fa   : > { %9628 = vst [vmem:[#allocation214_spill] sm:$0xff] %v6508_v42  ;;  %v1819_v0 = vmax.f32 %v1817_v47, %v6508_v42  ;;  %v6511_v17 = vpop.f32.mrb[141].mxu0 }
 0x2fb   : > { %9629 = vst [vmem:[#allocation215_spill] sm:$0xff] %v6511_v17  ;;  %v1952_v34 = vmax.f32 %v1950_v36, %v6511_v17  ;;  %v6514_v24 = vpop.f32.mrb[142].mxu0 }
 0x2fc   : > { %9630 = vst [vmem:[#allocation216_spill] sm:$0xff] %v6514_v24  ;;  %v1820_v59 = vmax.f32 %v1818_v41, %v6514_v24  ;;  %v6517_v2 = vpop.f32.mrb[143].mxu0 }
 0x2fd   : > { %9631 = vst [vmem:[#allocation217_spill] sm:$0xff] %v6517_v2  ;;  %v1953_v7 = vmax.f32 %v1951_v32, %v6517_v2 }
 0x301   : > { %v6520_v11 = vpop.f32.mrb[144].mxu0 }
 0x302   : > { %9632 = vst [vmem:[#allocation218_spill] sm:$0xff] %v6520_v11  ;;  %v1821_v22 = vmax.f32 %v1819_v0, %v6520_v11  ;;  %v6523_v26 = vpop.f32.mrb[145].mxu0 }
 0x303   : > { %9633 = vst [vmem:[#allocation219_spill] sm:$0xff] %v6523_v26  ;;  %v1954_v47 = vmax.f32 %v1952_v34, %v6523_v26  ;;  %v6526_v42 = vpop.f32.mrb[146].mxu0 }
 0x304   : > { %9634 = vst [vmem:[#allocation220_spill] sm:$0xff] %v6526_v42  ;;  %v1822_v36 = vmax.f32 %v1820_v59, %v6526_v42  ;;  %v6529_v17 = vpop.f32.mrb[147].mxu0 }
 0x305   : > { %9635 = vst [vmem:[#allocation221_spill] sm:$0xff] %v6529_v17  ;;  %v1955_v41 = vmax.f32 %v1953_v7, %v6529_v17 }
 0x309   : > { %v6532_v24 = vpop.f32.mrb[148].mxu0 }
 0x30a   : > { %9636 = vst [vmem:[#allocation222_spill] sm:$0xff] %v6532_v24  ;;  %v1823_v32 = vmax.f32 %v1821_v22, %v6532_v24  ;;  %v6535_v2 = vpop.f32.mrb[149].mxu0 }
 0x30b   : > { %9637 = vst [vmem:[#allocation223_spill] sm:$0xff] %v6535_v2  ;;  %v1956_v0 = vmax.f32 %v1954_v47, %v6535_v2  ;;  %v6538_v11 = vpop.f32.mrb[150].mxu0 }
 0x30c   : > { %9638 = vst [vmem:[#allocation224_spill] sm:$0xff] %v6538_v11  ;;  %v1824_v34 = vmax.f32 %v1822_v36, %v6538_v11  ;;  %v6541_v26 = vpop.f32.mrb[151].mxu0 }
 0x30d   : > { %9639 = vst [vmem:[#allocation225_spill] sm:$0xff] %v6541_v26  ;;  %v1957_v59 = vmax.f32 %v1955_v41, %v6541_v26 }
 0x311   : > { %v6544_v42 = vpop.f32.mrb[152].mxu0 }
 0x312   : > { %9640 = vst [vmem:[#allocation226_spill] sm:$0xff] %v6544_v42  ;;  %v1825_v7 = vmax.f32 %v1823_v32, %v6544_v42  ;;  %v6547_v17 = vpop.f32.mrb[153].mxu0 }
 0x313   : > { %9641 = vst [vmem:[#allocation227_spill] sm:$0xff] %v6547_v17  ;;  %v1958_v22 = vmax.f32 %v1956_v0, %v6547_v17  ;;  %v6550_v24 = vpop.f32.mrb[154].mxu0 }
 0x314   : > { %9642 = vst [vmem:[#allocation228_spill] sm:$0xff] %v6550_v24  ;;  %v1826_v47 = vmax.f32 %v1824_v34, %v6550_v24  ;;  %v6553_v2 = vpop.f32.mrb[155].mxu0 }
 0x315   : > { %9643 = vst [vmem:[#allocation229_spill] sm:$0xff] %v6553_v2  ;;  %v1959_v36 = vmax.f32 %v1957_v59, %v6553_v2 }
 0x319   : > { %v6556_v11 = vpop.f32.mrb[156].mxu0 }
 0x31a   : > { %9644 = vst [vmem:[#allocation230_spill] sm:$0xff] %v6556_v11  ;;  %v1827_v41 = vmax.f32 %v1825_v7, %v6556_v11  ;;  %v6559_v26 = vpop.f32.mrb[157].mxu0 }
 0x31b   : > { %9645 = vst [vmem:[#allocation231_spill] sm:$0xff] %v6559_v26  ;;  %v1960_v32 = vmax.f32 %v1958_v22, %v6559_v26  ;;  %v6562_v42 = vpop.f32.mrb[158].mxu0 }
 0x31c   : > { %9646 = vst [vmem:[#allocation232_spill] sm:$0xff] %v6562_v42  ;;  %v1828_v0 = vmax.f32 %v1826_v47, %v6562_v42  ;;  %v6565_v17 = vpop.f32.mrb[159].mxu0 }
 0x31d   : > { %9647 = vst [vmem:[#allocation233_spill] sm:$0xff] %v6565_v17  ;;  %v1961_v34 = vmax.f32 %v1959_v36, %v6565_v17 }
 0x321   : > { %v6568_v24 = vpop.f32.mrb[160].mxu0 }
 0x322   : > { %9648 = vst [vmem:[#allocation234_spill] sm:$0xff] %v6568_v24  ;;  %v1829_v59 = vmax.f32 %v1827_v41, %v6568_v24  ;;  %v6571_v2 = vpop.f32.mrb[161].mxu0 }
 0x323   : > { %9649 = vst [vmem:[#allocation235_spill] sm:$0xff] %v6571_v2  ;;  %v1962_v7 = vmax.f32 %v1960_v32, %v6571_v2  ;;  %v6574_v11 = vpop.f32.mrb[162].mxu0 }
 0x324   : > { %9650 = vst [vmem:[#allocation236_spill] sm:$0xff] %v6574_v11  ;;  %v1830_v22 = vmax.f32 %v1828_v0, %v6574_v11  ;;  %v6577_v26 = vpop.f32.mrb[163].mxu0 }
 0x325   : > { %9651 = vst [vmem:[#allocation237_spill] sm:$0xff] %v6577_v26  ;;  %v1963_v47 = vmax.f32 %v1961_v34, %v6577_v26 }
 0x329   : > { %v6580_v42 = vpop.f32.mrb[164].mxu0 }
 0x32a   : > { %9652 = vst [vmem:[#allocation238_spill] sm:$0xff] %v6580_v42  ;;  %v1831_v36 = vmax.f32 %v1829_v59, %v6580_v42  ;;  %v6583_v17 = vpop.f32.mrb[165].mxu0 }
 0x32b   : > { %9653 = vst [vmem:[#allocation239_spill] sm:$0xff] %v6583_v17  ;;  %v1964_v41 = vmax.f32 %v1962_v7, %v6583_v17  ;;  %v6586_v24 = vpop.f32.mrb[166].mxu0 }
 0x32c   : > { %9654 = vst [vmem:[#allocation240_spill] sm:$0xff] %v6586_v24  ;;  %v1832_v32 = vmax.f32 %v1830_v22, %v6586_v24  ;;  %v6589_v2 = vpop.f32.mrb[167].mxu0 }
 0x32d   : > { %9655 = vst [vmem:[#allocation241_spill] sm:$0xff] %v6589_v2  ;;  %v1965_v0 = vmax.f32 %v1963_v47, %v6589_v2 }
 0x331   : > { %v6592_v11 = vpop.f32.mrb[168].mxu0 }
 0x332   : > { %9656 = vst [vmem:[#allocation242_spill] sm:$0xff] %v6592_v11  ;;  %v1833_v34 = vmax.f32 %v1831_v36, %v6592_v11  ;;  %v6595_v26 = vpop.f32.mrb[169].mxu0 }
 0x333   : > { %9657 = vst [vmem:[#allocation243_spill] sm:$0xff] %v6595_v26  ;;  %v1966_v59 = vmax.f32 %v1964_v41, %v6595_v26  ;;  %v6598_v42 = vpop.f32.mrb[170].mxu0 }
 0x334   : > { %9658 = vst [vmem:[#allocation244_spill] sm:$0xff] %v6598_v42  ;;  %v1834_v7 = vmax.f32 %v1832_v32, %v6598_v42  ;;  %v6601_v17 = vpop.f32.mrb[171].mxu0 }
 0x335   : > { %9659 = vst [vmem:[#allocation245_spill] sm:$0xff] %v6601_v17  ;;  %v1967_v22 = vmax.f32 %v1965_v0, %v6601_v17 }
 0x339   : > { %v6604_v24 = vpop.f32.mrb[172].mxu0 }
 0x33a   : > { %9660 = vst [vmem:[#allocation246_spill] sm:$0xff] %v6604_v24  ;;  %v1835_v47 = vmax.f32 %v1833_v34, %v6604_v24  ;;  %v6607_v2 = vpop.f32.mrb[173].mxu0 }
 0x33b   : > { %9661 = vst [vmem:[#allocation247_spill] sm:$0xff] %v6607_v2  ;;  %v1968_v36 = vmax.f32 %v1966_v59, %v6607_v2  ;;  %v6610_v11 = vpop.f32.mrb[174].mxu0 }
 0x33c   : > { %9662 = vst [vmem:[#allocation248_spill] sm:$0xff] %v6610_v11  ;;  %v1836_v41 = vmax.f32 %v1834_v7, %v6610_v11  ;;  %v6613_v26 = vpop.f32.mrb[175].mxu0 }
 0x33d   : > { %9663 = vst [vmem:[#allocation249_spill] sm:$0xff] %v6613_v26  ;;  %v1969_v32 = vmax.f32 %v1967_v22, %v6613_v26 }
 0x341   : > { %v6616_v42 = vpop.f32.mrb[176].mxu0 }
 0x342   : > { %9664 = vst [vmem:[#allocation250_spill] sm:$0xff] %v6616_v42  ;;  %v1837_v0 = vmax.f32 %v1835_v47, %v6616_v42  ;;  %v6619_v17 = vpop.f32.mrb[177].mxu0 }
 0x343   : > { %9665 = vst [vmem:[#allocation251_spill] sm:$0xff] %v6619_v17  ;;  %v1970_v34 = vmax.f32 %v1968_v36, %v6619_v17  ;;  %v6622_v24 = vpop.f32.mrb[178].mxu0 }
 0x344   : > { %9666 = vst [vmem:[#allocation252_spill] sm:$0xff] %v6622_v24  ;;  %v1838_v59 = vmax.f32 %v1836_v41, %v6622_v24  ;;  %v6625_v2 = vpop.f32.mrb[179].mxu0 }
 0x345   : > { %9667 = vst [vmem:[#allocation253_spill] sm:$0xff] %v6625_v2  ;;  %v1971_v7 = vmax.f32 %v1969_v32, %v6625_v2 }
 0x349   : > { %v6628_v11 = vpop.f32.mrb[180].mxu0 }
 0x34a   : > { %9668 = vst [vmem:[#allocation254_spill] sm:$0xff] %v6628_v11  ;;  %v1839_v22 = vmax.f32 %v1837_v0, %v6628_v11  ;;  %v6631_v26 = vpop.f32.mrb[181].mxu0 }
 0x34b   : > { %9669 = vst [vmem:[#allocation255_spill] sm:$0xff] %v6631_v26  ;;  %v1972_v47 = vmax.f32 %v1970_v34, %v6631_v26  ;;  %v6634_v42 = vpop.f32.mrb[182].mxu0 }
 0x34c   : > { %9670 = vst [vmem:[#allocation256_spill] sm:$0xff] %v6634_v42  ;;  %v1840_v36 = vmax.f32 %v1838_v59, %v6634_v42  ;;  %v6637_v17 = vpop.f32.mrb[183].mxu0 }
 0x34d   : > { %9671 = vst [vmem:[#allocation257_spill] sm:$0xff] %v6637_v17  ;;  %v1973_v41 = vmax.f32 %v1971_v7, %v6637_v17 }
 0x351   : > { %v6640_v24 = vpop.f32.mrb[184].mxu0 }
 0x352   : > { %9672 = vst [vmem:[#allocation258_spill] sm:$0xff] %v6640_v24  ;;  %v1841_v32 = vmax.f32 %v1839_v22, %v6640_v24  ;;  %v6643_v2 = vpop.f32.mrb[185].mxu0 }
 0x353   : > { %9673 = vst [vmem:[#allocation259_spill] sm:$0xff] %v6643_v2  ;;  %v1974_v0 = vmax.f32 %v1972_v47, %v6643_v2  ;;  %v6646_v11 = vpop.f32.mrb[186].mxu0 }
 0x354   : > { %9674 = vst [vmem:[#allocation260_spill] sm:$0xff] %v6646_v11  ;;  %v1864_v34 = vmax.f32 %v6315_v52, %v1841_v32  ;;  %v1842_v26 = vmax.f32 %v1840_v36, %v6646_v11  ;;  %v6650_v55 = vpop.f32.mrb[187].mxu0 }
 0x355   : > { %9675 = vst [vmem:[#allocation261_spill] sm:$0xff] %v6650_v55  ;;  %v1997_v59 = vmax.f32 %v6318_v46, %v1974_v0  ;;  %v1975_v7 = vmax.f32 %v1973_v41, %v6650_v55 }
 0x356   : > { %v1866_v17 = vmax.f32 %v1864_v34, %v6392_v54 }
 0x357   : > { %v1999_v22 = vmax.f32 %v1997_v59, %v6395_v19 }
 0x358   : > { %v1868_v24 = vmax.f32 %v1866_v17, %v1842_v26 }
 0x359   : > { %v2001_v42 = vmax.f32 %v1999_v22, %v1975_v7 }
 0x35a   : > { %v1870_v47 = vmax.f32 %v1868_v24, %v6402_v9 }
 0x35b   : > { %v2003_v2 = vmax.f32 %v2001_v42, %v6407_v12 }
 0x35c   : > { %v1871_v52 = vmax.f32 %v6412_v49, %v1870_v47 }
 0x35d   : > { %v2004_v36 = vmax.f32 %v6415_v63, %v2003_v2 }
 0x35e   : > { %v1872_v32 = vmax.f32 %v6422_v27, %v1871_v52 }
 0x35f   : > { %v2005_v46 = vmax.f32 %v6427_v21, %v2004_v36 }
 0x360   : > { %v1873_v41 = vmax.f32 %v6432_v3, %v1872_v32  ;;  %v5331_v32 = vmov 1966171168  }
 0x361   : > { %v2006_v0 = vmax.f32 %v6435_v44, %v2005_v46  ;;  %v2021_v46 = vunpack.c.l.s4 %v5331_v32 }
 0x362   : > { %v1874_v34 = vmax.f32 %v6442_v51, %v1873_v41  ;;  %v6673_v51 = vld [vmem:[#allocation2] sm:$0x3] }
 0x363   : > { %v2007_v17 = vmax.f32 %v6447_v5, %v2006_v0  ;;  %9677 = vst [vmem:[#allocation262_spill] sm:$0xff] %v6673_v51 }
 0x364   : > { %v1875_v26 = vmax.f32 %v6452_v56, %v1874_v34  ;;  %v2022_v56 = vunpack.c.0.s8 %v2021_v46 }
 0x365   : > { %v2008_v24 = vmax.f32 %v6455_v29, %v2007_v17  ;;  %v9676_v17 = vlaneseq }
 0x366   : > { %v1876_v42 = vmax.f32 %v6462_v16, %v1875_v26 }
 0x367   : > { %v2009_v2 = vmax.f32 %v6467_v39, %v2008_v24  ;;  %v2024_v29 = vshrl.u32 %v9676_v17, 7 }
 0x368   : > { %v1877_v59 = vmax.f32 %v6472_v31, %v1876_v42 }
 0x369   : > { %v2010_v7 = vmax.f32 %v6475_v14, %v2009_v2  ;;  %v2025_v42 = vsub.s32 %v2022_v56, %v2024_v29 }
 0x36a   : > { %v1878_v22 = vrot.slane %v1877_v59, 4 }
 0x36b   : > { %v2011_v47 = vrot.slane %v2010_v7, 4 }
 0x36c   : > { %v1879_v52 = vmax.f32 %v1877_v59, %v1878_v22 }
 0x36d   : > { %v2012_v36 = vmax.f32 %v2010_v7, %v2011_v47  ;;  %v6683_v47 = vsub.s32 1, %v2024_v29 }
 0x36e   : > { %v1880_v41 = vrot.slane %v1879_v52, 2 }
 0x36f   : > { %v2013_v0 = vrot.slane %v2012_v36, 2  ;;  %9679 = vst [vmem:[#allocation264_spill] sm:$0xff] %v6683_v47 }
 0x370   : > { %v1881_v5 = vmax.f32 %v1879_v52, %v1880_v41 }
 0x371   : > { %v2014_v34 = vmax.f32 %v2012_v36, %v2013_v0 }
 0x372   : > { %v1882_v26 = vrot.slane %v1881_v5, 1 }
 0x373   : > { %v2015_v16 = vrot.slane %v2014_v34, 1 }
 0x374   : > { %v1883_v24 = vmax.f32 %v1881_v5, %v1882_v26  ;;  %v6685_v5 = vsub.s32 0, %v2024_v29 }
 0x375   : > { %v2016_v39 = vmax.f32 %v2014_v34, %v2015_v16 }
 0x376   : > { %9680 = vst [vmem:[#allocation265_spill] sm:$0xff] %v6685_v5 }
 0x377   : > { %v2019_v31 = vcombine.low %v1883_v24, %v2016_v39 }
 0x379   : > { %v2026_v2 = vrot.slane %v2019_v31, %v2025_v42 }
 0x37b   : > { %v2033_v59 = vrot.slane %v2026_v2, %v2025_v42 }
 0x37d   : > { %v6676_v7 = vmax.f32 %v6673_v51, %v2033_v59 }
 0x37f   : > { %9678 = vst [vmem:[#allocation263_spill] sm:$0xff] %v6676_v7  ;;  %2950 = vst.msk [vmem:[#allocation2] sm:$0x3] %vm6501_vm0, %v6676_v7  ;;  %v6689_v56 = vrot.slane %v6676_v7, %v6683_v47  ;;  %v6693_v16 = vrot.slane %v6676_v7, %v6685_v5 }
 0x381   : > { %v2305_v39 = vsub.f32 %v6475_v14, %v6689_v56  ;;  %v2050_v31 = vsub.f32 %v5845_v57, %v6693_v16  ;;  %v2051_v37 = vsub.f32 %v5847_v58, %v6689_v56  ;;  %v2052_v29 = vsub.f32 %v5850_v60, %v6693_v16 }
 0x382   : > { %v2053_v36 = vsub.f32 %v5852_v61, %v6689_v56  ;;  %v2054_v32 = vsub.f32 %v5855_v62, %v6693_v16  ;;  %v2055_v46 = vsub.f32 %v5859_v1, %v6689_v56  ;;  %v2056_v14 = vsub.f32 %v5864_v4, %v6693_v16 }
 0x383   : > { %v2816_v52 = vmul.f32 1.442695, %v2305_v39  ;;  %v2306_v57 = vmul.f32 1.442695, %v2050_v31  ;;  %v2308_v41 = vmul.f32 1.442695, %v2051_v37  ;;  %v2057_v58 = vsub.f32 %v5868_v6, %v6689_v56 }
 0x384   : > { %v2310_v0 = vmul.f32 1.442695, %v2052_v29  ;;  %v2312_v60 = vmul.f32 1.442695, %v2053_v36  ;;  %v2058_v61 = vsub.f32 %v5873_v8, %v6693_v16  ;;  %v2314_v34 = vmul.f32 1.442695, %v2054_v32 }
 0x385   : > { %4498 = vpow2.f32 %v2816_v52  ;;  %v2059_v62 = vsub.f32 %v5876_v10, %v6689_v56  ;;  %v2316_v1 = vmul.f32 1.442695, %v2055_v46  ;;  %v2060_v4 = vsub.f32 %v5880_v13, %v6693_v16 }
 0x386   : > { %4500 = vpow2.f32 %v2306_v57  ;;  %v2318_v17 = vmul.f32 1.442695, %v2056_v14  ;;  %v2061_v6 = vsub.f32 %v5883_v15, %v6689_v56  ;;  %v2320_v26 = vmul.f32 1.442695, %v2057_v58 }
 0x387   : > { %4502 = vpow2.f32 %v2308_v41  ;;  %v2062_v8 = vsub.f32 %v5889_v18, %v6693_v16  ;;  %v2322_v24 = vmul.f32 1.442695, %v2058_v61  ;;  %v2063_v10 = vsub.f32 %v5892_v20, %v6689_v56 }
 0x388   : > { %4504 = vpow2.f32 %v2310_v0  ;;  %v2324_v42 = vmul.f32 1.442695, %v2059_v62  ;;  %v2064_v13 = vsub.f32 %v5896_v23, %v6693_v16  ;;  %v2326_v2 = vmul.f32 1.442695, %v2060_v4 }
 0x389   : > { %4506 = vpow2.f32 %v2312_v60  ;;  %v2065_v15 = vsub.f32 %v5899_v25, %v6689_v56  ;;  %v2328_v59 = vmul.f32 1.442695, %v2061_v6  ;;  %v2066_v18 = vsub.f32 %v5905_v28, %v6693_v16 }
 0x38a   : > { %4508 = vpow2.f32 %v2314_v34  ;;  %v2330_v39 = vmul.f32 1.442695, %v2062_v8  ;;  %v2067_v20 = vsub.f32 %v5908_v30, %v6689_v56  ;;  %v2332_v37 = vmul.f32 1.442695, %v2063_v10 }
 0x38b   : > { %4510 = vpow2.f32 %v2316_v1  ;;  %v2068_v52 = vsub.f32 %v5912_v33, %v6693_v16  ;;  %v2334_v25 = vmul.f32 1.442695, %v2064_v13  ;;  %v2069_v28 = vsub.f32 %v5915_v35, %v6689_v56 }
 0x38c   : > { %4512 = vpow2.f32 %v2318_v17  ;;  %v2336_v36 = vmul.f32 1.442695, %v2065_v15  ;;  %v2070_v30 = vsub.f32 %v5921_v38, %v6693_v16  ;;  %v2338_v46 = vmul.f32 1.442695, %v2066_v18  ;;  %v9686_v18 = vld [vmem:[#allocation37_spill] sm:$0xff] }
 0x38d   : > { %4514 = vpow2.f32 %v2320_v26  ;;  %v2071_v33 = vsub.f32 %v5924_v40, %v6689_v56  ;;  %v2340_v57 = vmul.f32 1.442695, %v2067_v20  ;;  %v2072_v35 = vsub.f32 %v5928_v43, %v6693_v16 }
 0x38e   : > { %4516 = vpow2.f32 %v2322_v24  ;;  %v2342_v58 = vmul.f32 1.442695, %v2068_v52  ;;  %v2073_v38 = vsub.f32 %v5931_v45, %v6689_v56  ;;  %v2344_v60 = vmul.f32 1.442695, %v2069_v28  ;;  %v9687_v52 = vld [vmem:[#allocation38_spill] sm:$0xff] }
 0x38f   : > { %v6731_v31 = vpop.eup %4498  ;;  %4518 = vpow2.f32 %v2324_v42  ;;  %v2074_v40 = vsub.f32 %v5936_v48, %v6693_v16  ;;  %v2346_v34 = vmul.f32 1.442695, %v2070_v30  ;;  %v2075_v43 = vsub.f32 %v5939_v50, %v6689_v56  ;;  %v9682_v48 = vld [vmem:[#allocation34_spill] sm:$0xff]  ;;  %v9683_v50 = vld [vmem:[#allocation35_spill] sm:$0xff] }
 0x390   : > { %9681 = vst [vmem:[#allocation266_spill] sm:$0xff] %v6731_v31  ;;  %v6735_v23 = vpop.eup %4500  ;;  %4520 = vpow2.f32 %v2326_v2  ;;  %v2348_v1 = vmul.f32 1.442695, %v2071_v33  ;;  %v2076_v45 = vsub.f32 %v5943_v53, %v6693_v16  ;;  %v2350_v17 = vmul.f32 1.442695, %v2072_v35  ;;  %v9684_v53 = vld [vmem:[#allocation36_spill] sm:$0xff] }
 0x391   : > { %v6739_v29 = vpop.eup %4502  ;;  %4522 = vpow2.f32 %v2328_v59  ;;  %v2077_v26 = vsub.f32 %v9682_v48, %v6689_v56  ;;  %v2352_v8 = vmul.f32 1.442695, %v2073_v38  ;;  %v2078_v10 = vsub.f32 %v9683_v50, %v6693_v16  ;;  %v9689_v30 = vld [vmem:[#allocation39_spill] sm:$0xff]  ;;  %v9690_v35 = vld [vmem:[#allocation40_spill] sm:$0xff] }
 0x392   : > { %v6743_v32 = vpop.eup %4504  ;;  %4524 = vpow2.f32 %v2330_v39  ;;  %v2354_v42 = vmul.f32 1.442695, %v2074_v40  ;;  %v2079_v2 = vsub.f32 %v9684_v53, %v6689_v56  ;;  %v2356_v15 = vmul.f32 1.442695, %v2075_v43  ;;  %v9692_v40 = vld [vmem:[#allocation41_spill] sm:$0xff]  ;;  %v9698_v53 = vld [vmem:[#allocation44_spill] sm:$0xff] }
 0x393   : > { %v6747_v14 = vpop.eup %4506  ;;  %4526 = vpow2.f32 %v2332_v37  ;;  %v2080_v39 = vsub.f32 %v9686_v18, %v6693_v16  ;;  %v2358_v20 = vmul.f32 1.442695, %v2076_v45  ;;  %v2360_v28 = vmul.f32 1.442695, %v2077_v26  ;;  %v9694_v45 = vld [vmem:[#allocation42_spill] sm:$0xff] }
 0x394   : > { %v6751_v41 = vpop.eup %4508  ;;  %4528 = vpow2.f32 %v2334_v25  ;;  %v2081_v25 = vsub.f32 %v9687_v52, %v6689_v56  ;;  %v2362_v33 = vmul.f32 1.442695, %v2078_v10  ;;  %v2364_v38 = vmul.f32 1.442695, %v2079_v2 }
 0x395   : > { %v6755_v0 = vpop.eup %4510  ;;  %4530 = vpow2.f32 %v2336_v36  ;;  %v2366_v43 = vmul.f32 1.442695, %v2080_v39  ;;  %v2087_v2 = vsub.f32 %v9698_v53, %v6689_v56  ;;  %v9700_v39 = vld [vmem:[#allocation45_spill] sm:$0xff] }
 0x396   : > { %v6759_v61 = vpop.eup %4512  ;;  %4532 = vpow2.f32 %v2338_v46  ;;  %v2082_v46 = vsub.f32 %v9689_v30, %v6693_v16  ;;  %v2368_v48 = vmul.f32 1.442695, %v2081_v25  ;;  %v9708_v53 = vld [vmem:[#allocation49_spill] sm:$0xff] }
 0x397   : > { %v6763_v62 = vpop.eup %4514  ;;  %4534 = vpow2.f32 %v2340_v57 }
 0x398   : > { %v6767_v4 = vpop.eup %4516  ;;  %4536 = vpow2.f32 %v2342_v58  ;;  %v2083_v58 = vsub.f32 %v9690_v35, %v6689_v56  ;;  %v2370_v10 = vmul.f32 1.442695, %v2082_v46  ;;  %v9704_v35 = vld [vmem:[#allocation47_spill] sm:$0xff] }
 0x399   : > { %v6771_v6 = vpop.eup %4518  ;;  %4538 = vpow2.f32 %v2344_v60 }
 0x39a   : > { %v6775_v24 = vpop.eup %4520  ;;  %4540 = vpow2.f32 %v2346_v34  ;;  %v2084_v34 = vsub.f32 %v9692_v40, %v6693_v16 }
 0x39b   : > { %v6779_v13 = vpop.eup %4522  ;;  %4542 = vpow2.f32 %v2348_v1 }
 0x39c   : > { %v6783_v59 = vpop.eup %4524  ;;  %4544 = vpow2.f32 %v2350_v17  ;;  %v2085_v17 = vsub.f32 %v9694_v45, %v6689_v56  ;;  %v2374_v52 = vmul.f32 1.442695, %v2084_v34  ;;  %v9706_v45 = vld [vmem:[#allocation48_spill] sm:$0xff]  ;;  %v2380_v34 = vmul.f32 1.442695, %v2087_v2 }
 0x39d   : > { %9685 = vst [vmem:[#allocation34_spill] sm:$0xff] %v6783_v59  ;;  %v6787_v37 = vpop.eup %4526  ;;  %4546 = vpow2.f32 %v2352_v8  ;;  %v9696_v8 = vld [vmem:[#allocation43_spill] sm:$0xff] }
 0x39e   : > { %v6791_v36 = vpop.eup %4528  ;;  %4548 = vpow2.f32 %v2354_v42  ;;  %v2086_v50 = vsub.f32 %v9696_v8, %v6693_v16  ;;  %v2376_v46 = vmul.f32 1.442695, %v2085_v17 }
 0x39f   : > { %9688 = vst [vmem:[#allocation35_spill] sm:$0xff] %v6791_v36  ;;  %v6795_v57 = vpop.eup %4530  ;;  %4550 = vpow2.f32 %v2356_v15  ;;  %v2372_v15 = vmul.f32 1.442695, %v2083_v58 }
 0x3a0   : > { %v6799_v60 = vpop.eup %4532  ;;  %4552 = vpow2.f32 %v2358_v20  ;;  %v2088_v20 = vsub.f32 %v9700_v39, %v6693_v16  ;;  %v2378_v58 = vmul.f32 1.442695, %v2086_v50 }
 0x3a1   : > { %9691 = vst [vmem:[#allocation36_spill] sm:$0xff] %v6799_v60  ;;  %v6803_v1 = vpop.eup %4534  ;;  %4554 = vpow2.f32 %v2360_v28  ;;  %v9702_v28 = vld [vmem:[#allocation46_spill] sm:$0xff] }
 0x3a2   : > { %9693 = vst [vmem:[#allocation37_spill] sm:$0xff] %v6803_v1  ;;  %v6807_v26 = vpop.eup %4536  ;;  %4556 = vpow2.f32 %v2362_v33  ;;  %v2089_v30 = vsub.f32 %v9702_v28, %v6689_v56  ;;  %v2382_v17 = vmul.f32 1.442695, %v2088_v20  ;;  %v9710_v28 = vld [vmem:[#allocation50_spill] sm:$0xff] }
 0x3a3   : > { %9695 = vst [vmem:[#allocation38_spill] sm:$0xff] %v6807_v26  ;;  %v6811_v42 = vpop.eup %4538  ;;  %4558 = vpow2.f32 %v2364_v38  ;;  %v2090_v38 = vsub.f32 %v9704_v35, %v6693_v16 }
 0x3a4   : > { %9697 = vst [vmem:[#allocation39_spill] sm:$0xff] %v6811_v42  ;;  %v6815_v18 = vpop.eup %4540  ;;  %4560 = vpow2.f32 %v2366_v43  ;;  %v2091_v43 = vsub.f32 %v9706_v45, %v6689_v56  ;;  %v2384_v50 = vmul.f32 1.442695, %v2089_v30  ;;  %v9712_v45 = vld [vmem:[#allocation51_spill] sm:$0xff] }
 0x3a5   : > { %9699 = vst [vmem:[#allocation40_spill] sm:$0xff] %v6815_v18  ;;  %v6819_v25 = vpop.eup %4542  ;;  %4562 = vpow2.f32 %v2368_v48  ;;  %v2092_v48 = vsub.f32 %v9708_v53, %v6693_v16  ;;  %v2386_v2 = vmul.f32 1.442695, %v2090_v38  ;;  %v9714_v53 = vld [vmem:[#allocation52_spill] sm:$0xff] }
 0x3a6   : > { %9701 = vst [vmem:[#allocation41_spill] sm:$0xff] %v6819_v25  ;;  %v6823_v33 = vpop.eup %4544  ;;  %4564 = vpow2.f32 %v2370_v10  ;;  %v2093_v10 = vsub.f32 %v9710_v28, %v6689_v56  ;;  %v2388_v20 = vmul.f32 1.442695, %v2091_v43  ;;  %v9716_v28 = vld [vmem:[#allocation53_spill] sm:$0xff]  ;;  %v9865_v18 = vld [vmem:[#allocation204_spill] sm:$0xff] }
 0x3a7   : > { %9703 = vst [vmem:[#allocation42_spill] sm:$0xff] %v6823_v33  ;;  %v6827_v40 = vpop.eup %4546  ;;  %4566 = vpow2.f32 %v2372_v15  ;;  %v2094_v15 = vsub.f32 %v9712_v45, %v6693_v16  ;;  %v2390_v30 = vmul.f32 1.442695, %v2092_v48  ;;  %v9718_v45 = vld [vmem:[#allocation54_spill] sm:$0xff]  ;;  %v9862_v33 = vld [vmem:[#allocation200_spill] sm:$0xff] }
 0x3a8   : > { %9705 = vst [vmem:[#allocation43_spill] sm:$0xff] %v6827_v40  ;;  %v6831_v8 = vpop.eup %4548  ;;  %4568 = vpow2.f32 %v2374_v52  ;;  %v2095_v52 = vsub.f32 %v9714_v53, %v6689_v56  ;;  %v2392_v38 = vmul.f32 1.442695, %v2093_v10  ;;  %v9720_v53 = vld [vmem:[#allocation55_spill] sm:$0xff] }
 0x3a9   : > { %9707 = vst [vmem:[#allocation44_spill] sm:$0xff] %v6831_v8  ;;  %v6835_v39 = vpop.eup %4550  ;;  %4570 = vpow2.f32 %v2376_v46  ;;  %v2096_v46 = vsub.f32 %v9716_v28, %v6693_v16  ;;  %v2394_v43 = vmul.f32 1.442695, %v2094_v15  ;;  %v9722_v28 = vld [vmem:[#allocation56_spill] sm:$0xff]  ;;  %v9868_v40 = vld [vmem:[#allocation207_spill] sm:$0xff] }
 0x3aa   : > { %9709 = vst [vmem:[#allocation45_spill] sm:$0xff] %v6835_v39  ;;  %v6839_v35 = vpop.eup %4552  ;;  %4572 = vpow2.f32 %v2378_v58  ;;  %v2097_v58 = vsub.f32 %v9718_v45, %v6689_v56  ;;  %v2396_v48 = vmul.f32 1.442695, %v2095_v52  ;;  %v9724_v45 = vld [vmem:[#allocation57_spill] sm:$0xff]  ;;  %v9853_v8 = vld [vmem:[#allocation188_spill] sm:$0xff] }
 0x3ab   : > { %9711 = vst [vmem:[#allocation46_spill] sm:$0xff] %v6839_v35  ;;  %v6843_v22 = vpop.eup %4554  ;;  %4574 = vpow2.f32 %v2380_v34  ;;  %v2098_v34 = vsub.f32 %v9720_v53, %v6693_v16  ;;  %v2398_v10 = vmul.f32 1.442695, %v2096_v46  ;;  %v9726_v53 = vld [vmem:[#allocation58_spill] sm:$0xff]  ;;  %v9850_v35 = vld [vmem:[#allocation184_spill] sm:$0xff] }
 0x3ac   : > { %9713 = vst [vmem:[#allocation47_spill] sm:$0xff] %v6843_v22  ;;  %v6847_v47 = vpop.eup %4556  ;;  %4576 = vpow2.f32 %v2382_v17  ;;  %v2099_v17 = vsub.f32 %v9722_v28, %v6689_v56  ;;  %v2400_v15 = vmul.f32 1.442695, %v2097_v58  ;;  %v9728_v28 = vld [vmem:[#allocation59_spill] sm:$0xff]  ;;  %v9856_v22 = vld [vmem:[#allocation192_spill] sm:$0xff] }
 0x3ad   : > { %9715 = vst [vmem:[#allocation48_spill] sm:$0xff] %v6847_v47  ;;  %v6851_v5 = vpop.eup %4558  ;;  %4578 = vpow2.f32 %v2384_v50  ;;  %v2100_v50 = vsub.f32 %v9724_v45, %v6693_v16  ;;  %v2402_v52 = vmul.f32 1.442695, %v2098_v34  ;;  %v9730_v45 = vld [vmem:[#allocation60_spill] sm:$0xff] }
 0x3ae   : > { %9717 = vst [vmem:[#allocation49_spill] sm:$0xff] %v6851_v5  ;;  %v6855_v7 = vpop.eup %4560  ;;  %4580 = vpow2.f32 %v2386_v2  ;;  %v2101_v2 = vsub.f32 %v9726_v53, %v6689_v56  ;;  %v2404_v46 = vmul.f32 1.442695, %v2099_v17  ;;  %v9732_v53 = vld [vmem:[#allocation61_spill] sm:$0xff]  ;;  %v9841_v47 = vld [vmem:[#allocation172_spill] sm:$0xff] }
 0x3af   : > { %9719 = vst [vmem:[#allocation50_spill] sm:$0xff] %v6855_v7  ;;  %v6859_v51 = vpop.eup %4562  ;;  %4582 = vpow2.f32 %v2388_v20  ;;  %v2102_v20 = vsub.f32 %v9728_v28, %v6693_v16  ;;  %v2406_v58 = vmul.f32 1.442695, %v2100_v50  ;;  %v9734_v28 = vld [vmem:[#allocation62_spill] sm:$0xff]  ;;  %v9847_v5 = vld [vmem:[#allocation180_spill] sm:$0xff] }
 0x3b0   : > { %9721 = vst [vmem:[#allocation51_spill] sm:$0xff] %v6859_v51  ;;  %v6863_v31 = vpop.eup %4564  ;;  %4584 = vpow2.f32 %v2390_v30  ;;  %v2103_v30 = vsub.f32 %v9730_v45, %v6689_v56  ;;  %v2408_v34 = vmul.f32 1.442695, %v2101_v2  ;;  %v9736_v45 = vld [vmem:[#allocation63_spill] sm:$0xff]  ;;  %v9838_v7 = vld [vmem:[#allocation170_spill] sm:$0xff]  ;;  %v9844_v51 = vld [vmem:[#allocation176_spill] sm:$0xff] }
 0x3b1   : > { %9723 = vst [vmem:[#allocation52_spill] sm:$0xff] %v6863_v31  ;;  %v6867_v44 = vpop.eup %4566  ;;  %4586 = vpow2.f32 %v2392_v38  ;;  %v2104_v38 = vsub.f32 %v9732_v53, %v6693_v16  ;;  %v2410_v17 = vmul.f32 1.442695, %v2102_v20  ;;  %v9738_v53 = vld [vmem:[#allocation64_spill] sm:$0xff] }
 0x3b2   : > { %9725 = vst [vmem:[#allocation53_spill] sm:$0xff] %v6867_v44  ;;  %v6871_v3 = vpop.eup %4568  ;;  %4588 = vpow2.f32 %v2394_v43  ;;  %v2105_v43 = vsub.f32 %v9734_v28, %v6689_v56  ;;  %v2412_v50 = vmul.f32 1.442695, %v2103_v30  ;;  %v9740_v28 = vld [vmem:[#allocation65_spill] sm:$0xff]  ;;  %v9829_v31 = vld [vmem:[#allocation164_spill] sm:$0xff] }
 0x3b3   : > { %9727 = vst [vmem:[#allocation54_spill] sm:$0xff] %v6871_v3  ;;  %v6875_v21 = vpop.eup %4570  ;;  %4590 = vpow2.f32 %v2396_v48  ;;  %v2106_v48 = vsub.f32 %v9736_v45, %v6693_v16  ;;  %v2414_v2 = vmul.f32 1.442695, %v2104_v38  ;;  %v9742_v45 = vld [vmem:[#allocation66_spill] sm:$0xff]  ;;  %v9835_v44 = vld [vmem:[#allocation168_spill] sm:$0xff] }
 0x3b4   : > { %9729 = vst [vmem:[#allocation55_spill] sm:$0xff] %v6875_v21  ;;  %v6879_v27 = vpop.eup %4572  ;;  %4592 = vpow2.f32 %v2398_v10  ;;  %v2107_v10 = vsub.f32 %v9738_v53, %v6689_v56  ;;  %v2416_v20 = vmul.f32 1.442695, %v2105_v43  ;;  %v9744_v53 = vld [vmem:[#allocation67_spill] sm:$0xff]  ;;  %v9826_v3 = vld [vmem:[#allocation162_spill] sm:$0xff]  ;;  %v9859_v39 = vld [vmem:[#allocation196_spill] sm:$0xff] }
 0x3b5   : > { %9731 = vst [vmem:[#allocation56_spill] sm:$0xff] %v6879_v27  ;;  %v6883_v63 = vpop.eup %4574  ;;  %4594 = vpow2.f32 %v2400_v15  ;;  %v2108_v15 = vsub.f32 %v9740_v28, %v6693_v16  ;;  %v2418_v30 = vmul.f32 1.442695, %v2106_v48  ;;  %v9746_v28 = vld [vmem:[#allocation68_spill] sm:$0xff]  ;;  %v9832_v21 = vld [vmem:[#allocation166_spill] sm:$0xff] }
 0x3b6   : > { %9733 = vst [vmem:[#allocation57_spill] sm:$0xff] %v6883_v63  ;;  %v6887_v49 = vpop.eup %4576  ;;  %4596 = vpow2.f32 %v2402_v52  ;;  %v2109_v52 = vsub.f32 %v9742_v45, %v6689_v56  ;;  %v2420_v38 = vmul.f32 1.442695, %v2107_v10  ;;  %v9748_v45 = vld [vmem:[#allocation69_spill] sm:$0xff]  ;;  %v9817_v27 = vld [vmem:[#allocation156_spill] sm:$0xff] }
 0x3b7   : > { %9735 = vst [vmem:[#allocation58_spill] sm:$0xff] %v6887_v49  ;;  %v6891_v12 = vpop.eup %4578  ;;  %4598 = vpow2.f32 %v2404_v46  ;;  %v2110_v46 = vsub.f32 %v9744_v53, %v6693_v16  ;;  %v2422_v43 = vmul.f32 1.442695, %v2108_v15  ;;  %v9750_v53 = vld [vmem:[#allocation70_spill] sm:$0xff]  ;;  %v9823_v63 = vld [vmem:[#allocation160_spill] sm:$0xff] }
 0x3b8   : > { %9737 = vst [vmem:[#allocation59_spill] sm:$0xff] %v6891_v12  ;;  %v6895_v9 = vpop.eup %4580  ;;  %4600 = vpow2.f32 %v2406_v58  ;;  %v2111_v58 = vsub.f32 %v9746_v28, %v6689_v56  ;;  %v2424_v48 = vmul.f32 1.442695, %v2109_v52  ;;  %v9752_v28 = vld [vmem:[#allocation71_spill] sm:$0xff]  ;;  %v9814_v49 = vld [vmem:[#allocation154_spill] sm:$0xff] }
 0x3b9   : > { %9739 = vst [vmem:[#allocation60_spill] sm:$0xff] %v6895_v9  ;;  %v6899_v19 = vpop.eup %4582  ;;  %4602 = vpow2.f32 %v2408_v34  ;;  %v2112_v34 = vsub.f32 %v9748_v45, %v6693_v16  ;;  %v2426_v10 = vmul.f32 1.442695, %v2110_v46  ;;  %v9754_v45 = vld [vmem:[#allocation72_spill] sm:$0xff]  ;;  %v9820_v12 = vld [vmem:[#allocation158_spill] sm:$0xff] }
 0x3ba   : > { %9741 = vst [vmem:[#allocation61_spill] sm:$0xff] %v6899_v19  ;;  %v6903_v54 = vpop.eup %4584  ;;  %4604 = vpow2.f32 %v2410_v17  ;;  %v2113_v17 = vsub.f32 %v9750_v53, %v6689_v56  ;;  %v2428_v15 = vmul.f32 1.442695, %v2111_v58  ;;  %v9756_v53 = vld [vmem:[#allocation74_spill] sm:$0xff]  ;;  %v9811_v19 = vld [vmem:[#allocation152_spill] sm:$0xff] }
 0x3bb   : > { %9743 = vst [vmem:[#allocation62_spill] sm:$0xff] %v6903_v54  ;;  %v6907_v55 = vpop.eup %4586  ;;  %4606 = vpow2.f32 %v2412_v50  ;;  %v2114_v50 = vsub.f32 %v9752_v28, %v6693_v16  ;;  %v2430_v52 = vmul.f32 1.442695, %v2112_v34  ;;  %v9758_v28 = vld [vmem:[#allocation76_spill] sm:$0xff] }
 0x3bc   : > { %9745 = vst [vmem:[#allocation63_spill] sm:$0xff] %v6907_v55  ;;  %v6911_v11 = vpop.eup %4588  ;;  %4608 = vpow2.f32 %v2414_v2  ;;  %v2115_v2 = vsub.f32 %v9754_v45, %v6689_v56  ;;  %v2432_v46 = vmul.f32 1.442695, %v2113_v17  ;;  %v9760_v45 = vld [vmem:[#allocation82_spill] sm:$0xff] }
 0x3bd   : > { %9747 = vst [vmem:[#allocation64_spill] sm:$0xff] %v6911_v11  ;;  %v6915_v54 = vpop.eup %4590  ;;  %4610 = vpow2.f32 %v2416_v20  ;;  %v2116_v20 = vsub.f32 %v9756_v53, %v6693_v16  ;;  %v2434_v58 = vmul.f32 1.442695, %v2114_v50  ;;  %v9762_v53 = vld [vmem:[#allocation84_spill] sm:$0xff] }
 0x3be   : > { %9749 = vst [vmem:[#allocation65_spill] sm:$0xff] %v6915_v54  ;;  %v6919_v9 = vpop.eup %4592  ;;  %4612 = vpow2.f32 %v2418_v30  ;;  %v2117_v30 = vsub.f32 %v9758_v28, %v6689_v56  ;;  %v2436_v34 = vmul.f32 1.442695, %v2115_v2  ;;  %v9764_v28 = vld [vmem:[#allocation86_spill] sm:$0xff] }
 0x3bf   : > { %9751 = vst [vmem:[#allocation66_spill] sm:$0xff] %v6919_v9  ;;  %v6923_v11 = vpop.eup %4594  ;;  %4614 = vpow2.f32 %v2420_v38  ;;  %v2118_v38 = vsub.f32 %v9760_v45, %v6693_v16  ;;  %v2438_v17 = vmul.f32 1.442695, %v2116_v20  ;;  %v9766_v45 = vld [vmem:[#allocation88_spill] sm:$0xff] }
 0x3c0   : > { %9753 = vst [vmem:[#allocation67_spill] sm:$0xff] %v6923_v11  ;;  %v6927_v54 = vpop.eup %4596  ;;  %4616 = vpow2.f32 %v2422_v43  ;;  %v2119_v43 = vsub.f32 %v9762_v53, %v6689_v56  ;;  %v2440_v50 = vmul.f32 1.442695, %v2117_v30  ;;  %v9768_v53 = vld [vmem:[#allocation94_spill] sm:$0xff] }
 0x3c1   : > { %9755 = vst [vmem:[#allocation68_spill] sm:$0xff] %v6927_v54  ;;  %v6931_v9 = vpop.eup %4598  ;;  %4618 = vpow2.f32 %v2424_v48  ;;  %v2120_v48 = vsub.f32 %v9764_v28, %v6693_v16  ;;  %v2442_v2 = vmul.f32 1.442695, %v2118_v38  ;;  %v9770_v28 = vld [vmem:[#allocation96_spill] sm:$0xff] }
 0x3c2   : > { %9757 = vst [vmem:[#allocation69_spill] sm:$0xff] %v6931_v9  ;;  %v6935_v11 = vpop.eup %4600  ;;  %4620 = vpow2.f32 %v2426_v10  ;;  %v2121_v10 = vsub.f32 %v9766_v45, %v6689_v56  ;;  %v2444_v20 = vmul.f32 1.442695, %v2119_v43  ;;  %v9772_v45 = vld [vmem:[#allocation98_spill] sm:$0xff] }
 0x3c3   : > { %9759 = vst [vmem:[#allocation70_spill] sm:$0xff] %v6935_v11  ;;  %v6939_v54 = vpop.eup %4602  ;;  %4622 = vpow2.f32 %v2428_v15  ;;  %v2122_v15 = vsub.f32 %v9768_v53, %v6693_v16  ;;  %v2446_v30 = vmul.f32 1.442695, %v2120_v48  ;;  %v9774_v53 = vld [vmem:[#allocation100_spill] sm:$0xff] }
 0x3c4   : > { %9761 = vst [vmem:[#allocation71_spill] sm:$0xff] %v6939_v54  ;;  %v6943_v9 = vpop.eup %4604  ;;  %4624 = vpow2.f32 %v2430_v52  ;;  %v2123_v52 = vsub.f32 %v9770_v28, %v6689_v56  ;;  %v2448_v38 = vmul.f32 1.442695, %v2121_v10  ;;  %v9776_v28 = vld [vmem:[#allocation106_spill] sm:$0xff] }
 0x3c5   : > { %9763 = vst [vmem:[#allocation72_spill] sm:$0xff] %v6943_v9  ;;  %v6947_v11 = vpop.eup %4606  ;;  %4626 = vpow2.f32 %v2432_v46  ;;  %v2124_v46 = vsub.f32 %v9772_v45, %v6693_v16  ;;  %v2450_v43 = vmul.f32 1.442695, %v2122_v15  ;;  %v9778_v45 = vld [vmem:[#allocation108_spill] sm:$0xff] }
 0x3c6   : > { %9765 = vst [vmem:[#allocation74_spill] sm:$0xff] %v6947_v11  ;;  %v6951_v54 = vpop.eup %4608  ;;  %4628 = vpow2.f32 %v2434_v58  ;;  %v2125_v58 = vsub.f32 %v9774_v53, %v6689_v56  ;;  %v2452_v48 = vmul.f32 1.442695, %v2123_v52  ;;  %v9780_v53 = vld [vmem:[#allocation110_spill] sm:$0xff] }
 0x3c7   : > { %9767 = vst [vmem:[#allocation76_spill] sm:$0xff] %v6951_v54  ;;  %v6955_v9 = vpop.eup %4610  ;;  %4630 = vpow2.f32 %v2436_v34  ;;  %v2126_v34 = vsub.f32 %v9776_v28, %v6693_v16  ;;  %v2454_v10 = vmul.f32 1.442695, %v2124_v46  ;;  %v9782_v28 = vld [vmem:[#allocation112_spill] sm:$0xff] }
 0x3c8   : > { %9769 = vst [vmem:[#allocation82_spill] sm:$0xff] %v6955_v9  ;;  %v6959_v11 = vpop.eup %4612  ;;  %4632 = vpow2.f32 %v2438_v17  ;;  %v2127_v17 = vsub.f32 %v9778_v45, %v6689_v56  ;;  %v2456_v15 = vmul.f32 1.442695, %v2125_v58  ;;  %v9784_v45 = vld [vmem:[#allocation118_spill] sm:$0xff] }
 0x3c9   : > { %9771 = vst [vmem:[#allocation84_spill] sm:$0xff] %v6959_v11  ;;  %v6963_v54 = vpop.eup %4614  ;;  %4634 = vpow2.f32 %v2440_v50  ;;  %v2128_v50 = vsub.f32 %v9780_v53, %v6693_v16  ;;  %v2458_v52 = vmul.f32 1.442695, %v2126_v34  ;;  %v9786_v53 = vld [vmem:[#allocation120_spill] sm:$0xff] }
 0x3ca   : > { %9773 = vst [vmem:[#allocation86_spill] sm:$0xff] %v6963_v54  ;;  %v6967_v9 = vpop.eup %4616  ;;  %4636 = vpow2.f32 %v2442_v2  ;;  %v2129_v2 = vsub.f32 %v9782_v28, %v6689_v56  ;;  %v2460_v46 = vmul.f32 1.442695, %v2127_v17  ;;  %v9788_v28 = vld [vmem:[#allocation122_spill] sm:$0xff] }
 0x3cb   : > { %9775 = vst [vmem:[#allocation88_spill] sm:$0xff] %v6967_v9  ;;  %v6971_v11 = vpop.eup %4618  ;;  %4638 = vpow2.f32 %v2444_v20  ;;  %v2130_v20 = vsub.f32 %v9784_v45, %v6693_v16  ;;  %v2462_v58 = vmul.f32 1.442695, %v2128_v50  ;;  %v9790_v45 = vld [vmem:[#allocation124_spill] sm:$0xff] }
 0x3cc   : > { %9777 = vst [vmem:[#allocation94_spill] sm:$0xff] %v6971_v11  ;;  %v6975_v54 = vpop.eup %4620  ;;  %4640 = vpow2.f32 %v2446_v30  ;;  %v2131_v30 = vsub.f32 %v9786_v53, %v6689_v56  ;;  %v2464_v34 = vmul.f32 1.442695, %v2129_v2  ;;  %v9792_v53 = vld [vmem:[#allocation130_spill] sm:$0xff] }
 0x3cd   : > { %9779 = vst [vmem:[#allocation96_spill] sm:$0xff] %v6975_v54  ;;  %v6979_v9 = vpop.eup %4622  ;;  %4642 = vpow2.f32 %v2448_v38  ;;  %v2132_v38 = vsub.f32 %v9788_v28, %v6693_v16  ;;  %v2466_v17 = vmul.f32 1.442695, %v2130_v20  ;;  %v9794_v28 = vld [vmem:[#allocation132_spill] sm:$0xff] }
 0x3ce   : > { %9781 = vst [vmem:[#allocation98_spill] sm:$0xff] %v6979_v9  ;;  %v6983_v11 = vpop.eup %4624  ;;  %4644 = vpow2.f32 %v2450_v43  ;;  %v2133_v43 = vsub.f32 %v9790_v45, %v6689_v56  ;;  %v2468_v50 = vmul.f32 1.442695, %v2131_v30  ;;  %v9796_v45 = vld [vmem:[#allocation134_spill] sm:$0xff] }
 0x3cf   : > { %9783 = vst [vmem:[#allocation100_spill] sm:$0xff] %v6983_v11  ;;  %v6987_v54 = vpop.eup %4626  ;;  %4646 = vpow2.f32 %v2452_v48  ;;  %v2134_v48 = vsub.f32 %v9792_v53, %v6693_v16  ;;  %v2470_v2 = vmul.f32 1.442695, %v2132_v38  ;;  %v9798_v53 = vld [vmem:[#allocation136_spill] sm:$0xff] }
 0x3d0   : > { %9785 = vst [vmem:[#allocation106_spill] sm:$0xff] %v6987_v54  ;;  %v6991_v9 = vpop.eup %4628  ;;  %4648 = vpow2.f32 %v2454_v10  ;;  %v2135_v10 = vsub.f32 %v9794_v28, %v6689_v56  ;;  %v2472_v20 = vmul.f32 1.442695, %v2133_v43  ;;  %v9800_v28 = vld [vmem:[#allocation142_spill] sm:$0xff]  ;;  %v9805_v43 = vld [vmem:[#allocation148_spill] sm:$0xff] }
 0x3d1   : > { %9787 = vst [vmem:[#allocation108_spill] sm:$0xff] %v6991_v9  ;;  %v6995_v11 = vpop.eup %4630  ;;  %4650 = vpow2.f32 %v2456_v15  ;;  %v2136_v15 = vsub.f32 %v9796_v45, %v6693_v16  ;;  %v2474_v30 = vmul.f32 1.442695, %v2134_v48  ;;  %v9802_v45 = vld [vmem:[#allocation144_spill] sm:$0xff]  ;;  %v9807_v48 = vld [vmem:[#allocation149_spill] sm:$0xff] }
 0x3d2   : > { %9789 = vst [vmem:[#allocation110_spill] sm:$0xff] %v6995_v11  ;;  %v6999_v54 = vpop.eup %4632  ;;  %4652 = vpow2.f32 %v2458_v52  ;;  %v2137_v52 = vsub.f32 %v9798_v53, %v6689_v56  ;;  %v2476_v38 = vmul.f32 1.442695, %v2135_v10  ;;  %v9804_v53 = vld [vmem:[#allocation146_spill] sm:$0xff] }
 0x3d3   : > { %9791 = vst [vmem:[#allocation112_spill] sm:$0xff] %v6999_v54  ;;  %v7003_v9 = vpop.eup %4634  ;;  %4654 = vpow2.f32 %v2460_v46  ;;  %v2138_v46 = vsub.f32 %v9800_v28, %v6693_v16  ;;  %v2478_v55 = vmul.f32 1.442695, %v2136_v15 }
 0x3d4   : > { %9793 = vst [vmem:[#allocation118_spill] sm:$0xff] %v7003_v9  ;;  %v7007_v11 = vpop.eup %4636  ;;  %4656 = vpow2.f32 %v2462_v58  ;;  %v2139_v58 = vsub.f32 %v9802_v45, %v6689_v56  ;;  %v2480_v10 = vmul.f32 1.442695, %v2137_v52 }
 0x3d5   : > { %9795 = vst [vmem:[#allocation120_spill] sm:$0xff] %v7007_v11  ;;  %v7011_v54 = vpop.eup %4638  ;;  %4658 = vpow2.f32 %v2464_v34  ;;  %v2140_v34 = vsub.f32 %v9804_v53, %v6693_v16  ;;  %v2482_v15 = vmul.f32 1.442695, %v2138_v46 }
 0x3d6   : > { %9797 = vst [vmem:[#allocation122_spill] sm:$0xff] %v7011_v54  ;;  %v7015_v9 = vpop.eup %4640  ;;  %4660 = vpow2.f32 %v2466_v17  ;;  %v2142_v17 = vsub.f32 %v9807_v48, %v6693_v16  ;;  %v2484_v52 = vmul.f32 1.442695, %v2139_v58 }
 0x3d7   : > { %9799 = vst [vmem:[#allocation124_spill] sm:$0xff] %v7015_v9  ;;  %v7019_v11 = vpop.eup %4642  ;;  %4662 = vpow2.f32 %v2468_v50  ;;  %v2141_v9 = vsub.f32 %v9805_v43, %v6689_v56  ;;  %v2145_v43 = vsub.f32 %v9811_v19, %v6689_v56  ;;  %v2149_v19 = vsub.f32 %v9817_v27, %v6689_v56 }
 0x3d8   : > { %9801 = vst [vmem:[#allocation130_spill] sm:$0xff] %v7019_v11  ;;  %v7023_v54 = vpop.eup %4644  ;;  %4664 = vpow2.f32 %v2470_v2  ;;  %v9808_v11 = vld [vmem:[#allocation150_spill] sm:$0xff]  ;;  %v2486_v46 = vmul.f32 1.442695, %v2140_v34  ;;  %v2153_v27 = vsub.f32 %v9823_v63, %v6689_v56  ;;  %v9877_v63 = vsub.f32 %v9832_v21, %v6689_v56  ;;  %v9884_v21 = vld [vmem:[#allocation215_spill] sm:$0xff] }
 0x3d9   : > { %9803 = vst [vmem:[#allocation132_spill] sm:$0xff] %v7023_v54  ;;  %v7029_v28 = vpop.eup %4646  ;;  %v2143_v45 = vsub.f32 %v9808_v11, %v6689_v56  ;;  %4666 = vpow2.f32 %v2472_v20  ;;  %v9810_v54 = vld [vmem:[#allocation151_spill] sm:$0xff]  ;;  %v2147_v11 = vsub.f32 %v9814_v49, %v6689_v56  ;;  %v2151_v49 = vsub.f32 %v9820_v12, %v6689_v56 }
 0x3da   : > { %9806 = vst [vmem:[#allocation134_spill] sm:$0xff] %v7029_v28  ;;  %v7035_v50 = vpop.eup %4648  ;;  %v2144_v53 = vsub.f32 %v9810_v54, %v6693_v16  ;;  %4668 = vpow2.f32 %v2474_v30  ;;  %v9813_v28 = vld [vmem:[#allocation153_spill] sm:$0xff]  ;;  %v2488_v58 = vmul.f32 1.442695, %v2141_v9  ;;  %v2155_v12 = vsub.f32 %v9826_v3, %v6689_v56 }
 0x3db   : > { %9809 = vst [vmem:[#allocation136_spill] sm:$0xff] %v7035_v50  ;;  %v7041_v2 = vpop.eup %4650  ;;  %v2146_v48 = vsub.f32 %v9813_v28, %v6693_v16  ;;  %4670 = vpow2.f32 %v2476_v38  ;;  %v9816_v50 = vld [vmem:[#allocation155_spill] sm:$0xff]  ;;  %v2492_v9 = vmul.f32 1.442695, %v2143_v45  ;;  %v2496_v45 = vmul.f32 1.442695, %v2145_v43 }
 0x3dc   : > { %9812 = vst [vmem:[#allocation142_spill] sm:$0xff] %v7041_v2  ;;  %v7047_v20 = vpop.eup %4652  ;;  %v2148_v54 = vsub.f32 %v9816_v50, %v6693_v16  ;;  %4672 = vpow2.f32 %v2478_v55  ;;  %v9819_v2 = vld [vmem:[#allocation157_spill] sm:$0xff]  ;;  %v2490_v55 = vmul.f32 1.442695, %v2142_v17  ;;  %v2494_v17 = vmul.f32 1.442695, %v2144_v53 }
 0x3dd   : > { %9815 = vst [vmem:[#allocation144_spill] sm:$0xff] %v7047_v20  ;;  %v7053_v30 = vpop.eup %4654  ;;  %v2150_v28 = vsub.f32 %v9819_v2, %v6693_v16  ;;  %4674 = vpow2.f32 %v2480_v10  ;;  %v9822_v20 = vld [vmem:[#allocation159_spill] sm:$0xff]  ;;  %v2498_v53 = vmul.f32 1.442695, %v2146_v48  ;;  %v2500_v43 = vmul.f32 1.442695, %v2147_v11 }
 0x3de   : > { %9818 = vst [vmem:[#allocation146_spill] sm:$0xff] %v7053_v30  ;;  %v7059_v38 = vpop.eup %4656  ;;  %v2152_v50 = vsub.f32 %v9822_v20, %v6693_v16  ;;  %4676 = vpow2.f32 %v2482_v15  ;;  %v9825_v30 = vld [vmem:[#allocation161_spill] sm:$0xff]  ;;  %v2502_v48 = vmul.f32 1.442695, %v2148_v54  ;;  %v2504_v11 = vmul.f32 1.442695, %v2149_v19 }
 0x3df   : > { %9821 = vst [vmem:[#allocation148_spill] sm:$0xff] %v7059_v38  ;;  %v7065_v34 = vpop.eup %4658  ;;  %v2154_v2 = vsub.f32 %v9825_v30, %v6693_v16  ;;  %4678 = vpow2.f32 %v2484_v52  ;;  %v9828_v38 = vld [vmem:[#allocation163_spill] sm:$0xff]  ;;  %v2506_v54 = vmul.f32 1.442695, %v2150_v28  ;;  %v2508_v19 = vmul.f32 1.442695, %v2151_v49 }
 0x3e0   : > { %9824 = vst [vmem:[#allocation149_spill] sm:$0xff] %v7065_v34  ;;  %v7071_v10 = vpop.eup %4660  ;;  %v2156_v20 = vsub.f32 %v9828_v38, %v6693_v16  ;;  %4680 = vpow2.f32 %v2486_v46  ;;  %v9831_v34 = vld [vmem:[#allocation165_spill] sm:$0xff]  ;;  %v2510_v28 = vmul.f32 1.442695, %v2152_v50  ;;  %v2512_v49 = vmul.f32 1.442695, %v2153_v27 }
 0x3e1   : > { %9827 = vst [vmem:[#allocation150_spill] sm:$0xff] %v7071_v10  ;;  %v7077_v15 = vpop.eup %4662  ;;  %4682 = vpow2.f32 %v2488_v58  ;;  %v9834_v10 = vld [vmem:[#allocation167_spill] sm:$0xff]  ;;  %v2514_v50 = vmul.f32 1.442695, %v2154_v2  ;;  %v2516_v27 = vmul.f32 1.442695, %v2155_v12  ;;  %v9869_v12 = vsub.f32 %v9829_v31, %v6689_v56 }
 0x3e2   : > { %9830 = vst [vmem:[#allocation151_spill] sm:$0xff] %v7077_v15  ;;  %v7083_v52 = vpop.eup %4664  ;;  %4684 = vpow2.f32 %v2490_v55  ;;  %v9837_v15 = vld [vmem:[#allocation169_spill] sm:$0xff]  ;;  %v2518_v2 = vmul.f32 1.442695, %v2156_v20  ;;  %v9871_v38 = vld [vmem:[#allocation208_spill] sm:$0xff]  ;;  %v9873_v30 = vsub.f32 %v9831_v34, %v6693_v16  ;;  %v9876_v31 = vld [vmem:[#allocation211_spill] sm:$0xff]  ;;  %v9881_v3 = vsub.f32 %v9834_v10, %v6693_v16 }
 0x3e3   : > { %9833 = vst [vmem:[#allocation152_spill] sm:$0xff] %v7083_v52  ;;  %v7089_v46 = vpop.eup %4666  ;;  %4686 = vpow2.f32 %v2492_v9  ;;  %v9840_v52 = vld [vmem:[#allocation171_spill] sm:$0xff]  ;;  %v9872_v20 = vld [vmem:[#allocation209_spill] sm:$0xff] }
 0x3e4   : > { %9836 = vst [vmem:[#allocation153_spill] sm:$0xff] %v7089_v46  ;;  %v7095_v58 = vpop.eup %4668  ;;  %4688 = vpow2.f32 %v2494_v17  ;;  %v9843_v46 = vld [vmem:[#allocation175_spill] sm:$0xff]  ;;  %v9880_v34 = vld [vmem:[#allocation213_spill] sm:$0xff] }
 0x3e5   : > { %9839 = vst [vmem:[#allocation154_spill] sm:$0xff] %v7095_v58  ;;  %v7101_v55 = vpop.eup %4670  ;;  %4690 = vpow2.f32 %v2496_v45  ;;  %v9846_v58 = vld [vmem:[#allocation178_spill] sm:$0xff]  ;;  %v9888_v10 = vld [vmem:[#allocation217_spill] sm:$0xff] }
 0x3e6   : > { %9842 = vst [vmem:[#allocation155_spill] sm:$0xff] %v7101_v55  ;;  %v7107_v9 = vpop.eup %4672  ;;  %4692 = vpow2.f32 %v2498_v53  ;;  %v9849_v55 = vld [vmem:[#allocation183_spill] sm:$0xff] }
 0x3e7   : > { %9845 = vst [vmem:[#allocation156_spill] sm:$0xff] %v7107_v9  ;;  %v7113_v17 = vpop.eup %4674  ;;  %4694 = vpow2.f32 %v2500_v43  ;;  %v9852_v9 = vld [vmem:[#allocation186_spill] sm:$0xff] }
 0x3e8   : > { %9848 = vst [vmem:[#allocation157_spill] sm:$0xff] %v7113_v17  ;;  %v7119_v45 = vpop.eup %4676  ;;  %4696 = vpow2.f32 %v2502_v48  ;;  %v9855_v17 = vld [vmem:[#allocation191_spill] sm:$0xff] }
 0x3e9   : > { %9851 = vst [vmem:[#allocation158_spill] sm:$0xff] %v7119_v45  ;;  %v7125_v53 = vpop.eup %4678  ;;  %4698 = vpow2.f32 %v2504_v11  ;;  %v9858_v45 = vld [vmem:[#allocation194_spill] sm:$0xff] }
 0x3ea   : > { %9854 = vst [vmem:[#allocation159_spill] sm:$0xff] %v7125_v53  ;;  %v7131_v43 = vpop.eup %4680  ;;  %4700 = vpow2.f32 %v2506_v54  ;;  %v9861_v53 = vld [vmem:[#allocation199_spill] sm:$0xff] }
 0x3eb   : > { %9857 = vst [vmem:[#allocation160_spill] sm:$0xff] %v7131_v43  ;;  %v7137_v48 = vpop.eup %4682  ;;  %4702 = vpow2.f32 %v2508_v19  ;;  %v9864_v43 = vld [vmem:[#allocation202_spill] sm:$0xff]  ;;  %v2520_v19 = vmul.f32 1.442695, %v9869_v12  ;;  %v9889_v12 = vsub.f32 %v9837_v15, %v6693_v16  ;;  %v9896_v15 = vld [vmem:[#allocation221_spill] sm:$0xff] }
 0x3ec   : > { %9860 = vst [vmem:[#allocation161_spill] sm:$0xff] %v7137_v48  ;;  %v7143_v11 = vpop.eup %4684  ;;  %4704 = vpow2.f32 %v2510_v28  ;;  %v9867_v48 = vld [vmem:[#allocation206_spill] sm:$0xff]  ;;  %v9885_v28 = vsub.f32 %v9835_v44, %v6689_v56  ;;  %v9892_v44 = vld [vmem:[#allocation219_spill] sm:$0xff] }
 0x3ed   : > { %9863 = vst [vmem:[#allocation162_spill] sm:$0xff] %v7143_v11  ;;  %v7149_v54 = vpop.eup %4686  ;;  %4706 = vpow2.f32 %v2512_v49  ;;  %v9875_v49 = vld [vmem:[#allocation210_spill] sm:$0xff] }
 0x3ee   : > { %9866 = vst [vmem:[#allocation163_spill] sm:$0xff] %v7149_v54  ;;  %v7158_v11 = vpop.eup %4688  ;;  %4708 = vpow2.f32 %v2514_v50  ;;  %v2522_v54 = vmul.f32 1.442695, %v9873_v30  ;;  %v9879_v50 = vld [vmem:[#allocation212_spill] sm:$0xff]  ;;  %v9893_v30 = vsub.f32 %v9838_v7, %v6689_v56 }
 0x3ef   : > { %9870 = vst [vmem:[#allocation164_spill] sm:$0xff] %v7158_v11  ;;  %v7167_v25 = vpop.eup %4690  ;;  %4710 = vpow2.f32 %v2516_v27  ;;  %v2524_v11 = vmul.f32 1.442695, %v9877_v63  ;;  %v9883_v27 = vld [vmem:[#allocation214_spill] sm:$0xff]  ;;  %v9897_v63 = vsub.f32 %v9840_v52, %v6693_v16 }
 0x3f0   : > { %9874 = vst [vmem:[#allocation165_spill] sm:$0xff] %v7167_v25  ;;  %v7176_v26 = vpop.eup %4692  ;;  %4712 = vpow2.f32 %v2518_v2  ;;  %v2526_v25 = vmul.f32 1.442695, %v9881_v3  ;;  %v9887_v2 = vld [vmem:[#allocation216_spill] sm:$0xff]  ;;  %v9901_v3 = vsub.f32 %v9841_v47, %v6689_v56 }
 0x3f1   : > { %9878 = vst [vmem:[#allocation166_spill] sm:$0xff] %v7176_v26  ;;  %v7185_v60 = vpop.eup %4694  ;;  %4714 = vpow2.f32 %v2520_v19  ;;  %v2528_v26 = vmul.f32 1.442695, %v9885_v28  ;;  %v9891_v19 = vld [vmem:[#allocation218_spill] sm:$0xff]  ;;  %v9904_v28 = vsub.f32 %v9843_v46, %v6693_v16 }
 0x3f2   : > { %9882 = vst [vmem:[#allocation167_spill] sm:$0xff] %v7185_v60  ;;  %v7194_v42 = vpop.eup %4696  ;;  %4716 = vpow2.f32 %v2522_v54  ;;  %v2530_v60 = vmul.f32 1.442695, %v9889_v12  ;;  %v9907_v12 = vsub.f32 %v9844_v51, %v6689_v56 }
 0x3f3   : > { %9886 = vst [vmem:[#allocation168_spill] sm:$0xff] %v7194_v42  ;;  %v7203_v1 = vpop.eup %4698  ;;  %4718 = vpow2.f32 %v2524_v11  ;;  %v2532_v42 = vmul.f32 1.442695, %v9893_v30  ;;  %v9910_v30 = vsub.f32 %v9846_v58, %v6693_v16 }
 0x3f4   : > { %9890 = vst [vmem:[#allocation169_spill] sm:$0xff] %v7203_v1  ;;  %v7212_v36 = vpop.eup %4700  ;;  %4720 = vpow2.f32 %v2526_v25  ;;  %v2534_v1 = vmul.f32 1.442695, %v9897_v63  ;;  %v2540_v25 = vmul.f32 1.442695, %v9907_v12  ;;  %v9913_v63 = vsub.f32 %v9847_v5, %v6689_v56 }
 0x3f5   : > { %9894 = vst [vmem:[#allocation170_spill] sm:$0xff] %v7212_v36  ;;  %v7221_v59 = vpop.eup %4702  ;;  %4722 = vpow2.f32 %v2528_v26  ;;  %v2536_v36 = vmul.f32 1.442695, %v9901_v3  ;;  %v2542_v26 = vmul.f32 1.442695, %v9910_v30  ;;  %v9916_v3 = vsub.f32 %v9849_v55, %v6693_v16 }
 0x3f6   : > { %9898 = vst [vmem:[#allocation171_spill] sm:$0xff] %v7221_v59  ;;  %v7230_v54 = vpop.eup %4704  ;;  %4724 = vpow2.f32 %v2530_v60  ;;  %v2538_v59 = vmul.f32 1.442695, %v9904_v28  ;;  %v2544_v60 = vmul.f32 1.442695, %v9913_v63  ;;  %v9919_v28 = vsub.f32 %v9850_v35, %v6689_v56 }
 0x3f7   : > { %v7239_v11 = vpop.eup %4706  ;;  %4726 = vpow2.f32 %v2532_v42  ;;  %v2546_v42 = vmul.f32 1.442695, %v9916_v3  ;;  %v9922_v3 = vsub.f32 %v9853_v8, %v6689_v56  ;;  %v9923_v12 = vsub.f32 %v9855_v17, %v6693_v16 }
 0x3f8   : > { %v7248_v7 = vpop.eup %4708  ;;  %4728 = vpow2.f32 %v2534_v1  ;;  %v2548_v1 = vmul.f32 1.442695, %v9919_v28  ;;  %v9924_v35 = vsub.f32 %v9856_v22, %v6689_v56  ;;  %v9928_v17 = vsub.f32 %v9861_v53, %v6693_v16 }
 0x3f9   : > { %v7257_v52 = vpop.eup %4710  ;;  %4730 = vpow2.f32 %v2536_v36  ;;  %v2552_v30 = vmul.f32 1.442695, %v9922_v3  ;;  %v2554_v63 = vmul.f32 1.442695, %v9923_v12  ;;  %v10000_v36 = vld [vmem:[#allocation94_spill] sm:$0xff] }
 0x3fa   : > { %v7266_v47 = vpop.eup %4712  ;;  %4732 = vpow2.f32 %v2538_v59  ;;  %v9921_v59 = vsub.f32 %v9852_v9, %v6693_v16  ;;  %v2556_v28 = vmul.f32 1.442695, %v9924_v35  ;;  %v2562_v12 = vmul.f32 1.442695, %v9928_v17 }
 0x3fb   : > { %v7275_v46 = vpop.eup %4714  ;;  %4734 = vpow2.f32 %v2540_v25  ;;  %v9930_v35 = vsub.f32 %v9864_v43, %v6693_v16  ;;  %v9933_v17 = vsub.f32 %v9868_v40, %v6689_v56  ;;  %v9935_v43 = vsub.f32 %v9871_v38, %v6693_v16 }
 0x3fc   : > { %v7284_v51 = vpop.eup %4716  ;;  %4736 = vpow2.f32 %v2542_v26  ;;  %v2550_v55 = vmul.f32 1.442695, %v9921_v59  ;;  %v9925_v26 = vsub.f32 %v9858_v45, %v6693_v16  ;;  %v9926_v59 = vsub.f32 %v9859_v39, %v6689_v56 }
 0x3fd   : > { %9920 = vst [vmem:[#allocation172_spill] sm:$0xff] %v7284_v51  ;;  %v7295_v25 = vpop.eup %4718  ;;  %4738 = vpow2.f32 %v2544_v60  ;;  %v9929_v60 = vsub.f32 %v9862_v33, %v6689_v56  ;;  %v2566_v45 = vmul.f32 1.442695, %v9930_v35  ;;  %v9931_v39 = vsub.f32 %v9865_v18, %v6689_v56 }
 0x3fe   : > { %v2558_v9 = vmul.f32 1.442695, %v9925_v26  ;;  %v2560_v8 = vmul.f32 1.442695, %v9926_v59  ;;  %v7306_v3 = vpop.eup %4720  ;;  %4740 = vpow2.f32 %v2546_v42  ;;  %v9932_v42 = vsub.f32 %v9867_v48, %v6693_v16 }
 0x3ff   : > { %9927 = vst [vmem:[#allocation175_spill] sm:$0xff] %v7306_v3  ;;  %v2564_v22 = vmul.f32 1.442695, %v9929_v60  ;;  %v7317_v26 = vpop.eup %4722  ;;  %4742 = vpow2.f32 %v2548_v1  ;;  %v2568_v59 = vmul.f32 1.442695, %v9931_v39  ;;  %v9936_v18 = vsub.f32 %v9872_v20, %v6689_v56  ;;  %v10080_v3 = vld [vmem:[#allocation40_spill] sm:$0xff] }
 0x400   : > { %v2570_v53 = vmul.f32 1.442695, %v9932_v42  ;;  %v2572_v33 = vmul.f32 1.442695, %v9933_v17  ;;  %v7328_v60 = vpop.eup %4724  ;;  %4744 = vpow2.f32 %v2550_v55  ;;  %v7333_v35 = vmul.f32 1.442695, %v9935_v43 }
 0x401   : > { %9934 = vst [vmem:[#allocation176_spill] sm:$0xff] %v7328_v60  ;;  %v7338_v1 = vmul.f32 1.442695, %v9936_v18  ;;  %v9937_v48 = vsub.f32 %v9875_v49, %v6693_v16  ;;  %v7345_v40 = vpop.eup %4726  ;;  %4746 = vpow2.f32 %v2552_v30  ;;  %v9939_v55 = vsub.f32 %v9876_v31, %v6689_v56 }
 0x402   : > { %9938 = vst [vmem:[#allocation178_spill] sm:$0xff] %v7345_v40  ;;  %v9940_v38 = vsub.f32 %v9879_v50, %v6693_v16  ;;  %v9941_v20 = vsub.f32 %v9880_v34, %v6689_v56  ;;  %v7362_v49 = vpop.eup %4728  ;;  %4748 = vpow2.f32 %v2554_v63  ;;  %v9943_v30 = vsub.f32 %v9883_v27, %v6693_v16 }
 0x403   : > { %v7343_v39 = vmul.f32 1.442695, %v9937_v48  ;;  %v7350_v42 = vmul.f32 1.442695, %v9939_v55  ;;  %9942 = vst [vmem:[#allocation180_spill] sm:$0xff] %v7362_v49  ;;  %v9944_v31 = vsub.f32 %v9884_v21, %v6689_v56  ;;  %v9945_v50 = vsub.f32 %v9887_v2, %v6693_v16  ;;  %v7379_v34 = vpop.eup %4730  ;;  %v10079_v49 = vld [vmem:[#allocation42_spill] sm:$0xff] }
 0x404   : > { %v7355_v17 = vmul.f32 1.442695, %v9940_v38  ;;  %v7360_v43 = vmul.f32 1.442695, %v9941_v20  ;;  %v7367_v18 = vmul.f32 1.442695, %v9943_v30  ;;  %4750 = vpow2.f32 %v2556_v28  ;;  %v7396_v30 = vpop.eup %4732 }
 0x405   : > { %v7372_v48 = vmul.f32 1.442695, %v9944_v31  ;;  %v7377_v55 = vmul.f32 1.442695, %v9945_v50  ;;  %9946 = vst [vmem:[#allocation183_spill] sm:$0xff] %v7379_v34  ;;  %v9947_v63 = vsub.f32 %v9888_v10, %v6689_v56  ;;  %v9948_v38 = vsub.f32 %v9891_v19, %v6693_v16  ;;  %9950 = vst [vmem:[#allocation184_spill] sm:$0xff] %v7396_v30  ;;  %v7404_v19 = vpop.eup %4734 }
 0x406   : > { %v9949_v20 = vsub.f32 %v9892_v44, %v6689_v56  ;;  %4752 = vpow2.f32 %v2558_v9  ;;  %v2819_v28 = vpack.c.bf16 %v6747_v14, %v6739_v29  ;;  %v2818_v10 = vpack.c.bf16 %v6743_v32, %v6735_v23  ;;  %9951 = vst [vmem:[#allocation186_spill] sm:$0xff] %v7404_v19  ;;  %v7413_v29 = vpop.eup %4736  ;;  %v9953_v32 = vld [vmem:[#allocation34_spill] sm:$0xff]  ;;  %v9954_v14 = vld [vmem:[#allocation35_spill] sm:$0xff] }
 0x407   : > { %v7384_v27 = vmul.f32 1.442695, %v9947_v63  ;;  %v7389_v21 = vmul.f32 1.442695, %v9948_v38  ;;  %v2821_v31 = vpack.c.bf16 %v6763_v62, %v6755_v0  ;;  %4754 = vpow2.f32 %v2560_v8  ;;  %9952 = vst [vmem:[#allocation188_spill] sm:$0xff] %v7413_v29  ;;  %v9955_v62 = vld [vmem:[#allocation37_spill] sm:$0xff] }
 0x408   : > { %v7394_v2 = vmul.f32 1.442695, %v9949_v20  ;;  %v2820_v44 = vpack.c.bf16 %v6759_v61, %v6751_v41  ;;  %v2823_v50 = vpack.c.bf16 %v6779_v13, %v6771_v6  ;;  %v2822_v9 = vpack.c.bf16 %v6775_v24, %v6767_v4  ;;  %3191 = vmatprep.subr.bf16.mxu1 %v2819_v28  ;;  %v9956_v8 = vld [vmem:[#allocation39_spill] sm:$0xff]  ;;  %v7421_v61 = vpop.eup %4738  ;;  %v9958_v6 = vld [vmem:[#allocation36_spill] sm:$0xff]  ;;  %v9959_v4 = vld [vmem:[#allocation38_spill] sm:$0xff] }
 0x409   : > { %4756 = vpow2.f32 %v2562_v12  ;;  %v2825_v23 = vpack.c.bf16 %v6795_v57, %v6787_v37  ;;  %9957 = vst [vmem:[#allocation191_spill] sm:$0xff] %v7421_v61  ;;  %3192 = vmatpush1.bf16.msra.mxu1 %v2818_v10  ;;  %v9960_v13 = vld [vmem:[#allocation41_spill] sm:$0xff]  ;;  %v9961_v63 = vld [vmem:[#allocation43_spill] sm:$0xff]  ;;  %v7429_v37 = vpop.eup %4740  ;;  %v7475_v30 = vld [vmem:[%s7472_s9] sm:$0xff] }
 0x40a   : > { %4758 = vpow2.f32 %v2564_v22  ;;  %9964 = vst [vmem:[#allocation192_spill] sm:$0xff] %v7429_v37  ;;  %3193 = vmatprep.subr.bf16.mxu1 %v2821_v31  ;;  %v9966_v0 = vld [vmem:[#allocation47_spill] sm:$0xff]  ;;  %v7437_v24 = vpop.eup %4742  ;;  %9995 = vst [vmem:[#allocation194_spill] sm:$0xff] %v7475_v30  ;;  %v10020_v38 = vld [vmem:[#allocation132_spill] sm:$0xff] }
 0x40b   : > { %4760 = vpow2.f32 %v2566_v45  ;;  %v7445_v19 = vpop.eup %4744  ;;  %v10021_v29 = vld [vmem:[#allocation136_spill] sm:$0xff]  ;;  %v10031_v41 = vld [vmem:[#allocation157_spill] sm:$0xff]  ;;  %v10049_v31 = vld [vmem:[#allocation222_spill] sm:$0xff] }
 0x40c   : > { %4762 = vpow2.f32 %v2568_v59  ;;  %v7453_v61 = vpop.eup %4746  ;;  %v9998_v59 = vld [vmem:[#allocation76_spill] sm:$0xff] }
 0x40d   : > { %4764 = vpow2.f32 %v2570_v53  ;;  %3194 = vmatpush1.bf16.msra.mxu1 %v2820_v44  ;;  %v7461_v5 = vpop.eup %4748  ;;  %v7478_v53 = vld [vmem:[%s7472_s9 + $0x20] sm:$0xff] }
 0x40e   : > { %4766 = vpow2.f32 %v2572_v33  ;;  %3195 = vmatprep.subr.bf16.mxu1 %v2823_v50  ;;  %9996 = vst [vmem:[#allocation196_spill] sm:$0xff] %v7478_v53  ;;  %v9997_v50 = vld [vmem:[#allocation72_spill] sm:$0xff] }
 0x40f   : > { %4768 = vpow2.f32 %v7333_v35  ;;  %v7480_v35 = vpop.eup %4750  ;;  %v10009_v33 = vld [vmem:[#allocation220_spill] sm:$0xff] }
 0x410   : > { %4770 = vpow2.f32 %v7338_v1  ;;  %v7489_v57 = vpop.eup %4752  ;;  %v10010_v10 = vsub.f32 %v10009_v33, %v6693_v16  ;;  %v10032_v1 = vpack.c.bf16 %v9954_v14, %v9953_v32  ;;  %v10054_v33 = vld [vmem:[#allocation171_spill] sm:$0xff]  ;;  %v10073_v34 = vld [vmem:[#allocation188_spill] sm:$0xff] }
 0x411   : > { %4772 = vpow2.f32 %v7343_v39  ;;  %v7498_v58 = vpop.eup %4754  ;;  %3196 = vmatpush1.bf16.msra.mxu1 %v2822_v9  ;;  %v4142_v39 = vcombine.high %v7475_v30, %v7478_v53  ;;  %v10036_v30 = vld [vmem:[#allocation161_spill] sm:$0xff]  ;;  %v10038_v9 = vld [vmem:[#allocation160_spill] sm:$0xff] }
 0x412   : > { %4774 = vpow2.f32 %v7350_v42  ;;  %v2598_v20 = vmul.f32 1.442695, %v10010_v10  ;;  %3197 = vmatprep.subr.bf16.mxu1 %v2825_v23  ;;  %v10029_v42 = vld [vmem:[#allocation152_spill] sm:$0xff]  ;;  %v10046_v53 = vld [vmem:[#allocation169_spill] sm:$0xff]  ;;  %v10055_v23 = vld [vmem:[#allocation170_spill] sm:$0xff] }
 0x413   : > { %v7508_v12 = vpop.eup %4756  ;;  %4776 = vpow2.f32 %v7355_v17  ;;  %3223 = vmatprep.mubr.bf16.mxu1 %v4142_v39  ;;  %v10023_v17 = vld [vmem:[#allocation149_spill] sm:$0xff]  ;;  %v10044_v39 = vld [vmem:[#allocation164_spill] sm:$0xff] }
 0x414   : > { %10013 = vst [vmem:[#allocation199_spill] sm:$0xff] %v7508_v12  ;;  %v7517_v37 = vpop.eup %4758  ;;  %4778 = vpow2.f32 %v7360_v43 }
 0x415   : > { %v7526_v22 = vpop.eup %4760  ;;  %4780 = vpow2.f32 %v7367_v18  ;;  %3198 = vmatpush1.bf16.msra.mxu1 %v10032_v1  ;;  %v10043_v1 = vld [vmem:[#allocation162_spill] sm:$0xff]  ;;  %v10061_v18 = vpack.c.bf16 %v9959_v4, %v9958_v6  ;;  %v10081_v6 = vpack.c.bf16 %v10079_v49, %v10080_v3 }
 0x416   : > { %v7535_v45 = vpop.eup %4762  ;;  %4782 = vpow2.f32 %v7372_v48  ;;  %v10040_v48 = vpack.c.bf16 %v9956_v8, %v9955_v62  ;;  %v10050_v62 = vsub.f32 %v10049_v31, %v6693_v16  ;;  %v10057_v31 = vld [vmem:[#allocation223_spill] sm:$0xff] }
 0x417   : > { %v7547_v10 = vpop.eup %4764  ;;  %4784 = vpow2.f32 %v7377_v55  ;;  %v10048_v55 = vsub.f32 %v9896_v15, %v6689_v56 }
 0x418   : > { %10039 = vst [vmem:[#allocation200_spill] sm:$0xff] %v7547_v10  ;;  %3199 = vmatprep.subr.bf16.mxu1 %v10040_v48  ;;  %v7559_v44 = vpop.eup %4766  ;;  %4786 = vpow2.f32 %v7384_v27  ;;  %v2602_v8 = vmul.f32 1.442695, %v10050_v62  ;;  %v10058_v62 = vsub.f32 %v10057_v31, %v6689_v56  ;;  %v10059_v48 = vld [vmem:[#allocation224_spill] sm:$0xff]  ;;  %v10071_v27 = vld [vmem:[#allocation191_spill] sm:$0xff]  ;;  %v10103_v10 = vld [vmem:[#allocation49_spill] sm:$0xff] }
 0x419   : > { %10047 = vst [vmem:[#allocation202_spill] sm:$0xff] %v7559_v44  ;;  %v2600_v43 = vmul.f32 1.442695, %v10048_v55  ;;  %v7570_v32 = vpop.eup %4768  ;;  %4788 = vpow2.f32 %v7389_v21  ;;  %v10060_v21 = vsub.f32 %v10059_v48, %v6693_v16  ;;  %3200 = vmatpush1.bf16.msra.mxu1 %v10061_v18  ;;  %v10065_v18 = vld [vmem:[#allocation225_spill] sm:$0xff]  ;;  %v10082_v48 = vld [vmem:[#allocation192_spill] sm:$0xff] }
 0x41a   : > { %10053 = vst [vmem:[#allocation204_spill] sm:$0xff] %v7570_v32  ;;  %v7579_v55 = vpop.eup %4770  ;;  %4790 = vpow2.f32 %v7394_v2  ;;  %v2604_v28 = vmul.f32 1.442695, %v10058_v62  ;;  %v10063_v2 = vpack.c.bf16 %v9961_v63, %v9960_v13  ;;  %v10066_v62 = vsub.f32 %v10065_v18, %v6689_v56 }
 0x41b   : > { %10056 = vst [vmem:[#allocation206_spill] sm:$0xff] %v7579_v55  ;;  %v2606_v14 = vmul.f32 1.442695, %v10060_v21  ;;  %v7593_v15 = vpop.eup %4772  ;;  %4792 = vpow2.f32 %v2598_v20  ;;  %v10067_v21 = vld [vmem:[#allocation226_spill] sm:$0xff] }
 0x41c   : > { %10062 = vst [vmem:[#allocation207_spill] sm:$0xff] %v7593_v15  ;;  %3201 = vmatprep.subr.bf16.mxu1 %v10063_v2  ;;  %v7604_v4 = vpop.eup %4774  ;;  %4794 = vpow2.f32 %v2600_v43  ;;  %v2608_v20 = vmul.f32 1.442695, %v10066_v62  ;;  %v10068_v13 = vsub.f32 %v10067_v21, %v6693_v16  ;;  %v10075_v21 = vld [vmem:[#allocation227_spill] sm:$0xff]  ;;  %v10077_v2 = vld [vmem:[#allocation228_spill] sm:$0xff] }
 0x41d   : > { %10064 = vst [vmem:[#allocation208_spill] sm:$0xff] %v7604_v4  ;;  %v7614_v31 = vpop.eup %4776  ;;  %4796 = vpow2.f32 %v2602_v8  ;;  %v10078_v60 = vsub.f32 %v10077_v2, %v6693_v16  ;;  %3202 = vmatpush1.bf16.msra.mxu1 %v10081_v6  ;;  %v10087_v6 = vld [vmem:[#allocation229_spill] sm:$0xff]  ;;  %v10096_v43 = vld [vmem:[#allocation44_spill] sm:$0xff] }
 0x41e   : > { %v2610_v63 = vmul.f32 1.442695, %v10068_v13  ;;  %10069 = vst [vmem:[#allocation209_spill] sm:$0xff] %v7614_v31  ;;  %v7622_v62 = vpop.eup %4778  ;;  %4798 = vpow2.f32 %v2604_v28  ;;  %v10076_v13 = vsub.f32 %v10075_v21, %v6689_v56  ;;  %v10084_v28 = vld [vmem:[#allocation45_spill] sm:$0xff]  ;;  %v10088_v2 = vsub.f32 %v10087_v6, %v6689_v56  ;;  %v10099_v6 = vld [vmem:[#allocation236_spill] sm:$0xff] }
 0x41f   : > { %10074 = vst [vmem:[#allocation210_spill] sm:$0xff] %v7622_v62  ;;  %v2614_v8 = vmul.f32 1.442695, %v10078_v60  ;;  %v7635_v40 = vpop.eup %4780  ;;  %4800 = vpow2.f32 %v2606_v14  ;;  %v10085_v18 = vpack.c.bf16 %v9966_v0, %v10084_v28  ;;  %v10095_v28 = vld [vmem:[#allocation46_spill] sm:$0xff]  ;;  %v2212_v4 = vsub.f32 %v10099_v6, %v6693_v16  ;;  %v10102_v62 = vld [vmem:[#allocation51_spill] sm:$0xff]  ;;  %v10118_v15 = vld [vmem:[#allocation48_spill] sm:$0xff] }
 0x420   : > { %v2612_v51 = vmul.f32 1.442695, %v10076_v13  ;;  %10083 = vst [vmem:[#allocation211_spill] sm:$0xff] %v7635_v40  ;;  %v7646_v49 = vpop.eup %4782  ;;  %4802 = vpow2.f32 %v2608_v20  ;;  %v2616_v14 = vmul.f32 1.442695, %v10088_v2  ;;  %v10089_v13 = vld [vmem:[#allocation230_spill] sm:$0xff]  ;;  %v10097_v12 = vpack.c.bf16 %v10095_v28, %v10096_v43 }
 0x421   : > { %3203 = vmatprep.subr.bf16.mxu1 %v10085_v18  ;;  %10086 = vst [vmem:[#allocation212_spill] sm:$0xff] %v7646_v49  ;;  %v10090_v0 = vsub.f32 %v10089_v13, %v6693_v16  ;;  %v7656_v21 = vpop.eup %4784  ;;  %4804 = vpow2.f32 %v2610_v63  ;;  %v10093_v13 = vld [vmem:[#allocation231_spill] sm:$0xff]  ;;  %v10104_v43 = vpack.c.bf16 %v10102_v62, %v10103_v10  ;;  %v10106_v20 = vld [vmem:[#allocation237_spill] sm:$0xff]  ;;  %v10111_v10 = vld [vmem:[#allocation234_spill] sm:$0xff]  ;;  %v2630_v32 = vmul.f32 1.442695, %v2212_v4 }
 0x422   : > { %10091 = vst [vmem:[#allocation213_spill] sm:$0xff] %v7656_v21  ;;  %v7664_v2 = vpop.eup %4786  ;;  %4806 = vpow2.f32 %v2612_v51  ;;  %3204 = vmatpush1.bf16.msra.mxu1 %v10097_v12  ;;  %v10100_v51 = vld [vmem:[#allocation232_spill] sm:$0xff]  ;;  %v2213_v63 = vsub.f32 %v10106_v20, %v6689_v56  ;;  %v10107_v40 = vld [vmem:[#allocation233_spill] sm:$0xff]  ;;  %v10112_v62 = vsub.f32 %v10111_v10, %v6693_v16  ;;  %v10114_v49 = vld [vmem:[#allocation239_spill] sm:$0xff] }
 0x423   : > { %v2618_v18 = vmul.f32 1.442695, %v10090_v0  ;;  %10092 = vst [vmem:[#allocation214_spill] sm:$0xff] %v7664_v2  ;;  %v10094_v0 = vsub.f32 %v10093_v13, %v6689_v56  ;;  %v7676_v3 = vpop.eup %4788  ;;  %4808 = vpow2.f32 %v2614_v8  ;;  %v10101_v13 = vsub.f32 %v10100_v51, %v6693_v16  ;;  %3205 = vmatprep.subr.bf16.mxu1 %v10104_v43  ;;  %v10110_v51 = vld [vmem:[#allocation238_spill] sm:$0xff]  ;;  %v10121_v10 = vld [vmem:[#allocation240_spill] sm:$0xff] }
 0x424   : > { %10098 = vst [vmem:[#allocation215_spill] sm:$0xff] %v7676_v3  ;;  %v7688_v28 = vpop.eup %4790  ;;  %4810 = vpow2.f32 %v2616_v14  ;;  %v10108_v8 = vsub.f32 %v10107_v40, %v6689_v56  ;;  %v2626_v43 = vmul.f32 1.442695, %v10112_v62  ;;  %v2215_v20 = vsub.f32 %v10114_v49, %v6689_v56  ;;  %v10115_v14 = vld [vmem:[#allocation235_spill] sm:$0xff]  ;;  %v10117_v2 = vld [vmem:[#allocation50_spill] sm:$0xff] }
 0x425   : > { %v2620_v60 = vmul.f32 1.442695, %v10094_v0  ;;  %v2622_v0 = vmul.f32 1.442695, %v10101_v13  ;;  %10105 = vst [vmem:[#allocation216_spill] sm:$0xff] %v7688_v28  ;;  %v7695_v21 = vpop.eup %4792  ;;  %v2214_v13 = vsub.f32 %v10110_v51, %v6693_v16  ;;  %4812 = vpow2.f32 %v2618_v18  ;;  %v10122_v49 = vld [vmem:[#allocation55_spill] sm:$0xff] }
 0x426   : > { %v2624_v6 = vmul.f32 1.442695, %v10108_v8  ;;  %10109 = vst [vmem:[#allocation217_spill] sm:$0xff] %v7695_v21  ;;  %v7702_v12 = vpop.eup %4794  ;;  %v10116_v40 = vsub.f32 %v10115_v14, %v6689_v56  ;;  %v10119_v31 = vpack.c.bf16 %v10117_v2, %v10118_v15  ;;  %v2216_v62 = vsub.f32 %v10121_v10, %v6693_v16  ;;  %v10126_v15 = vld [vmem:[#allocation241_spill] sm:$0xff]  ;;  %v10128_v10 = vld [vmem:[#allocation242_spill] sm:$0xff]  ;;  %v10132_v21 = vld [vmem:[#allocation52_spill] sm:$0xff] }
 0x427   : > { %10113 = vst [vmem:[#allocation218_spill] sm:$0xff] %v7702_v12  ;;  %4814 = vpow2.f32 %v2620_v60  ;;  %v7714_v51 = vpop.eup %4796  ;;  %v10123_v60 = vld [vmem:[#allocation53_spill] sm:$0xff]  ;;  %v2632_v2 = vmul.f32 1.442695, %v2213_v63  ;;  %v2634_v4 = vmul.f32 1.442695, %v2214_v13 }
 0x428   : > { %v2628_v8 = vmul.f32 1.442695, %v10116_v40  ;;  %3206 = vmatpush1.bf16.msra.mxu1 %v10119_v31  ;;  %10120 = vst [vmem:[#allocation219_spill] sm:$0xff] %v7714_v51  ;;  %4816 = vpow2.f32 %v2622_v0  ;;  %v10124_v44 = vpack.c.bf16 %v10122_v49, %v10123_v60  ;;  %v7723_v40 = vpop.eup %4798  ;;  %v2217_v31 = vsub.f32 %v10126_v15, %v6689_v56  ;;  %v10131_v14 = vld [vmem:[#allocation54_spill] sm:$0xff]  ;;  %v10135_v15 = vld [vmem:[#allocation244_spill] sm:$0xff]  ;;  %v10137_v12 = vld [vmem:[#allocation57_spill] sm:$0xff] }
 0x429   : > { %10125 = vst [vmem:[#allocation221_spill] sm:$0xff] %v7723_v40  ;;  %4818 = vpow2.f32 %v2624_v6  ;;  %v7727_v18 = vpop.eup %4800  ;;  %v2218_v0 = vsub.f32 %v10128_v10, %v6693_v16  ;;  %v2636_v60 = vmul.f32 1.442695, %v2215_v20  ;;  %v10133_v28 = vpack.c.bf16 %v10131_v14, %v10132_v21  ;;  %v10136_v10 = vld [vmem:[#allocation59_spill] sm:$0xff]  ;;  %v10140_v21 = vld [vmem:[#allocation245_spill] sm:$0xff]  ;;  %v10145_v20 = vld [vmem:[#allocation58_spill] sm:$0xff] }
 0x42a   : > { %3207 = vmatprep.subr.bf16.mxu1 %v10124_v44  ;;  %10127 = vst [vmem:[#allocation34_spill] sm:$0xff] %v7727_v18  ;;  %4820 = vpow2.f32 %v2626_v43  ;;  %v7731_v3 = vpop.eup %4802  ;;  %v10130_v44 = vld [vmem:[#allocation243_spill] sm:$0xff]  ;;  %v2220_v43 = vsub.f32 %v10135_v15, %v6693_v16  ;;  %v2638_v13 = vmul.f32 1.442695, %v2216_v62  ;;  %v10138_v55 = vpack.c.bf16 %v10136_v10, %v10137_v12  ;;  %v10142_v15 = vld [vmem:[#allocation246_spill] sm:$0xff]  ;;  %v10146_v51 = vld [vmem:[#allocation56_spill] sm:$0xff] }
 0x42b   : > { %10129 = vst [vmem:[#allocation35_spill] sm:$0xff] %v7731_v3  ;;  %v2219_v49 = vsub.f32 %v10130_v44, %v6689_v56  ;;  %4822 = vpow2.f32 %v2628_v8  ;;  %v7740_v6 = vpop.eup %4804  ;;  %v2640_v14 = vmul.f32 1.442695, %v2217_v31  ;;  %v2642_v62 = vmul.f32 1.442695, %v2218_v0  ;;  %v10151_v40 = vld [vmem:[#allocation61_spill] sm:$0xff] }
 0x42c   : > { %3208 = vmatpush1.bf16.msra.mxu1 %v10133_v28  ;;  %10134 = vst [vmem:[#allocation37_spill] sm:$0xff] %v7740_v6  ;;  %4824 = vpow2.f32 %v2630_v32  ;;  %v7749_v8 = vpop.eup %4806  ;;  %v2221_v28 = vsub.f32 %v10140_v21, %v6689_v56  ;;  %v2222_v32 = vsub.f32 %v10142_v15, %v6693_v16  ;;  %v10147_v18 = vpack.c.bf16 %v10145_v20, %v10146_v51  ;;  %v10149_v21 = vld [vmem:[#allocation248_spill] sm:$0xff]  ;;  %v10150_v15 = vld [vmem:[#allocation63_spill] sm:$0xff] }
 0x42d   : > { %3209 = vmatprep.subr.bf16.mxu1 %v10138_v55  ;;  %10139 = vst [vmem:[#allocation39_spill] sm:$0xff] %v7749_v8  ;;  %4826 = vpow2.f32 %v2632_v2  ;;  %v7753_v44 = vpop.eup %4808  ;;  %v10144_v55 = vld [vmem:[#allocation247_spill] sm:$0xff]  ;;  %v2644_v10 = vmul.f32 1.442695, %v2219_v49  ;;  %v2646_v0 = vmul.f32 1.442695, %v2220_v43  ;;  %v10152_v3 = vpack.c.bf16 %v10150_v15, %v10151_v40 }
 0x42e   : > { %10141 = vst [vmem:[#allocation36_spill] sm:$0xff] %v7753_v44  ;;  %4828 = vpow2.f32 %v2634_v4  ;;  %v7757_v63 = vpop.eup %4810  ;;  %v2223_v12 = vsub.f32 %v10144_v55, %v6689_v56  ;;  %v2224_v4 = vsub.f32 %v10149_v21, %v6693_v16  ;;  %v2648_v20 = vmul.f32 1.442695, %v2221_v28  ;;  %v10156_v21 = vld [vmem:[#allocation250_spill] sm:$0xff]  ;;  %v10160_v6 = vld [vmem:[#allocation60_spill] sm:$0xff]  ;;  %v10165_v8 = vld [vmem:[#allocation65_spill] sm:$0xff] }
 0x42f   : > { %10143 = vst [vmem:[#allocation38_spill] sm:$0xff] %v7757_v63  ;;  %4830 = vpow2.f32 %v2636_v60  ;;  %v7766_v2 = vpop.eup %4812  ;;  %v2650_v43 = vmul.f32 1.442695, %v2222_v32  ;;  %v10159_v49 = vld [vmem:[#allocation62_spill] sm:$0xff] }
 0x430   : > { %3210 = vmatpush1.bf16.msra.mxu1 %v10147_v18  ;;  %10148 = vst [vmem:[#allocation41_spill] sm:$0xff] %v7766_v2  ;;  %4832 = vpow2.f32 %v2638_v13  ;;  %v10154_v18 = vld [vmem:[#allocation249_spill] sm:$0xff]  ;;  %v2226_v13 = vsub.f32 %v10156_v21, %v6693_v16  ;;  %v2652_v15 = vmul.f32 1.442695, %v2223_v12  ;;  %v10161_v44 = vpack.c.bf16 %v10159_v49, %v10160_v6  ;;  %v10164_v21 = vld [vmem:[#allocation67_spill] sm:$0xff]  ;;  %v10173_v12 = vld [vmem:[#allocation66_spill] sm:$0xff] }
 0x431   : > { %3211 = vmatprep.subr.bf16.mxu1 %v10152_v3  ;;  %v7775_v60 = vpop.eup %4814  ;;  %v2225_v51 = vsub.f32 %v10154_v18, %v6689_v56  ;;  %4834 = vpow2.f32 %v2640_v14  ;;  %v10158_v3 = vld [vmem:[#allocation251_spill] sm:$0xff]  ;;  %v10163_v18 = vld [vmem:[#allocation252_spill] sm:$0xff]  ;;  %v2654_v32 = vmul.f32 1.442695, %v2224_v4  ;;  %v10166_v63 = vpack.c.bf16 %v10164_v21, %v10165_v8  ;;  %v10168_v6 = vld [vmem:[#allocation253_spill] sm:$0xff] }
 0x432   : > { %10153 = vst [vmem:[#allocation43_spill] sm:$0xff] %v7775_v60  ;;  %v7779_v55 = vpop.eup %4816  ;;  %4836 = vpow2.f32 %v2642_v62  ;;  %v2227_v40 = vsub.f32 %v10158_v3, %v6689_v56  ;;  %v2228_v62 = vsub.f32 %v10163_v18, %v6693_v16  ;;  %v10170_v18 = vld [vmem:[#allocation254_spill] sm:$0xff]  ;;  %v2658_v4 = vmul.f32 1.442695, %v2226_v13  ;;  %v10174_v2 = vld [vmem:[#allocation64_spill] sm:$0xff]  ;;  %v10179_v60 = vld [vmem:[#allocation69_spill] sm:$0xff] }
 0x433   : > { %10155 = vst [vmem:[#allocation47_spill] sm:$0xff] %v7779_v55  ;;  %v7783_v31 = vpop.eup %4818  ;;  %4838 = vpow2.f32 %v2644_v10  ;;  %v2656_v49 = vmul.f32 1.442695, %v2225_v51  ;;  %v10175_v55 = vpack.c.bf16 %v10173_v12, %v10174_v2  ;;  %v10182_v2 = vld [vmem:[#allocation257_spill] sm:$0xff] }
 0x434   : > { %10157 = vst [vmem:[#allocation72_spill] sm:$0xff] %v7783_v31  ;;  %3212 = vmatpush1.bf16.msra.mxu1 %v10161_v44  ;;  %v7792_v14 = vpop.eup %4820  ;;  %4840 = vpow2.f32 %v2646_v0  ;;  %v2229_v44 = vsub.f32 %v10168_v6, %v6689_v56  ;;  %v2230_v0 = vsub.f32 %v10170_v18, %v6693_v16  ;;  %v2660_v21 = vmul.f32 1.442695, %v2227_v40  ;;  %v10177_v6 = vld [vmem:[#allocation256_spill] sm:$0xff]  ;;  %v10178_v18 = vld [vmem:[#allocation71_spill] sm:$0xff]  ;;  %v10186_v40 = vld [vmem:[#allocation70_spill] sm:$0xff] }
 0x435   : > { %10162 = vst [vmem:[#allocation76_spill] sm:$0xff] %v7792_v14  ;;  %3213 = vmatprep.subr.bf16.mxu1 %v10166_v63  ;;  %v7801_v10 = vpop.eup %4822  ;;  %4842 = vpow2.f32 %v2648_v20  ;;  %v10172_v63 = vld [vmem:[#allocation255_spill] sm:$0xff]  ;;  %v2662_v13 = vmul.f32 1.442695, %v2228_v62  ;;  %v10180_v31 = vpack.c.bf16 %v10178_v18, %v10179_v60  ;;  %v10187_v14 = vld [vmem:[#allocation68_spill] sm:$0xff] }
 0x436   : > { %10167 = vst [vmem:[#allocation94_spill] sm:$0xff] %v7801_v10  ;;  %v7805_v3 = vpop.eup %4824  ;;  %4844 = vpow2.f32 %v2650_v43  ;;  %v2231_v8 = vsub.f32 %v10172_v63, %v6689_v56  ;;  %v2232_v43 = vsub.f32 %v10177_v6, %v6693_v16  ;;  %v2664_v12 = vmul.f32 1.442695, %v2229_v44  ;;  %v10184_v6 = vld [vmem:[#allocation258_spill] sm:$0xff] }
 0x437   : > { %10169 = vst [vmem:[#allocation220_spill] sm:$0xff] %v7805_v3  ;;  %v7809_v28 = vpop.eup %4826  ;;  %4846 = vpow2.f32 %v2652_v15  ;;  %v2666_v62 = vmul.f32 1.442695, %v2230_v0  ;;  %v10188_v3 = vpack.c.bf16 %v10186_v40, %v10187_v14  ;;  %v10192_v10 = vld [vmem:[#allocation74_spill] sm:$0xff]  ;;  %v10195_v14 = vld [vmem:[#allocation261_spill] sm:$0xff] }
 0x438   : > { %10171 = vst [vmem:[#allocation132_spill] sm:$0xff] %v7809_v28  ;;  %3214 = vmatpush1.bf16.msra.mxu1 %v10175_v55  ;;  %v7818_v20 = vpop.eup %4828  ;;  %4848 = vpow2.f32 %v2654_v32  ;;  %v2233_v55 = vsub.f32 %v10182_v2, %v6689_v56  ;;  %v2234_v32 = vsub.f32 %v10184_v6, %v6693_v16  ;;  %v2668_v18 = vmul.f32 1.442695, %v2231_v8  ;;  %v10190_v2 = vld [vmem:[#allocation260_spill] sm:$0xff]  ;;  %v10191_v6 = vld [vmem:[#allocation82_spill] sm:$0xff] }
 0x439   : > { %10176 = vst [vmem:[#allocation136_spill] sm:$0xff] %v7818_v20  ;;  %3215 = vmatprep.subr.bf16.mxu1 %v10180_v31  ;;  %v7827_v15 = vpop.eup %4830  ;;  %4850 = vpow2.f32 %v2656_v49  ;;  %v10185_v31 = vld [vmem:[#allocation259_spill] sm:$0xff]  ;;  %v2670_v0 = vmul.f32 1.442695, %v2232_v43  ;;  %v10193_v28 = vpack.c.bf16 %v10191_v6, %v10192_v10  ;;  %v10200_v8 = vpack.c.bf16 %v9998_v59, %v9997_v50  ;;  %v10206_v59 = vld [vmem:[#allocation78_spill] sm:$0xff] }
 0x43a   : > { %10181 = vst [vmem:[#allocation149_spill] sm:$0xff] %v7827_v15  ;;  %v7831_v63 = vpop.eup %4832  ;;  %4852 = vpow2.f32 %v2658_v4  ;;  %v2235_v60 = vsub.f32 %v10185_v31, %v6689_v56  ;;  %v2236_v4 = vsub.f32 %v10190_v2, %v6693_v16  ;;  %v2672_v40 = vmul.f32 1.442695, %v2233_v55  ;;  %v10197_v2 = vld [vmem:[#allocation73_spill] sm:$0xff] }
 0x43b   : > { %10183 = vst [vmem:[#allocation152_spill] sm:$0xff] %v7831_v63  ;;  %v7835_v51 = vpop.eup %4834  ;;  %4854 = vpow2.f32 %v2660_v21  ;;  %v2674_v43 = vmul.f32 1.442695, %v2234_v32  ;;  %v2241_v50 = vsub.f32 %v10206_v59, %v6689_v56  ;;  %v10212_v59 = vld [vmem:[#allocation84_spill] sm:$0xff] }
 0x43c   : > { %3216 = vmatpush1.bf16.msra.mxu1 %v10188_v3  ;;  %v7844_v49 = vpop.eup %4836  ;;  %4856 = vpow2.f32 %v2662_v13  ;;  %v2237_v3 = vsub.f32 %v10195_v14, %v6689_v56  ;;  %v2238_v13 = vsub.f32 %v10197_v2, %v6693_v16  ;;  %v2676_v6 = vmul.f32 1.442695, %v2235_v60  ;;  %v10202_v14 = vld [vmem:[#allocation77_spill] sm:$0xff]  ;;  %v10203_v2 = vld [vmem:[#allocation86_spill] sm:$0xff]  ;;  %v10211_v60 = vld [vmem:[#allocation88_spill] sm:$0xff] }
 0x43d   : > { %10189 = vst [vmem:[#allocation157_spill] sm:$0xff] %v7844_v49  ;;  %3217 = vmatprep.subr.bf16.mxu1 %v10193_v28  ;;  %v7853_v21 = vpop.eup %4838  ;;  %4858 = vpow2.f32 %v2664_v12  ;;  %v10199_v28 = vld [vmem:[#allocation75_spill] sm:$0xff]  ;;  %v2678_v32 = vmul.f32 1.442695, %v2236_v4  ;;  %v10204_v20 = vpack.c.bf16 %v10000_v36, %v10203_v2  ;;  %v10228_v63 = vld [vmem:[#allocation96_spill] sm:$0xff] }
 0x43e   : > { %10194 = vst [vmem:[#allocation161_spill] sm:$0xff] %v7853_v21  ;;  %v7857_v31 = vpop.eup %4840  ;;  %4860 = vpow2.f32 %v2666_v62  ;;  %v2239_v10 = vsub.f32 %v10199_v28, %v6689_v56  ;;  %v2240_v62 = vsub.f32 %v10202_v14, %v6693_v16  ;;  %v2682_v36 = vmul.f32 1.442695, %v2238_v13  ;;  %v10210_v14 = vld [vmem:[#allocation80_spill] sm:$0xff]  ;;  %v10217_v21 = vld [vmem:[#allocation98_spill] sm:$0xff] }
 0x43f   : > { %10196 = vst [vmem:[#allocation160_spill] sm:$0xff] %v7857_v31  ;;  %v7861_v44 = vpop.eup %4842  ;;  %4862 = vpow2.f32 %v2668_v18  ;;  %v2243_v2 = vsub.f32 %v10210_v14, %v6689_v56  ;;  %v10216_v31 = vld [vmem:[#allocation106_spill] sm:$0xff] }
 0x440   : > { %10198 = vst [vmem:[#allocation162_spill] sm:$0xff] %v7861_v44  ;;  %3218 = vmatpush1.bf16.msra.mxu1 %v10200_v8  ;;  %v7870_v12 = vpop.eup %4844  ;;  %4864 = vpow2.f32 %v2670_v0  ;;  %v2680_v8 = vmul.f32 1.442695, %v2237_v3  ;;  %v10208_v0 = vld [vmem:[#allocation79_spill] sm:$0xff]  ;;  %v2684_v55 = vmul.f32 1.442695, %v2239_v10  ;;  %v10218_v44 = vpack.c.bf16 %v10216_v31, %v10217_v21 }
 0x441   : > { %10201 = vst [vmem:[#allocation164_spill] sm:$0xff] %v7870_v12  ;;  %3219 = vmatprep.subr.bf16.mxu1 %v10204_v20  ;;  %v7879_v18 = vpop.eup %4846  ;;  %4866 = vpow2.f32 %v2672_v40  ;;  %v2242_v4 = vsub.f32 %v10208_v0, %v6693_v16  ;;  %v10213_v40 = vpack.c.bf16 %v10211_v60, %v10212_v59  ;;  %v10215_v0 = vld [vmem:[#allocation81_spill] sm:$0xff]  ;;  %v2686_v13 = vmul.f32 1.442695, %v2240_v62  ;;  %v7907_v10 = vld [vmem:[%s7472_s9 + $0x60] sm:$0xff]  ;;  %v10220_v59 = vld [vmem:[#allocation83_spill] sm:$0xff] }
 0x442   : > { %10205 = vst [vmem:[#allocation169_spill] sm:$0xff] %v7879_v18  ;;  %v7883_v28 = vpop.eup %4848  ;;  %4868 = vpow2.f32 %v2674_v43  ;;  %v2244_v43 = vsub.f32 %v10215_v0, %v6693_v16  ;;  %v10221_v0 = vld [vmem:[#allocation85_spill] sm:$0xff]  ;;  %v2688_v62 = vmul.f32 1.442695, %v2241_v50  ;;  %v10224_v12 = vld [vmem:[#allocation196_spill] sm:$0xff] }
 0x443   : > { %10207 = vst [vmem:[#allocation222_spill] sm:$0xff] %v7883_v28  ;;  %v7887_v20 = vpop.eup %4850  ;;  %4870 = vpow2.f32 %v2676_v6  ;;  %v7904_v6 = vld [vmem:[%s7472_s9 + $0x40] sm:$0xff]  ;;  %v2690_v31 = vmul.f32 1.442695, %v2242_v4  ;;  %v10231_v4 = vld [vmem:[#allocation89_spill] sm:$0xff] }
 0x444   : > { %10209 = vst [vmem:[#allocation171_spill] sm:$0xff] %v7887_v20  ;;  %3220 = vmatpush1.bf16.msra.mxu1 %v10213_v40  ;;  %v7896_v49 = vpop.eup %4852  ;;  %4872 = vpow2.f32 %v2678_v32  ;;  %v2245_v40 = vsub.f32 %v10220_v59, %v6689_v56  ;;  %v2246_v32 = vsub.f32 %v10221_v0, %v6693_v16  ;;  %v10225_v28 = vld [vmem:[#allocation194_spill] sm:$0xff]  ;;  %v2692_v20 = vmul.f32 1.442695, %v2243_v2  ;;  %v10227_v59 = vld [vmem:[#allocation100_spill] sm:$0xff] }
 0x445   : > { %10214 = vst [vmem:[#allocation170_spill] sm:$0xff] %v7896_v49  ;;  %3221 = vmatprep.subr.bf16.mxu1 %v10218_v44  ;;  %v7911_v14 = vpop.eup %4854  ;;  %4874 = vpow2.f32 %v2680_v8  ;;  %v10223_v44 = vld [vmem:[#allocation87_spill] sm:$0xff]  ;;  %v4141_v60 = vcombine.low %v10225_v28, %v10224_v12  ;;  %v10229_v15 = vpack.c.bf16 %v10227_v59, %v10228_v63  ;;  %v4150_v50 = vcombine.high %v7904_v6, %v7907_v10  ;;  %v10232_v28 = vld [vmem:[#allocation118_spill] sm:$0xff] }
 0x446   : > { %10219 = vst [vmem:[#allocation223_spill] sm:$0xff] %v7911_v14  ;;  %v7917_v3 = vpop.eup %4856  ;;  %v2247_v21 = vsub.f32 %v10223_v44, %v6689_v56  ;;  %4876 = vpow2.f32 %v2682_v36  ;;  %v2248_v36 = vsub.f32 %v10231_v4, %v6693_v16  ;;  %v2694_v12 = vmul.f32 1.442695, %v2244_v43  ;;  %v10236_v44 = vld [vmem:[#allocation90_spill] sm:$0xff]  ;;  %v10238_v4 = vld [vmem:[#allocation91_spill] sm:$0xff] }
 0x447   : > { %10222 = vst [vmem:[#allocation224_spill] sm:$0xff] %v7917_v3  ;;  %v7923_v18 = vpop.eup %4858  ;;  %4878 = vpow2.f32 %v2684_v55  ;;  %v10233_v55 = vld [vmem:[#allocation110_spill] sm:$0xff]  ;;  %v2249_v59 = vsub.f32 %v10236_v44, %v6689_v56  ;;  %v2696_v8 = vmul.f32 1.442695, %v2245_v40  ;;  %v2698_v43 = vmul.f32 1.442695, %v2246_v32 }
 0x448   : > { %10226 = vst [vmem:[#allocation225_spill] sm:$0xff] %v7923_v18  ;;  %3222 = vmatpush1.bf16.msra.mxu1 %v10229_v15  ;;  %v7932_v0 = vpop.eup %4860  ;;  %4880 = vpow2.f32 %v2686_v13  ;;  %v10234_v2 = vpack.c.bf16 %v10232_v28, %v10233_v55  ;;  %v2250_v13 = vsub.f32 %v10238_v4, %v6693_v16  ;;  %v10240_v55 = vld [vmem:[#allocation92_spill] sm:$0xff]  ;;  %v2700_v15 = vmul.f32 1.442695, %v2247_v21  ;;  %v10245_v32 = vld [vmem:[#allocation93_spill] sm:$0xff]  ;;  %v10246_v14 = vld [vmem:[#allocation130_spill] sm:$0xff] }
 0x449   : > { %10230 = vst [vmem:[#allocation226_spill] sm:$0xff] %v7932_v0  ;;  %v7941_v63 = vpop.eup %4862  ;;  %4882 = vpow2.f32 %v2688_v62  ;;  %v10241_v44 = vld [vmem:[#allocation112_spill] sm:$0xff]  ;;  %v10247_v18 = vld [vmem:[#allocation122_spill] sm:$0xff] }
 0x44a   : > { %3274 = vmatprep.subr.bf16.mxu1 %v10234_v2  ;;  %10235 = vst [vmem:[#allocation191_spill] sm:$0xff] %v7941_v63  ;;  %v7945_v49 = vpop.eup %4864  ;;  %4884 = vpow2.f32 %v2690_v31  ;;  %v2251_v2 = vsub.f32 %v10240_v55, %v6689_v56  ;;  %v10242_v62 = vld [vmem:[#allocation108_spill] sm:$0xff]  ;;  %v2702_v31 = vmul.f32 1.442695, %v2248_v36  ;;  %v10248_v55 = vpack.c.bf16 %v10246_v14, %v10247_v18  ;;  %v7969_v21 = vld [vmem:[%s7472_s9 + $0xa0] sm:$0xff]  ;;  %v10251_v18 = vld [vmem:[#allocation99_spill] sm:$0xff] }
 0x44b   : > { %10237 = vst [vmem:[#allocation188_spill] sm:$0xff] %v7945_v49  ;;  %3224 = vmatmul.mubr.bf16.vlgmr.msra.gmra.mrb[68].mxu1 %v4141_v60  ;;  %v7949_v28 = vpop.eup %4866  ;;  %4886 = vpow2.f32 %v2692_v20  ;;  %v10243_v40 = vpack.c.bf16 %v10241_v44, %v10242_v62  ;;  %v2252_v60 = vsub.f32 %v10245_v32, %v6693_v16  ;;  %v7966_v20 = vld [vmem:[%s7472_s9 + $0x80] sm:$0xff]  ;;  %v10249_v62 = vld [vmem:[#allocation95_spill] sm:$0xff]  ;;  %v10250_v32 = vld [vmem:[#allocation97_spill] sm:$0xff]  ;;  %v2704_v36 = vmul.f32 1.442695, %v2249_v59 }
 0x44c   : > { %10239 = vst [vmem:[#allocation227_spill] sm:$0xff] %v7949_v28  ;;  %3233 = vmatprep.mubr.bf16.mxu1 %v4150_v50  ;;  %v7958_v3 = vpop.eup %4868  ;;  %4888 = vpow2.f32 %v2694_v12  ;;  %v2254_v12 = vsub.f32 %v10250_v32, %v6693_v16  ;;  %v2255_v14 = vsub.f32 %v10251_v18, %v6689_v56  ;;  %v4149_v50 = vcombine.low %v7904_v6, %v7907_v10  ;;  %v10253_v63 = vld [vmem:[#allocation120_spill] sm:$0xff]  ;;  %v10257_v10 = vld [vmem:[#allocation142_spill] sm:$0xff] }
 0x44d   : > { %3275 = vmatpush1.bf16.msra.mxu1 %v10243_v40  ;;  %10244 = vst [vmem:[#allocation228_spill] sm:$0xff] %v7958_v3  ;;  %v7973_v44 = vpop.eup %4870  ;;  %v2253_v40 = vsub.f32 %v10249_v62, %v6689_v56  ;;  %4890 = vpow2.f32 %v2696_v8  ;;  %v2708_v49 = vmul.f32 1.442695, %v2251_v2  ;;  %v10252_v62 = vld [vmem:[#allocation124_spill] sm:$0xff]  ;;  %v4158_v8 = vcombine.high %v7966_v20, %v7969_v21  ;;  %v10261_v18 = vld [vmem:[#allocation102_spill] sm:$0xff] }
 0x44e   : > { %3276 = vmatprep.subr.bf16.mxu1 %v10248_v55  ;;  %v7979_v4 = vpop.eup %4872  ;;  %4892 = vpow2.f32 %v2698_v43  ;;  %v2706_v55 = vmul.f32 1.442695, %v2250_v13  ;;  %v10254_v28 = vpack.c.bf16 %v10252_v62, %v10253_v63  ;;  %v10256_v13 = vld [vmem:[#allocation101_spill] sm:$0xff]  ;;  %v2710_v6 = vmul.f32 1.442695, %v2252_v60 }
 0x44f   : > { %v7985_v0 = vpop.eup %4874  ;;  %4894 = vpow2.f32 %v2700_v15  ;;  %v2256_v43 = vsub.f32 %v10256_v13, %v6693_v16  ;;  %v10258_v15 = vld [vmem:[#allocation134_spill] sm:$0xff]  ;;  %v2257_v62 = vsub.f32 %v10261_v18, %v6689_v56  ;;  %v2712_v59 = vmul.f32 1.442695, %v2253_v40  ;;  %v10263_v13 = vld [vmem:[#allocation103_spill] sm:$0xff] }
 0x450   : > { %v7994_v32 = vpop.eup %4876  ;;  %4896 = vpow2.f32 %v2702_v31  ;;  %v10259_v2 = vpack.c.bf16 %v10257_v10, %v10258_v15  ;;  %v2258_v31 = vsub.f32 %v10263_v13, %v6693_v16  ;;  %v2714_v60 = vmul.f32 1.442695, %v2254_v12  ;;  %v10265_v15 = vld [vmem:[#allocation104_spill] sm:$0xff]  ;;  %v10268_v12 = vld [vmem:[#allocation105_spill] sm:$0xff]  ;;  %v10269_v13 = vld [vmem:[#allocation146_spill] sm:$0xff] }
 0x451   : > { %3277 = vmatpush1.bf16.msra.mxu1 %v10254_v28  ;;  %10255 = vst [vmem:[#allocation42_spill] sm:$0xff] %v7994_v32  ;;  %v8003_v28 = vpop.eup %4878  ;;  %4898 = vpow2.f32 %v2704_v36  ;;  %v2716_v63 = vmul.f32 1.442695, %v2255_v14  ;;  %v10266_v40 = vpack.c.bf16 %v10021_v29, %v10020_v38  ;;  %v8031_v14 = vld [vmem:[%s7472_s9 + $0xe0] sm:$0xff]  ;;  %v4157_v29 = vcombine.low %v7966_v20, %v7969_v21  ;;  %v10280_v21 = vld [vmem:[#allocation153_spill] sm:$0xff] }
 0x452   : > { %3278 = vmatprep.subr.bf16.mxu1 %v10259_v2  ;;  %10260 = vst [vmem:[#allocation40_spill] sm:$0xff] %v8003_v28  ;;  %v8007_v3 = vpop.eup %4880  ;;  %4900 = vpow2.f32 %v2706_v55  ;;  %v2259_v2 = vsub.f32 %v10265_v15, %v6689_v56  ;;  %v2718_v55 = vmul.f32 1.442695, %v2256_v43  ;;  %v10270_v15 = vpack.c.bf16 %v10023_v17, %v10269_v13  ;;  %v10274_v17 = vld [vmem:[#allocation111_spill] sm:$0xff]  ;;  %v10276_v28 = vld [vmem:[#allocation144_spill] sm:$0xff] }
 0x453   : > { %10262 = vst [vmem:[#allocation192_spill] sm:$0xff] %v8007_v3  ;;  %3234 = vmatmul.mubr.bf16.gmra.mrb[72].mxu1 %v4149_v50  ;;  %v8011_v10 = vpop.eup %4882  ;;  %4902 = vpow2.f32 %v2708_v49  ;;  %v2260_v50 = vsub.f32 %v10268_v12, %v6693_v16  ;;  %v8028_v49 = vld [vmem:[%s7472_s9 + $0xc0] sm:$0xff]  ;;  %v10272_v12 = vld [vmem:[#allocation109_spill] sm:$0xff]  ;;  %v2720_v43 = vmul.f32 1.442695, %v2257_v62  ;;  %v2263_v13 = vsub.f32 %v10274_v17, %v6689_v56 }
 0x454   : > { %10264 = vst [vmem:[#allocation45_spill] sm:$0xff] %v8011_v10  ;;  %3243 = vmatprep.mubr.bf16.mxu1 %v4158_v8  ;;  %v8020_v18 = vpop.eup %4884  ;;  %4904 = vpow2.f32 %v2710_v6  ;;  %v10271_v8 = vld [vmem:[#allocation107_spill] sm:$0xff]  ;;  %v2262_v6 = vsub.f32 %v10272_v12, %v6693_v16  ;;  %v2724_v3 = vmul.f32 1.442695, %v2259_v2  ;;  %v10284_v17 = vld [vmem:[#allocation114_spill] sm:$0xff] }
 0x455   : > { %3279 = vmatpush1.bf16.msra.mxu1 %v10266_v40  ;;  %10267 = vst [vmem:[#allocation229_spill] sm:$0xff] %v8020_v18  ;;  %v8035_v38 = vpop.eup %4886  ;;  %v2261_v40 = vsub.f32 %v10271_v8, %v6689_v56  ;;  %4906 = vpow2.f32 %v2712_v59  ;;  %v10275_v8 = vld [vmem:[#allocation148_spill] sm:$0xff]  ;;  %v4166_v59 = vcombine.high %v8028_v49, %v8031_v14  ;;  %v2726_v20 = vmul.f32 1.442695, %v2260_v50 }
 0x456   : > { %3280 = vmatprep.subr.bf16.mxu1 %v10270_v15  ;;  %v8041_v36 = vpop.eup %4888  ;;  %4908 = vpow2.f32 %v2714_v60  ;;  %v2722_v15 = vmul.f32 1.442695, %v2258_v31  ;;  %v10277_v10 = vpack.c.bf16 %v10275_v8, %v10276_v28  ;;  %v10279_v31 = vld [vmem:[#allocation113_spill] sm:$0xff]  ;;  %v2265_v8 = vsub.f32 %v10284_v17, %v6689_v56 }
 0x457   : > { %10273 = vst [vmem:[#allocation230_spill] sm:$0xff] %v8041_v36  ;;  %v8047_v32 = vpop.eup %4890  ;;  %4910 = vpow2.f32 %v2716_v63  ;;  %v2264_v60 = vsub.f32 %v10279_v31, %v6693_v16  ;;  %v10281_v63 = vld [vmem:[#allocation151_spill] sm:$0xff]  ;;  %v2728_v62 = vmul.f32 1.442695, %v2261_v40  ;;  %v2730_v50 = vmul.f32 1.442695, %v2262_v6 }
 0x458   : > { %v8056_v12 = vpop.eup %4892  ;;  %4912 = vpow2.f32 %v2718_v55  ;;  %v10282_v2 = vpack.c.bf16 %v10280_v21, %v10281_v63  ;;  %v10286_v31 = vld [vmem:[#allocation115_spill] sm:$0xff]  ;;  %v10288_v63 = vld [vmem:[#allocation116_spill] sm:$0xff]  ;;  %v2732_v28 = vmul.f32 1.442695, %v2263_v13  ;;  %v10292_v6 = vld [vmem:[#allocation117_spill] sm:$0xff] }
 0x459   : > { %3281 = vmatpush1.bf16.msra.mxu1 %v10277_v10  ;;  %10278 = vst [vmem:[#allocation231_spill] sm:$0xff] %v8056_v12  ;;  %v8065_v10 = vpop.eup %4894  ;;  %4914 = vpow2.f32 %v2720_v43  ;;  %v2266_v55 = vsub.f32 %v10286_v31, %v6693_v16  ;;  %v10289_v43 = vld [vmem:[#allocation150_spill] sm:$0xff]  ;;  %v10293_v36 = vld [vmem:[#allocation155_spill] sm:$0xff] }
 0x45a   : > { %3282 = vmatprep.subr.bf16.mxu1 %v10282_v2  ;;  %10283 = vst [vmem:[#allocation46_spill] sm:$0xff] %v8065_v10  ;;  %v8069_v18 = vpop.eup %4896  ;;  %4916 = vpow2.f32 %v2722_v15  ;;  %v2267_v2 = vsub.f32 %v10288_v63, %v6689_v56  ;;  %v10290_v40 = vpack.c.bf16 %v10029_v42, %v10289_v43  ;;  %v2734_v15 = vmul.f32 1.442695, %v2264_v60  ;;  %v8093_v13 = vld [vmem:[%s7472_s9 + $0x120] sm:$0xff]  ;;  %v10295_v43 = vld [vmem:[#allocation119_spill] sm:$0xff] }
 0x45b   : > { %10285 = vst [vmem:[#allocation44_spill] sm:$0xff] %v8069_v18  ;;  %3244 = vmatmul.mubr.bf16.gmra.mrb[76].mxu1 %v4157_v29  ;;  %v8073_v21 = vpop.eup %4898  ;;  %4918 = vpow2.f32 %v2724_v3  ;;  %v2268_v29 = vsub.f32 %v10292_v6, %v6693_v16  ;;  %v10294_v63 = vpack.c.bf16 %v10031_v41, %v10293_v36  ;;  %v8090_v3 = vld [vmem:[%s7472_s9 + $0x100] sm:$0xff]  ;;  %v10296_v6 = vld [vmem:[#allocation121_spill] sm:$0xff]  ;;  %v2736_v60 = vmul.f32 1.442695, %v2265_v8  ;;  %v10298_v41 = vld [vmem:[#allocation123_spill] sm:$0xff] }
 0x45c   : > { %10287 = vst [vmem:[#allocation236_spill] sm:$0xff] %v8073_v21  ;;  %3253 = vmatprep.mubr.bf16.mxu1 %v4166_v59  ;;  %v8082_v31 = vpop.eup %4900  ;;  %4920 = vpow2.f32 %v2726_v20  ;;  %v2270_v20 = vsub.f32 %v10296_v6, %v6693_v16  ;;  %v2271_v36 = vsub.f32 %v10298_v41, %v6689_v56  ;;  %v4165_v42 = vcombine.low %v8028_v49, %v8031_v14  ;;  %v10300_v10 = vld [vmem:[#allocation154_spill] sm:$0xff]  ;;  %v10304_v14 = vld [vmem:[#allocation159_spill] sm:$0xff] }
 0x45d   : > { %3283 = vmatpush1.bf16.msra.mxu1 %v10290_v40  ;;  %10291 = vst [vmem:[#allocation232_spill] sm:$0xff] %v8082_v31  ;;  %v8097_v59 = vpop.eup %4902  ;;  %v2269_v40 = vsub.f32 %v10295_v43, %v6689_v56  ;;  %4922 = vpow2.f32 %v2728_v62  ;;  %v2740_v18 = vmul.f32 1.442695, %v2267_v2  ;;  %v10299_v43 = vld [vmem:[#allocation156_spill] sm:$0xff]  ;;  %v4174_v62 = vcombine.high %v8090_v3, %v8093_v13  ;;  %v10306_v2 = vld [vmem:[#allocation126_spill] sm:$0xff]  ;;  %v10314_v31 = vld [vmem:[#allocation165_spill] sm:$0xff] }
 0x45e   : > { %3284 = vmatprep.subr.bf16.mxu1 %v10294_v63  ;;  %v8103_v17 = vpop.eup %4904  ;;  %4924 = vpow2.f32 %v2730_v50  ;;  %v2738_v63 = vmul.f32 1.442695, %v2266_v55  ;;  %v10301_v21 = vpack.c.bf16 %v10299_v43, %v10300_v10  ;;  %v10303_v55 = vld [vmem:[#allocation125_spill] sm:$0xff]  ;;  %v2742_v49 = vmul.f32 1.442695, %v2268_v29 }
 0x45f   : > { %10297 = vst [vmem:[#allocation51_spill] sm:$0xff] %v8103_v17  ;;  %v8109_v12 = vpop.eup %4906  ;;  %4926 = vpow2.f32 %v2732_v28  ;;  %v2272_v50 = vsub.f32 %v10303_v55, %v6693_v16  ;;  %v10305_v28 = vpack.c.bf16 %v10036_v30, %v10304_v14  ;;  %v2273_v41 = vsub.f32 %v10306_v2, %v6689_v56  ;;  %v10308_v55 = vld [vmem:[#allocation127_spill] sm:$0xff]  ;;  %v10309_v14 = vld [vmem:[#allocation128_spill] sm:$0xff] }
 0x460   : > { %v8118_v6 = vpop.eup %4908  ;;  %4928 = vpow2.f32 %v2734_v15  ;;  %v2744_v43 = vmul.f32 1.442695, %v2269_v40  ;;  %v2274_v15 = vsub.f32 %v10308_v55, %v6693_v16  ;;  %v2746_v30 = vmul.f32 1.442695, %v2270_v20  ;;  %v10313_v20 = vld [vmem:[#allocation129_spill] sm:$0xff]  ;;  %v10315_v17 = vld [vmem:[#allocation163_spill] sm:$0xff] }
 0x461   : > { %3285 = vmatpush1.bf16.msra.mxu1 %v10301_v21  ;;  %10302 = vst [vmem:[#allocation49_spill] sm:$0xff] %v8118_v6  ;;  %v8127_v21 = vpop.eup %4910  ;;  %4930 = vpow2.f32 %v2736_v60  ;;  %v2748_v10 = vmul.f32 1.442695, %v2271_v36  ;;  %v10310_v60 = vld [vmem:[#allocation158_spill] sm:$0xff]  ;;  %v8155_v36 = vld [vmem:[%s7472_s9 + $0x28] sm:$0xff] }
 0x462   : > { %3286 = vmatprep.subr.bf16.mxu1 %v10305_v28  ;;  %v8131_v8 = vpop.eup %4912  ;;  %4932 = vpow2.f32 %v2738_v63  ;;  %v2275_v28 = vsub.f32 %v10309_v14, %v6689_v56  ;;  %v10311_v40 = vpack.c.bf16 %v10038_v9, %v10310_v60  ;;  %v2750_v63 = vmul.f32 1.442695, %v2272_v50  ;;  %v10317_v60 = vld [vmem:[#allocation131_spill] sm:$0xff] }
 0x463   : > { %10307 = vst [vmem:[#allocation237_spill] sm:$0xff] %v8131_v8  ;;  %3254 = vmatmul.mubr.bf16.gmra.mrb[80].mxu1 %v4165_v42  ;;  %v8135_v29 = vpop.eup %4914  ;;  %4934 = vpow2.f32 %v2740_v18  ;;  %v2276_v42 = vsub.f32 %v10313_v20, %v6693_v16  ;;  %v10316_v14 = vpack.c.bf16 %v10314_v31, %v10315_v17  ;;  %v8152_v18 = vld [vmem:[%s7472_s9 + $0x8] sm:$0xff]  ;;  %v10318_v20 = vld [vmem:[#allocation133_spill] sm:$0xff]  ;;  %v2752_v50 = vmul.f32 1.442695, %v2273_v41 }
 0x464   : > { %3263 = vmatprep.mubr.bf16.mxu1 %v4174_v62  ;;  %v8144_v55 = vpop.eup %4916  ;;  %4936 = vpow2.f32 %v2742_v49  ;;  %v2278_v49 = vsub.f32 %v10318_v20, %v6693_v16  ;;  %v10320_v17 = vld [vmem:[#allocation135_spill] sm:$0xff]  ;;  %v4173_v9 = vcombine.low %v8090_v3, %v8093_v13  ;;  %v2756_v8 = vmul.f32 1.442695, %v2275_v28  ;;  %v10325_v28 = vld [vmem:[#allocation138_spill] sm:$0xff] }
 0x465   : > { %3287 = vmatpush1.bf16.msra.mxu1 %v10311_v40  ;;  %10312 = vst [vmem:[#allocation233_spill] sm:$0xff] %v8144_v55  ;;  %v8159_v62 = vpop.eup %4918  ;;  %v2277_v40 = vsub.f32 %v10317_v60, %v6689_v56  ;;  %4938 = vpow2.f32 %v2744_v43  ;;  %v2279_v31 = vsub.f32 %v10320_v17, %v6689_v56  ;;  %v10321_v60 = vpack.c.bf16 %v10044_v39, %v10043_v1  ;;  %v10323_v13 = vld [vmem:[#allocation167_spill] sm:$0xff]  ;;  %v10328_v55 = vld [vmem:[#allocation168_spill] sm:$0xff] }
 0x466   : > { %3288 = vmatprep.subr.bf16.mxu1 %v10316_v14  ;;  %v8165_v2 = vpop.eup %4920  ;;  %4940 = vpow2.f32 %v2746_v30  ;;  %v2754_v14 = vmul.f32 1.442695, %v2274_v15  ;;  %v4144_v41 = vcombine.high %v8152_v18, %v8155_v36  ;;  %v10322_v15 = vld [vmem:[#allocation137_spill] sm:$0xff]  ;;  %v2758_v3 = vmul.f32 1.442695, %v2276_v42 }
 0x467   : > { %10319 = vst [vmem:[#allocation238_spill] sm:$0xff] %v8165_v2  ;;  %v8171_v6 = vpop.eup %4922  ;;  %4942 = vpow2.f32 %v2748_v10  ;;  %v2280_v30 = vsub.f32 %v10322_v15, %v6693_v16  ;;  %v10324_v10 = vpack.c.bf16 %v10046_v53, %v10323_v13  ;;  %v2281_v17 = vsub.f32 %v10325_v28, %v6689_v56  ;;  %v10326_v15 = vld [vmem:[#allocation139_spill] sm:$0xff]  ;;  %v10327_v13 = vld [vmem:[#allocation140_spill] sm:$0xff]  ;;  %v10329_v2 = vld [vmem:[#allocation166_spill] sm:$0xff] }
 0x468   : > { %v8180_v20 = vpop.eup %4924  ;;  %4944 = vpow2.f32 %v2750_v63  ;;  %v2282_v63 = vsub.f32 %v10326_v15, %v6693_v16  ;;  %v2762_v42 = vmul.f32 1.442695, %v2278_v49  ;;  %v2764_v39 = vmul.f32 1.442695, %v2279_v31  ;;  %v10331_v49 = vld [vmem:[#allocation141_spill] sm:$0xff] }
 0x469   : > { %3289 = vmatpush1.bf16.msra.mxu1 %v10321_v60  ;;  %v8189_v1 = vpop.eup %4926  ;;  %4946 = vpow2.f32 %v2752_v50  ;;  %v2760_v60 = vmul.f32 1.442695, %v2277_v40  ;;  %v10330_v28 = vpack.c.bf16 %v10328_v55, %v10329_v2  ;;  %v10332_v15 = vpack.c.bf16 %v7239_v11, %v10054_v33  ;;  %v10333_v55 = vld [vmem:[#allocation143_spill] sm:$0xff] }
 0x46a   : > { %3290 = vmatprep.subr.bf16.mxu1 %v10324_v10  ;;  %v8193_v43 = vpop.eup %4928  ;;  %4948 = vpow2.f32 %v2754_v14  ;;  %v2283_v10 = vsub.f32 %v10327_v13, %v6689_v56  ;;  %v2766_v14 = vmul.f32 1.442695, %v2280_v30  ;;  %v2285_v31 = vsub.f32 %v10333_v55, %v6689_v56  ;;  %v10335_v11 = vld [vmem:[#allocation147_spill] sm:$0xff]  ;;  %v10338_v55 = vld [vmem:[#allocation173_spill] sm:$0xff] }
 0x46b   : > { %3264 = vmatmul.mubr.bf16.gmra.mrb[84].mxu1 %v4173_v9  ;;  %v8197_v53 = vpop.eup %4930  ;;  %4950 = vpow2.f32 %v2756_v8  ;;  %v2284_v9 = vsub.f32 %v10331_v49, %v6693_v16  ;;  %v2770_v30 = vmul.f32 1.442695, %v2282_v63  ;;  %v2287_v33 = vsub.f32 %v10335_v11, %v6689_v56  ;;  %v10355_v8 = vld [vmem:[#allocation172_spill] sm:$0xff] }
 0x46c   : > { %3306 = vmatprep.mubr.bf16.mxu1 %v4144_v41  ;;  %v8206_v50 = vpop.eup %4932  ;;  %4952 = vpow2.f32 %v2758_v3  ;;  %v2768_v41 = vmul.f32 1.442695, %v2281_v17  ;;  %v10336_v40 = vpack.c.bf16 %v7230_v54, %v10055_v23  ;;  %v10341_v54 = vld [vmem:[#allocation174_spill] sm:$0xff] }
 0x46d   : > { %3291 = vmatpush1.bf16.msra.mxu1 %v10330_v28  ;;  %v8215_v2 = vpop.eup %4934  ;;  %4954 = vpow2.f32 %v2760_v60  ;;  %v10334_v28 = vld [vmem:[#allocation145_spill] sm:$0xff]  ;;  %v2774_v63 = vmul.f32 1.442695, %v2284_v9  ;;  %v2289_v23 = vsub.f32 %v10341_v54, %v6689_v56 }
 0x46e   : > { %3292 = vmatprep.subr.bf16.mxu1 %v10332_v15  ;;  %v8219_v13 = vpop.eup %4936  ;;  %v2286_v3 = vsub.f32 %v10334_v28, %v6693_v16  ;;  %4956 = vpow2.f32 %v2762_v42  ;;  %v2772_v15 = vmul.f32 1.442695, %v2283_v10  ;;  %v2288_v42 = vsub.f32 %v10338_v55, %v6693_v16  ;;  %v10343_v55 = vld [vmem:[#allocation177_spill] sm:$0xff] }
 0x46f   : > { %v8223_v49 = vpop.eup %4938  ;;  %4958 = vpow2.f32 %v2764_v39  ;;  %v10339_v28 = vpack.c.bf16 %v7275_v46, %v7257_v52  ;;  %v10344_v52 = vld [vmem:[#allocation179_spill] sm:$0xff]  ;;  %v10345_v39 = vpack.c.bf16 %v7266_v47, %v7248_v7  ;;  %v10347_v54 = vld [vmem:[#allocation181_spill] sm:$0xff]  ;;  %v10350_v7 = vld [vmem:[#allocation182_spill] sm:$0xff] }
 0x470   : > { %v8232_v60 = vpop.eup %4940  ;;  %4960 = vpow2.f32 %v2766_v14  ;;  %v2290_v14 = vsub.f32 %v10343_v55, %v6693_v16  ;;  %v2778_v9 = vmul.f32 1.442695, %v2286_v3  ;;  %v2291_v46 = vsub.f32 %v10344_v52, %v6689_v56 }
 0x471   : > { %3293 = vmatpush1.bf16.msra.mxu1 %v10336_v40  ;;  %10337 = vst [vmem:[#allocation234_spill] sm:$0xff] %v8232_v60  ;;  %v8241_v10 = vpop.eup %4942  ;;  %4962 = vpow2.f32 %v2768_v41  ;;  %v2776_v40 = vmul.f32 1.442695, %v2285_v31  ;;  %v2782_v3 = vmul.f32 1.442695, %v2288_v42  ;;  %v10348_v55 = vpack.c.bf16 %v7317_v26, %v7295_v25  ;;  %v10353_v25 = vld [vmem:[#allocation187_spill] sm:$0xff] }
 0x472   : > { %3294 = vmatprep.subr.bf16.mxu1 %v10339_v28  ;;  %10340 = vst [vmem:[#allocation239_spill] sm:$0xff] %v8241_v10  ;;  %v8245_v11 = vpop.eup %4944  ;;  %4964 = vpow2.f32 %v2770_v30  ;;  %v2780_v28 = vmul.f32 1.442695, %v2287_v33  ;;  %v2292_v30 = vsub.f32 %v10347_v54, %v6693_v16  ;;  %v2293_v47 = vsub.f32 %v10350_v7, %v6689_v56  ;;  %v10352_v54 = vld [vmem:[#allocation185_spill] sm:$0xff]  ;;  %v10354_v33 = vld [vmem:[#allocation175_spill] sm:$0xff] }
 0x473   : > { %10342 = vst [vmem:[#allocation235_spill] sm:$0xff] %v8245_v11  ;;  %v8249_v17 = vpop.eup %4946  ;;  %4966 = vpow2.f32 %v2772_v15  ;;  %v2786_v42 = vmul.f32 1.442695, %v2290_v14  ;;  %v2295_v26 = vsub.f32 %v10353_v25, %v6689_v56  ;;  %v10356_v60 = vpack.c.bf16 %v10354_v33, %v10355_v8  ;;  %v10358_v7 = vld [vmem:[#allocation189_spill] sm:$0xff]  ;;  %v10360_v11 = vld [vmem:[#allocation178_spill] sm:$0xff] }
 0x474   : > { %v8258_v41 = vpop.eup %4948  ;;  %4968 = vpow2.f32 %v2774_v63  ;;  %v2294_v63 = vsub.f32 %v10352_v54, %v6693_v16  ;;  %v2790_v14 = vmul.f32 1.442695, %v2292_v30  ;;  %v10359_v54 = vld [vmem:[#allocation183_spill] sm:$0xff]  ;;  %v10362_v8 = vld [vmem:[#allocation190_spill] sm:$0xff]  ;;  %v2792_v33 = vmul.f32 1.442695, %v2293_v47 }
 0x475   : > { %3295 = vmatpush1.bf16.msra.mxu1 %v10345_v39  ;;  %10346 = vst [vmem:[#allocation50_spill] sm:$0xff] %v8258_v41  ;;  %v8267_v15 = vpop.eup %4950  ;;  %4970 = vpow2.f32 %v2776_v40  ;;  %v2784_v39 = vmul.f32 1.442695, %v2289_v23  ;;  %v10361_v10 = vpack.c.bf16 %v10359_v54, %v10360_v11  ;;  %v2796_v54 = vmul.f32 1.442695, %v2295_v26  ;;  %v10366_v41 = vld [vmem:[#allocation176_spill] sm:$0xff] }
 0x476   : > { %3296 = vmatprep.subr.bf16.mxu1 %v10348_v55  ;;  %10349 = vst [vmem:[#allocation48_spill] sm:$0xff] %v8267_v15  ;;  %v8271_v52 = vpop.eup %4952  ;;  %4972 = vpow2.f32 %v2778_v9  ;;  %v2788_v55 = vmul.f32 1.442695, %v2291_v46  ;;  %v2296_v9 = vsub.f32 %v10358_v7, %v6693_v16  ;;  %v10363_v7 = vld [vmem:[#allocation193_spill] sm:$0xff]  ;;  %v2794_v30 = vmul.f32 1.442695, %v2294_v63 }
 0x477   : > { %10351 = vst [vmem:[#allocation240_spill] sm:$0xff] %v8271_v52  ;;  %v8275_v31 = vpop.eup %4954  ;;  %4974 = vpow2.f32 %v2780_v28  ;;  %v10365_v46 = vld [vmem:[#allocation180_spill] sm:$0xff] }
 0x478   : > { %v8284_v40 = vpop.eup %4956  ;;  %4976 = vpow2.f32 %v2782_v3  ;;  %v2298_v3 = vsub.f32 %v10363_v7, %v6693_v16  ;;  %v10367_v52 = vpack.c.bf16 %v10365_v46, %v10366_v41  ;;  %v2798_v63 = vmul.f32 1.442695, %v2296_v9  ;;  %v10369_v7 = vld [vmem:[#allocation186_spill] sm:$0xff]  ;;  %v10374_v26 = vld [vmem:[#allocation184_spill] sm:$0xff] }
 0x479   : > { %3297 = vmatpush1.bf16.msra.mxu1 %v10356_v60  ;;  %10357 = vst [vmem:[#allocation55_spill] sm:$0xff] %v8284_v40  ;;  %v8293_v28 = vpop.eup %4958  ;;  %v2297_v60 = vsub.f32 %v10362_v8, %v6689_v56  ;;  %4978 = vpow2.f32 %v2784_v39  ;;  %v10368_v8 = vld [vmem:[#allocation197_spill] sm:$0xff]  ;;  %v10370_v15 = vpack.c.bf16 %v10071_v27, %v10369_v7  ;;  %v10371_v41 = vld [vmem:[#allocation198_spill] sm:$0xff]  ;;  %v10373_v27 = vld [vmem:[#allocation203_spill] sm:$0xff]  ;;  %v10375_v40 = vpack.c.bf16 %v10073_v34, %v10374_v26 }
 0x47a   : > { %3298 = vmatprep.subr.bf16.mxu1 %v10361_v10  ;;  %v8297_v25 = vpop.eup %4960  ;;  %4980 = vpow2.f32 %v2786_v42  ;;  %v10364_v10 = vld [vmem:[#allocation195_spill] sm:$0xff]  ;;  %v2300_v42 = vsub.f32 %v10368_v8, %v6693_v16  ;;  %v10372_v8 = vld [vmem:[#allocation201_spill] sm:$0xff]  ;;  %v2802_v9 = vmul.f32 1.442695, %v2298_v3 }
 0x47b   : > { %v8301_v23 = vpop.eup %4962  ;;  %v2299_v11 = vsub.f32 %v10364_v10, %v6689_v56  ;;  %4982 = vpow2.f32 %v2788_v55  ;;  %v2800_v46 = vmul.f32 1.442695, %v2297_v60  ;;  %v2980_v60 = vld [vmem:[%s7472_s9 + $0xe8] sm:$0xff] }
 0x47c   : > { %v8310_v39 = vpop.eup %4964  ;;  %4984 = vpow2.f32 %v2790_v14  ;;  %v2302_v14 = vsub.f32 %v10372_v8, %v6693_v16  ;;  %v2806_v3 = vmul.f32 1.442695, %v2300_v42  ;;  %v10377_v8 = vpack.c.bf16 %v7453_v61, %v7437_v24 }
 0x47d   : > { %3299 = vmatpush1.bf16.msra.mxu1 %v10367_v52  ;;  %v8319_v55 = vpop.eup %4966  ;;  %v2301_v52 = vsub.f32 %v10371_v41, %v6689_v56  ;;  %4986 = vpow2.f32 %v2792_v33  ;;  %v2804_v7 = vmul.f32 1.442695, %v2299_v11  ;;  %v10376_v41 = vld [vmem:[#allocation205_spill] sm:$0xff]  ;;  %v10378_v61 = vpack.c.bf16 %v7445_v19, %v10082_v48 }
 0x47e   : > { %3300 = vmatprep.subr.bf16.mxu1 %v10370_v15  ;;  %v8323_v10 = vpop.eup %4968  ;;  %4988 = vpow2.f32 %v2794_v30  ;;  %v2303_v15 = vsub.f32 %v10373_v27, %v6689_v56  ;;  %v2304_v30 = vsub.f32 %v10376_v41, %v6693_v16  ;;  %v4143_v48 = vcombine.low %v8152_v18, %v8155_v36  ;;  %v10404_v56 = vld [vmem:[#allocation213_spill] sm:$0xff] }
 0x47f   : > { %v8327_v47 = vpop.eup %4970  ;;  %4990 = vpow2.f32 %v2796_v54  ;;  %v2810_v54 = vmul.f32 1.442695, %v2302_v14  ;;  %v2964_v14 = vld [vmem:[%s7472_s9 + $0x68] sm:$0xff] }
 0x480   : > { %v8336_v33 = vpop.eup %4972  ;;  %4992 = vpow2.f32 %v2798_v63  ;;  %v2812_v42 = vmul.f32 1.442695, %v2303_v15  ;;  %v2814_v26 = vmul.f32 1.442695, %v2304_v30  ;;  %v10381_v30 = vpack.c.bf16 %v7535_v45, %v7517_v37  ;;  %v10385_v45 = vld [vmem:[#allocation206_spill] sm:$0xff] }
 0x481   : > { %3301 = vmatpush1.bf16.msra.mxu1 %v10375_v40  ;;  %v8345_v34 = vpop.eup %4974  ;;  %4994 = vpow2.f32 %v2800_v46  ;;  %v2808_v40 = vmul.f32 1.442695, %v2301_v52  ;;  %v10379_v52 = vpack.c.bf16 %v7498_v58, %v7480_v35  ;;  %v2960_v46 = vld [vmem:[%s7472_s9 + $0x48] sm:$0xff]  ;;  %v10380_v58 = vpack.c.bf16 %v7489_v57, %v7461_v5 }
 0x482   : > { %3302 = vmatprep.subr.bf16.mxu1 %v10377_v8  ;;  %v8347_v11 = vpop.eup %4976  ;;  %4996 = vpow2.f32 %v2802_v9  ;;  %v4152_v35 = vcombine.high %v2960_v46, %v2964_v14  ;;  %v2976_v9 = vld [vmem:[%s7472_s9 + $0xc8] sm:$0xff] }
 0x483   : > { %v8349_v16 = vpop.eup %4978  ;;  %4998 = vpow2.f32 %v2804_v7 }
 0x484   : > { %v8356_v63 = vpop.eup %4980  ;;  %5000 = vpow2.f32 %v2806_v3  ;;  %v10382_v3 = vld [vmem:[#allocation199_spill] sm:$0xff] }
 0x485   : > { %3303 = vmatpush1.bf16.msra.mxu1 %v10378_v61  ;;  %v8365_v27 = vpop.eup %4982  ;;  %5002 = vpow2.f32 %v2808_v40  ;;  %v10383_v8 = vpack.c.bf16 %v7526_v22, %v10382_v3  ;;  %v2968_v61 = vld [vmem:[%s7472_s9 + $0x88] sm:$0xff]  ;;  %v4151_v22 = vcombine.low %v2960_v46, %v2964_v14  ;;  %v10390_v3 = vld [vmem:[#allocation200_spill] sm:$0xff]  ;;  %v10393_v40 = vld [vmem:[#allocation210_spill] sm:$0xff] }
 0x486   : > { %3304 = vmatprep.subr.bf16.mxu1 %v10379_v52  ;;  %v8367_v19 = vpop.eup %4984  ;;  %5004 = vpow2.f32 %v2810_v54  ;;  %v10386_v54 = vld [vmem:[#allocation202_spill] sm:$0xff]  ;;  %v10394_v52 = vld [vmem:[#allocation208_spill] sm:$0xff] }
 0x487   : > { %v8371_v15 = vpop.eup %4986  ;;  %5006 = vpow2.f32 %v2812_v42  ;;  %v10387_v42 = vpack.c.bf16 %v10385_v45, %v10386_v54  ;;  %v10395_v7 = vpack.c.bf16 %v10393_v40, %v10394_v52  ;;  %v10399_v54 = vld [vmem:[#allocation207_spill] sm:$0xff]  ;;  %v10401_v40 = vld [vmem:[#allocation214_spill] sm:$0xff]  ;;  %v10402_v52 = vld [vmem:[#allocation212_spill] sm:$0xff] }
 0x488   : > { %v8378_v41 = vpop.eup %4988  ;;  %5008 = vpow2.f32 %v2814_v26  ;;  %v2972_v26 = vld [vmem:[%s7472_s9 + $0xa8] sm:$0xff]  ;;  %v10403_v46 = vpack.c.bf16 %v10401_v40, %v10402_v52  ;;  %v10414_v40 = vld [vmem:[#allocation221_spill] sm:$0xff] }
 0x489   : > { %3305 = vmatpush1.bf16.msra.mxu1 %v10380_v58  ;;  %v8385_v36 = vpop.eup %4990  ;;  %v4160_v45 = vcombine.high %v2968_v61, %v2972_v26  ;;  %v10417_v52 = vld [vmem:[#allocation219_spill] sm:$0xff] }
 0x48a   : > { %3357 = vmatprep.subr.bf16.mxu1 %v10381_v30  ;;  %v8387_v5 = vpop.eup %4992  ;;  %v10389_v30 = vld [vmem:[#allocation204_spill] sm:$0xff] }
 0x48b   : > { %v8389_v57 = vpop.eup %4994 }
 0x48c   : > { %3307 = vmatmul.mubr.bf16.vlgmr.msra.gmra.mrb[68].mxu1 %v4143_v48  ;;  %v8396_v37 = vpop.eup %4996 }
 0x48d   : > { %3358 = vmatpush1.bf16.msra.mxu1 %v10383_v8  ;;  %3316 = vmatprep.mubr.bf16.mxu1 %v4152_v35  ;;  %10384 = vst [vmem:[#allocation53_spill] sm:$0xff] %v8396_v37  ;;  %v8405_v48 = vpop.eup %4998  ;;  %v10391_v8 = vpack.c.bf16 %v10389_v30, %v10390_v3  ;;  %v10397_v30 = vld [vmem:[#allocation266_spill] sm:$0xff]  ;;  %v10405_v37 = vld [vmem:[#allocation211_spill] sm:$0xff]  ;;  %v4168_v3 = vcombine.high %v2976_v9, %v2980_v60 }
 0x48e   : > { %3359 = vmatprep.subr.bf16.mxu1 %v10387_v42  ;;  %v8407_v58 = vpop.eup %5000 }
 0x48f   : > { %10388 = vst [vmem:[#allocation241_spill] sm:$0xff] %v8407_v58  ;;  %v8409_v35 = vpop.eup %5002  ;;  %v10406_v58 = vpack.c.bf16 %v10404_v56, %v10405_v37  ;;  %v2988_v56 = vld [vmem:[%s7472_s9 + $0x128] sm:$0xff]  ;;  %v4167_v37 = vcombine.low %v2976_v9, %v2980_v60  ;;  %v2953_v60 = vld [vmem:[%s7472_s9 + $0x10] sm:$0xff] }
 0x490   : > { %v8416_v42 = vpop.eup %5004  ;;  %v2957_v9 = vld [vmem:[%s7472_s9 + $0x30] sm:$0xff] }
 0x491   : > { %3360 = vmatpush1.bf16.msra.mxu1 %v10391_v8  ;;  %10392 = vst [vmem:[#allocation242_spill] sm:$0xff] %v8416_v42  ;;  %v8423_v14 = vpop.eup %5006  ;;  %v10398_v8 = vld [vmem:[#allocation209_spill] sm:$0xff] }
 0x492   : > { %3361 = vmatprep.subr.bf16.mxu1 %v10395_v7  ;;  %10396 = vst [vmem:[#allocation243_spill] sm:$0xff] %v8423_v14  ;;  %v8425_v18 = vpop.eup %5008  ;;  %v10400_v24 = vpack.c.bf16 %v10398_v8, %v10399_v54  ;;  %v10407_v14 = vld [vmem:[#allocation218_spill] sm:$0xff]  ;;  %v10408_v54 = vld [vmem:[#allocation216_spill] sm:$0xff] }
 0x493   : > { %v10409_v8 = vpack.c.bf16 %v10407_v14, %v10408_v54 }
 0x494   : > { %3317 = vmatmul.mubr.bf16.gmra.mrb[72].mxu1 %v4151_v22  ;;  %v4159_v22 = vcombine.low %v2968_v61, %v2972_v26  ;;  %v2984_v26 = vld [vmem:[%s7472_s9 + $0x108] sm:$0xff] }
 0x495   : > { %3362 = vmatpush1.bf16.msra.mxu1 %v10400_v24  ;;  %3326 = vmatprep.mubr.bf16.mxu1 %v4160_v45  ;;  %v10410_v24 = vld [vmem:[#allocation217_spill] sm:$0xff]  ;;  %v10411_v45 = vld [vmem:[#allocation215_spill] sm:$0xff]  ;;  %v4176_v54 = vcombine.high %v2984_v26, %v2988_v56 }
 0x496   : > { %3363 = vmatprep.subr.bf16.mxu1 %v10403_v46  ;;  %v10412_v7 = vpack.c.bf16 %v10410_v24, %v10411_v45  ;;  %v10413_v46 = vld [vmem:[#allocation35_spill] sm:$0xff]  ;;  %v10425_v45 = vld [vmem:[#allocation72_spill] sm:$0xff] }
 0x497   : > { %v10415_v61 = vpack.c.bf16 %v10413_v46, %v10414_v40  ;;  %v10426_v46 = vld [vmem:[#allocation43_spill] sm:$0xff] }
 0x498   : > { %v10427_v40 = vpack.c.bf16 %v10425_v45, %v10426_v46  ;;  %v10437_v46 = vld [vmem:[#allocation149_spill] sm:$0xff] }
 0x499   : > { %3364 = vmatpush1.bf16.msra.mxu1 %v10406_v58  ;;  %v10416_v58 = vld [vmem:[#allocation34_spill] sm:$0xff] }
 0x49a   : > { %3365 = vmatprep.subr.bf16.mxu1 %v10409_v8  ;;  %v10418_v14 = vpack.c.bf16 %v10416_v58, %v10417_v52  ;;  %v10420_v8 = vld [vmem:[#allocation39_spill] sm:$0xff]  ;;  %v10429_v52 = vld [vmem:[#allocation41_spill] sm:$0xff] }
 0x49b   : > { %v10428_v58 = vld [vmem:[#allocation47_spill] sm:$0xff] }
 0x49c   : > { %3327 = vmatmul.mubr.bf16.gmra.mrb[76].mxu1 %v4159_v22  ;;  %v10419_v22 = vld [vmem:[#allocation38_spill] sm:$0xff] }
 0x49d   : > { %3366 = vmatpush1.bf16.msra.mxu1 %v10412_v7  ;;  %3336 = vmatprep.mubr.bf16.mxu1 %v4168_v3  ;;  %v10421_v42 = vpack.c.bf16 %v10419_v22, %v10420_v8  ;;  %v10422_v3 = vld [vmem:[#allocation36_spill] sm:$0xff]  ;;  %v10423_v7 = vld [vmem:[#allocation37_spill] sm:$0xff]  ;;  %v10432_v22 = vld [vmem:[#allocation94_spill] sm:$0xff] }
 0x49e   : > { %3367 = vmatprep.subr.bf16.mxu1 %v10415_v61  ;;  %v10424_v24 = vpack.c.bf16 %v10422_v3, %v10423_v7  ;;  %v4175_v61 = vcombine.low %v2984_v26, %v2988_v56  ;;  %v3744_v3 = vld [vmem:[%s5725_s21] sm:$0xff]  ;;  %v10434_v7 = vld [vmem:[#allocation220_spill] sm:$0xff]  ;;  %v10438_v26 = vpack.c.bf16 %v7835_v51, %v10437_v46  ;;  %v3747_v56 = vld [vmem:[%s5725_s21 + $0x18] sm:$0xff]  ;;  %v5332_v46 = vmov 1  }
 0x49f   : > { %3758 = vperm.xlu0 %4406, %v3744_v3   ;;  %v10448_v51 = vld [vmem:[#allocation171_spill] sm:$0xff] }
 0x4a1   : > { %3368 = vmatpush1.bf16.msra.mxu1 %v10418_v14  ;;  %v10430_v14 = vpack.c.bf16 %v10428_v58, %v10429_v52  ;;  %v10439_v58 = vld [vmem:[#allocation152_spill] sm:$0xff] }
 0x4a2   : > { %3369 = vmatprep.subr.bf16.mxu1 %v10421_v42  ;;  %v4146_v42 = vcombine.high %v2953_v60, %v2957_v9  ;;  %v10440_v52 = vld [vmem:[#allocation136_spill] sm:$0xff] }
 0x4a4   : > { %3337 = vmatmul.mubr.bf16.gmra.mrb[80].mxu1 %v4167_v37  ;;  %v10431_v37 = vld [vmem:[#allocation132_spill] sm:$0xff] }
 0x4a5   : > { %3370 = vmatpush1.bf16.msra.mxu1 %v10424_v24  ;;  %3346 = vmatprep.mubr.bf16.mxu1 %v4176_v54  ;;  %v10433_v8 = vpack.c.bf16 %v10431_v37, %v10432_v22  ;;  %v3746_v54 = vld [vmem:[%s5725_s21 + $0x10] sm:$0xff]  ;;  %v10443_v37 = vld [vmem:[#allocation161_spill] sm:$0xff] }
 0x4a6   : > { %3371 = vmatprep.subr.bf16.mxu1 %v10427_v40  ;;  %v10435_v24 = vld [vmem:[#allocation76_spill] sm:$0xff]  ;;  %3768 = vperm.xlu1 %4407, %v3746_v54   ;;  %v3745_v40 = vld [vmem:[%s5725_s21 + $0x8] sm:$0xff]  ;;  %s5333_s21 = smov [#allocation13]  }
 0x4a7   : > { %v10436_v45 = vpack.c.bf16 %v10434_v7, %v10435_v24  ;;  %3763 = vperm.xlu0 %4406, %v3745_v40   ;;  %v10449_v24 = vld [vmem:[#allocation169_spill] sm:$0xff]  ;;  %s5184_s8 = sshll.u32 %s5333_s21, 4  ;;  %s5185_s8 = int_to_ptr.vmem [resolvable:$false] %s5184_s8 }
 0x4a8   : > { %s5186_s17 = scalar_lea.vmem %s5185_s8, 2048  ;;  %p5187_p5 = scmp.lt.s32.totalorder %s8818_s11, %s5185_s8 }
 0x4a9   : > { %3372 = vmatpush1.bf16.msra.mxu1 %v10430_v14  ;;  %v10441_v14 = vpack.c.bf16 %v10439_v58, %v10440_v52  ;;  %v10452_v58 = vld [vmem:[#allocation164_spill] sm:$0xff]  ;;  %p5188_p8 = scmp.lt.s32.totalorder %s5186_s17, %s5180_s12 }
 0x4aa   : > { %3373 = vmatprep.subr.bf16.mxu1 %v10433_v8  ;;  %3773 = vperm.xlu1 %4407, %v3747_v56   ;;  %v10445_v8 = vld [vmem:[#allocation160_spill] sm:$0xff] }
 0x4ab   : > { %4408 = vset.pattern.permute.xlu0 %v5332_v46  ;;  %p5189_p12 = por %p5188_p8, %p5187_p5 }
 0x4ac   : > { %3347 = vmatmul.mubr.bf16.gmra.mrb[84].mxu1 %v4175_v61  ;;  %v10442_v61 = vld [vmem:[#allocation162_spill] sm:$0xff]  ;;  %3785 = vperm.xlu0 %4408, %v3744_v3   ;;  %v10463_v3 = vld [vmem:[#allocation188_spill] sm:$0xff] }
 0x4ad   : > { %3374 = vmatpush1.bf16.msra.mxu1 %v10436_v45  ;;  %3389 = vmatprep.mubr.bf16.mxu1 %v4146_v42  ;;  %v10444_v22 = vpack.c.bf16 %v10442_v61, %v10443_v37  ;;  %v10446_v42 = vld [vmem:[#allocation157_spill] sm:$0xff]  ;;  %v10450_v45 = vpack.c.bf16 %v10448_v51, %v10449_v24  ;;  %v10455_v61 = vld [vmem:[#allocation223_spill] sm:$0xff] }
 0x4ae   : > { %3375 = vmatprep.subr.bf16.mxu1 %v10438_v26  ;;  %v10447_v7 = vpack.c.bf16 %v10445_v8, %v10446_v42  ;;  %4409 = vset.pattern.permute.xlu1 %v5332_v46  ;;  %v10451_v26 = vld [vmem:[#allocation222_spill] sm:$0xff]  ;;  %v10461_v51 = vld [vmem:[#allocation191_spill] sm:$0xff]  ;;  %v10466_v46 = vpack.c.bf16 %v7985_v0, %v7973_v44  ;;  %v10475_v0 = vpack.c.bf16 %v8047_v32, %v8035_v38  ;;  %v10477_v44 = vld [vmem:[#allocation229_spill] sm:$0xff] }
 0x4af   : > { %3789 = vperm.xlu1 %4409, %v3745_v40   ;;  %v10453_v52 = vpack.c.bf16 %v10451_v26, %v10452_v58  ;;  %v10458_v8 = vld [vmem:[#allocation170_spill] sm:$0xff]  ;;  %v10469_v26 = vld [vmem:[#allocation45_spill] sm:$0xff]  ;;  %v10470_v58 = vld [vmem:[#allocation40_spill] sm:$0xff]  ;;  %v10485_v38 = vpack.c.bf16 %v8109_v12, %v8097_v59  ;;  %v10493_v59 = vpack.c.bf16 %v8171_v6, %v8159_v62  ;;  %v10499_v62 = vpack.c.bf16 %v8223_v49, %v8215_v2 }
 0x4b0   : > { %3797 = vperm.xlu0 %4408, %v3747_v56   ;;  %v10464_v40 = vld [vmem:[#allocation226_spill] sm:$0xff]  ;;  %v10506_v2 = vld [vmem:[#allocation48_spill] sm:$0xff] }
 0x4b1   : > { %3376 = vmatpush1.bf16.msra.mxu1 %v10441_v14  ;;  %v10454_v14 = vld [vmem:[#allocation225_spill] sm:$0xff]  ;;  %v10507_v49 = vpack.c.bf16 %v8275_v31, %v10506_v2  ;;  %v10514_v31 = vpack.c.bf16 %v8327_v47, %v8319_v55  ;;  %v10520_v47 = vpack.c.bf16 %v8389_v57, %v8385_v36  ;;  %v10522_v55 = vpack.c.bf16 %v8409_v35, %v8405_v48 }
 0x4b2   : > { %3377 = vmatprep.subr.bf16.mxu1 %v10444_v22  ;;  %v10456_v37 = vpack.c.bf16 %v10454_v14, %v10455_v61  ;;  %v10457_v22 = vld [vmem:[#allocation224_spill] sm:$0xff]  ;;  %v2974_v57 = vld [vmem:[%s7472_s9 + $0xb8] sm:$0xff] }
 0x4b3   : > { %3793 = vperm.xlu1 %4409, %v3746_v54   ;;  %v10459_v42 = vpack.c.bf16 %v10457_v22, %v10458_v8  ;;  %v10467_v54 = vld [vmem:[#allocation228_spill] sm:$0xff]  ;;  %v10473_v8 = vld [vmem:[#allocation42_spill] sm:$0xff] }
 0x4b4   : > { %v10468_v56 = vpack.c.bf16 %v7979_v4, %v10467_v54  ;;  %v2961_v14 = vld [vmem:[%s7472_s9 + $0x50] sm:$0xff]  ;;  %v10476_v4 = vld [vmem:[#allocation230_spill] sm:$0xff]  ;;  %v10483_v54 = vld [vmem:[#allocation231_spill] sm:$0xff] }
 0x4b5   : > { %3378 = vmatpush1.bf16.msra.mxu1 %v10447_v7  ;;  %v10460_v7 = vld [vmem:[#allocation227_spill] sm:$0xff]  ;;  %v2965_v61 = vld [vmem:[%s7472_s9 + $0x70] sm:$0xff] }
 0x4b6   : > { %3379 = vmatprep.subr.bf16.mxu1 %v10450_v45  ;;  %v10462_v24 = vpack.c.bf16 %v10460_v7, %v10461_v51  ;;  %v10465_v45 = vpack.c.bf16 %v10463_v3, %v10464_v40  ;;  %v10472_v22 = vld [vmem:[#allocation192_spill] sm:$0xff]  ;;  %v4154_v7 = vcombine.high %v2961_v14, %v2965_v61  ;;  %v10478_v51 = vpack.c.bf16 %v10476_v4, %v10477_v44  ;;  %v10480_v3 = vld [vmem:[#allocation46_spill] sm:$0xff]  ;;  %v10495_v4 = vld [vmem:[#allocation233_spill] sm:$0xff] }
 0x4b7   : > { %v2973_v40 = vld [vmem:[%s7472_s9 + $0xb0] sm:$0xff] }
 0x4b9   : > { %3380 = vmatpush1.bf16.msra.mxu1 %v10453_v52  ;;  %v10471_v52 = vpack.c.bf16 %v10469_v26, %v10470_v58  ;;  %v10486_v26 = vld [vmem:[#allocation51_spill] sm:$0xff]  ;;  %v10487_v58 = vld [vmem:[#allocation232_spill] sm:$0xff] }
 0x4ba   : > { %3381 = vmatprep.subr.bf16.mxu1 %v10456_v37  ;;  %v4145_v37 = vcombine.low %v2953_v60, %v2957_v9  ;;  %v2969_v9 = vld [vmem:[%s7472_s9 + $0x90] sm:$0xff] }
 0x4bb   : > { %v4162_v32 = vcombine.high %v2969_v9, %v2973_v40 }
 0x4bd   : > { %3382 = vmatpush1.bf16.msra.mxu1 %v10459_v42  ;;  %v10474_v42 = vpack.c.bf16 %v10472_v22, %v10473_v8  ;;  %v4161_v22 = vcombine.low %v2969_v9, %v2973_v40  ;;  %v10490_v8 = vld [vmem:[#allocation237_spill] sm:$0xff] }
 0x4be   : > { %3383 = vmatprep.subr.bf16.mxu1 %v10462_v24  ;;  %v10479_v24 = vld [vmem:[#allocation236_spill] sm:$0xff]  ;;  %v2954_v9 = vld [vmem:[%s7472_s9 + $0x18] sm:$0xff] }
 0x4bf   : > { %v10481_v60 = vpack.c.bf16 %v10479_v24, %v10480_v3  ;;  %v10498_v3 = vpack.c.bf16 %v8193_v43, %v8180_v20  ;;  %v2958_v40 = vld [vmem:[%s7472_s9 + $0x38] sm:$0xff]  ;;  %v10503_v43 = vld [vmem:[#allocation235_spill] sm:$0xff]  ;;  %v10504_v20 = vld [vmem:[#allocation234_spill] sm:$0xff] }
 0x4c1   : > { %3384 = vmatpush1.bf16.msra.mxu1 %v10465_v45  ;;  %v4153_v45 = vcombine.low %v2961_v14, %v2965_v61  ;;  %v10489_v14 = vpack.c.bf16 %v8135_v29, %v8127_v21  ;;  %v2977_v61 = vld [vmem:[%s7472_s9 + $0xd0] sm:$0xff]  ;;  %v10497_v21 = vpack.c.bf16 %v8197_v53, %v8189_v1  ;;  %v10501_v1 = vld [vmem:[#allocation239_spill] sm:$0xff] }
 0x4c2   : > { %3385 = vmatprep.subr.bf16.mxu1 %v10466_v46  ;;  %v10482_v46 = vld [vmem:[#allocation44_spill] sm:$0xff]  ;;  %v10502_v53 = vpack.c.bf16 %v8249_v17, %v10501_v1  ;;  %v10511_v17 = vpack.c.bf16 %v8301_v23, %v8293_v28  ;;  %v10517_v23 = vpack.c.bf16 %v8347_v11, %v8336_v33  ;;  %v10518_v28 = vpack.c.bf16 %v8371_v15, %v8365_v27  ;;  %v10524_v33 = vld [vmem:[#allocation53_spill] sm:$0xff]  ;;  %v10526_v11 = vld [vmem:[#allocation243_spill] sm:$0xff] }
 0x4c3   : > { %v2985_v29 = vld [vmem:[%s7472_s9 + $0x110] sm:$0xff]  ;;  %v2966_v27 = vld [vmem:[%s7472_s9 + $0x78] sm:$0xff]  ;;  %v10528_v15 = vld [vmem:[#allocation242_spill] sm:$0xff] }
 0x4c5   : > { %3386 = vmatpush1.bf16.msra.mxu1 %v10468_v56  ;;  %v10484_v56 = vpack.c.bf16 %v10482_v46, %v10483_v54  ;;  %v10505_v46 = vpack.c.bf16 %v10503_v43, %v10504_v20  ;;  %v4148_v54 = vcombine.high %v2954_v9, %v2958_v40 }
 0x4c6   : > { %3387 = vmatprep.subr.bf16.mxu1 %v10471_v52  ;;  %v10488_v52 = vpack.c.bf16 %v10486_v26, %v10487_v58  ;;  %v10515_v26 = vpack.c.bf16 %v8323_v10, %v8310_v39  ;;  %v10516_v58 = vpack.c.bf16 %v8349_v16, %v8345_v34  ;;  %v10521_v39 = vpack.c.bf16 %v8387_v5, %v8378_v41  ;;  %v10523_v10 = vld [vmem:[#allocation241_spill] sm:$0xff] }
 0x4c7   : > { %v10525_v34 = vpack.c.bf16 %v10523_v10, %v10524_v33  ;;  %v10527_v16 = vpack.c.bf16 %v10397_v30, %v10526_v11  ;;  %v10529_v41 = vpack.c.bf16 %v8425_v18, %v10528_v15  ;;  %v2970_v5 = vld [vmem:[%s7472_s9 + $0x98] sm:$0xff] }
 0x4c8   : > { %v4164_v35 = vcombine.high %v2970_v5, %v2974_v57  ;;  %v2978_v30 = vld [vmem:[%s7472_s9 + $0xd8] sm:$0xff] }
 0x4c9   : > { %3388 = vmatpush1.bf16.msra.mxu1 %v10474_v42  ;;  %v10491_v42 = vld [vmem:[#allocation49_spill] sm:$0xff] }
 0x4ca   : > { %3440 = vmatprep.subr.bf16.mxu1 %v10475_v0  ;;  %v10494_v0 = vld [vmem:[#allocation238_spill] sm:$0xff]  ;;  %v2990_v18 = vld [vmem:[%s7472_s9 + $0x138] sm:$0xff] }
 0x4cb   : > { %v10496_v44 = vpack.c.bf16 %v10494_v0, %v10495_v4 }
 0x4cc   : > { %3390 = vmatmul.mubr.bf16.vlgmr.msra.gmra.mrb[68].mxu1 %v4145_v37  ;;  %v2981_v37 = vld [vmem:[%s7472_s9 + $0xf0] sm:$0xff] }
 0x4cd   : > { %3441 = vmatpush1.bf16.msra.mxu1 %v10478_v51  ;;  %3399 = vmatprep.mubr.bf16.mxu1 %v4154_v7  ;;  %v10492_v7 = vpack.c.bf16 %v10490_v8, %v10491_v42  ;;  %v4170_v12 = vcombine.high %v2977_v61, %v2981_v37  ;;  %v2989_v51 = vld [vmem:[%s7472_s9 + $0x130] sm:$0xff]  ;;  %v4169_v24 = vcombine.low %v2977_v61, %v2981_v37  ;;  %v2986_v37 = vld [vmem:[%s7472_s9 + $0x118] sm:$0xff] }
 0x4ce   : > { %3442 = vmatprep.subr.bf16.mxu1 %v10481_v60  ;;  %v4178_v6 = vcombine.high %v2985_v29, %v2989_v51  ;;  %v10500_v60 = vpack.c.bf16 %v8219_v13, %v8206_v50  ;;  %v10508_v50 = vld [vmem:[#allocation240_spill] sm:$0xff]  ;;  %v10509_v13 = vld [vmem:[#allocation50_spill] sm:$0xff]  ;;  %v4180_v8 = vcombine.high %v2986_v37, %v2990_v18  ;;  %v4179_v42 = vcombine.low %v2986_v37, %v2990_v18 }
 0x4d1   : > { %3443 = vmatpush1.bf16.msra.mxu1 %v10484_v56  ;;  %v10510_v56 = vpack.c.bf16 %v10508_v50, %v10509_v13 }
 0x4d2   : > { %3444 = vmatprep.subr.bf16.mxu1 %v10485_v38 }
 0x4d4   : > { %3400 = vmatmul.mubr.bf16.gmra.mrb[72].mxu1 %v4153_v45  ;;  %v4177_v45 = vcombine.low %v2985_v29, %v2989_v51  ;;  %v10534_v29 = vld [vmem:[#allocation264_spill] sm:$0xff] }
 0x4d5   : > { %3445 = vmatpush1.bf16.msra.mxu1 %v10488_v52  ;;  %3409 = vmatprep.mubr.bf16.mxu1 %v4162_v32  ;;  %v10512_v32 = vld [vmem:[#allocation55_spill] sm:$0xff]  ;;  %v2982_v52 = vld [vmem:[%s7472_s9 + $0xf8] sm:$0xff] }
 0x4d6   : > { %3446 = vmatprep.subr.bf16.mxu1 %v10489_v14  ;;  %v10513_v38 = vpack.c.bf16 %v8297_v25, %v10512_v32  ;;  %v10519_v25 = vpack.c.bf16 %v8367_v19, %v8356_v63  ;;  %v2962_v63 = vld [vmem:[%s7472_s9 + $0x58] sm:$0xff]  ;;  %v4147_v19 = vcombine.low %v2954_v9, %v2958_v40  ;;  %v4163_v14 = vcombine.low %v2970_v5, %v2974_v57 }
 0x4d7   : > { %v4156_v36 = vcombine.high %v2962_v63, %v2966_v27  ;;  %v4155_v48 = vcombine.low %v2962_v63, %v2966_v27  ;;  %v4172_v61 = vcombine.high %v2978_v30, %v2982_v52 }
 0x4d9   : > { %3447 = vmatpush1.bf16.msra.mxu1 %v10492_v7  ;;  %v10530_v7 = vld [vmem:[#allocation262_spill] sm:$0xff] }
 0x4da   : > { %3448 = vmatprep.subr.bf16.mxu1 %v10493_v59 }
 0x4dc   : > { %3410 = vmatmul.mubr.bf16.gmra.mrb[76].mxu1 %v4161_v22  ;;  %v4171_v22 = vcombine.low %v2978_v30, %v2982_v52 }
 0x4dd   : > { %3449 = vmatpush1.bf16.msra.mxu1 %v10496_v44  ;;  %3419 = vmatprep.mubr.bf16.mxu1 %v4170_v12  ;;  %v10531_v12 = vld [vmem:[#allocation263_spill] sm:$0xff]  ;;  %v10533_v44 = vld [vmem:[#allocation265_spill] sm:$0xff] }
 0x4de   : > { %3450 = vmatprep.subr.bf16.mxu1 %v10497_v21  ;;  %v10532_v59 = vsub.f32 %v10530_v7, %v10531_v12 }
 0x4e0   : > { %v2037_v0 = vmul.f32 1.442695, %v10532_v59 }
 0x4e1   : > { %3451 = vmatpush1.bf16.msra.mxu1 %v10498_v3 }
 0x4e2   : > { %3452 = vmatprep.subr.bf16.mxu1 %v10499_v62  ;;  %5010 = vpow2.f32 %v2037_v0 }
 0x4e4   : > { %3420 = vmatmul.mubr.bf16.gmra.mrb[80].mxu1 %v4169_v24 }
 0x4e5   : > { %3453 = vmatpush1.bf16.msra.mxu1 %v10500_v60  ;;  %3429 = vmatprep.mubr.bf16.mxu1 %v4178_v6 }
 0x4e6   : > { %3454 = vmatprep.subr.bf16.mxu1 %v10502_v53 }
 0x4e9   : > { %3455 = vmatpush1.bf16.msra.mxu1 %v10505_v46 }
 0x4ea   : > { %3456 = vmatprep.subr.bf16.mxu1 %v10507_v49 }
 0x4ec   : > { %3430 = vmatmul.mubr.bf16.gmra.mrb[84].mxu1 %v4177_v45  ;;  %v5011_v4 = vpop.eup %5010 }
 0x4ed   : > { %3457 = vmatpush1.bf16.msra.mxu1 %v10510_v56  ;;  %3472 = vmatprep.mubr.bf16.mxu1 %v4148_v54  ;;  %v3547_v21 = vrot.slane %v5011_v4, %v10533_v44  ;;  %v3551_v51 = vrot.slane %v5011_v4, %v10534_v29 }
 0x4ee   : > { %3458 = vmatprep.subr.bf16.mxu1 %v10511_v17 }
 0x4ef   : > { %v3554_v24 = vmul.f32 0.0, %v3547_v21  ;;  %v3555_v6 = vmul.f32 0.0, %v3551_v51 }
 0x4f1   : > { %3459 = vmatpush1.bf16.msra.mxu1 %v10513_v38 }
 0x4f2   : > { %3460 = vmatprep.subr.bf16.mxu1 %v10514_v31 }
 0x4f5   : > { %3461 = vmatpush1.bf16.msra.mxu1 %v10515_v26 }
 0x4f6   : > { %3462 = vmatprep.subr.bf16.mxu1 %v10516_v58 }
 0x4f9   : > { %3463 = vmatpush1.bf16.msra.mxu1 %v10517_v23 }
 0x4fa   : > { %3464 = vmatprep.subr.bf16.mxu1 %v10518_v28 }
 0x4fd   : > { %3465 = vmatpush1.bf16.msra.mxu1 %v10519_v25 }
 0x4fe   : > { %3466 = vmatprep.subr.bf16.mxu1 %v10520_v47 }
 0x501   : > { %3467 = vmatpush1.bf16.msra.mxu1 %v10521_v39 }
 0x502   : > { %3468 = vmatprep.subr.bf16.mxu1 %v10522_v55 }
 0x505   : > { %3469 = vmatpush1.bf16.msra.mxu1 %v10525_v34 }
 0x506   : > { %3470 = vmatprep.subr.bf16.mxu1 %v10527_v16 }
 0x509   : > { %3471 = vmatpush1.bf16.msra.mxu1 %v10529_v41 }
 0x50c   : > { %3473 = vmatmul.mubr.bf16.vlgmr.msra.gmra.mrb[68].mxu1 %v4147_v19 }
 0x50d   : > { %3482 = vmatprep.mubr.bf16.mxu1 %v4156_v36 }
 0x514   : > { %3483 = vmatmul.mubr.bf16.gmra.mrb[72].mxu1 %v4155_v48 }
 0x515   : > { %3492 = vmatprep.mubr.bf16.mxu1 %v4164_v35 }
 0x51c   : > { %3493 = vmatmul.mubr.bf16.gmra.mrb[76].mxu1 %v4163_v14 }
 0x51d   : > { %3502 = vmatprep.mubr.bf16.mxu1 %v4172_v61 }
 0x524   : > { %3503 = vmatmul.mubr.bf16.gmra.mrb[80].mxu1 %v4171_v22 }
 0x525   : > { %3512 = vmatprep.mubr.bf16.mxu1 %v4180_v8  ;;  %v8649_v36 = vpop.permute.xlu1 %3768 }
 0x529   : > { %v8657_v61 = vpop.permute.xlu1 %3773 }
 0x52c   : > { %3513 = vmatmul.mubr.bf16.gmra.mrb[84].mxu1 %v4179_v42  ;;  %v3759_v42 = vpop.permute.xlu0 %3758 }
 0x5df   : > { %v3474_v3 = vpop.f32.mrb[68].mxu1 }
 0x5e0   : > { %v3574_v62 = vadd.f32 %v3554_v24, %v3474_v3  ;;  %v3476_v60 = vpop.f32.mrb[69].mxu1 }
 0x5e1   : > { %v3575_v1 = vadd.f32 %v3555_v6, %v3476_v60  ;;  %v3478_v53 = vpop.f32.mrb[70].mxu1 }
 0x5e2   : > { %v3576_v9 = vadd.f32 %v3554_v24, %v3478_v53  ;;  %v3480_v40 = vpop.f32.mrb[71].mxu1 }
 0x5e3   : > { %v3577_v45 = vadd.f32 %v3555_v6, %v3480_v40 }
 0x5e7   : > { %v3484_v43 = vpop.f32.mrb[72].mxu1 }
 0x5e8   : > { %v3578_v20 = vadd.f32 %v3554_v24, %v3484_v43  ;;  %v3486_v46 = vpop.f32.mrb[73].mxu1  ;;  %v3748_v43 = vld [vmem:[%s5714_s16] sm:$0xff] }
 0x5e9   : > { %v3579_v54 = vadd.f32 %v3555_v6, %v3486_v46  ;;  %v3488_v2 = vpop.f32.mrb[74].mxu1 }
 0x5ea   : > { %v8641_v49 = vadd.f32 %v3554_v24, %v3488_v2  ;;  %v3490_v50 = vpop.f32.mrb[75].mxu1  ;;  %v3749_v2 = vld [vmem:[%s5714_s16 + $0x8] sm:$0xff] }
 0x5eb   : > { %v8643_v13 = vadd.f32 %v3555_v6, %v3490_v50  ;;  %v3750_v50 = vld [vmem:[%s5714_s16 + $0x10] sm:$0xff] }
 0x5ef   : > { %v3494_v56 = vpop.f32.mrb[76].mxu1 }
 0x5f0   : > { %v3582_v17 = vadd.f32 %v3554_v24, %v3494_v56  ;;  %v3496_v32 = vpop.f32.mrb[77].mxu1  ;;  %v3751_v56 = vld [vmem:[%s5714_s16 + $0x18] sm:$0xff] }
 0x5f1   : > { %v3583_v38 = vadd.f32 %v3555_v6, %v3496_v32  ;;  %v3498_v31 = vpop.f32.mrb[78].mxu1 }
 0x5f2   : > { %v3584_v26 = vadd.f32 %v3554_v24, %v3498_v31  ;;  %v3500_v58 = vpop.f32.mrb[79].mxu1  ;;  %v3753_v31 = vld [vmem:[%s5714_s16 + $0x28] sm:$0xff] }
 0x5f3   : > { %v3585_v23 = vadd.f32 %v3555_v6, %v3500_v58  ;;  %v3776_v58 = vsub.f32 %v3748_v43, %v3759_v42 }
 0x5f7   : > { %v3504_v28 = vpop.f32.mrb[80].mxu1 }
 0x5f8   : > { %v3586_v25 = vadd.f32 %v3554_v24, %v3504_v28  ;;  %v3506_v47 = vpop.f32.mrb[81].mxu1  ;;  %v8704_v28 = vld [vmem:[%s5714_s16 + $0x30] sm:$0xff] }
 0x5f9   : > { %v3587_v39 = vadd.f32 %v3555_v6, %v3506_v47  ;;  %v3508_v55 = vpop.f32.mrb[82].mxu1 }
 0x5fa   : > { %v8645_v10 = vadd.f32 %v3554_v24, %v3508_v55  ;;  %v3510_v33 = vpop.f32.mrb[83].mxu1 }
 0x5fb   : > { %v8647_v34 = vadd.f32 %v3555_v6, %v3510_v33  ;;  %v3781_v33 = vsub.f32 %v3753_v31, %v8649_v36 }
 0x5ff   : > { %v3514_v11 = vpop.f32.mrb[84].mxu1 }
 0x600   : > { %v3590_v16 = vadd.f32 %v3554_v24, %v3514_v11  ;;  %v3516_v63 = vpop.f32.mrb[85].mxu1 }
 0x601   : > { %v3591_v27 = vadd.f32 %v3555_v6, %v3516_v63  ;;  %v3518_v19 = vpop.f32.mrb[86].mxu1 }
 0x602   : > { %3610 = vst [vmem:[#allocation3 + $0x80] sm:$0xff] %v3590_v16  ;;  %v3520_v15 = vpop.f32.mrb[87].mxu1  ;;  %v3782_v16 = vsub.f32 %v8704_v28, %v8657_v61 }
 0x603   : > { %3611 = vst [vmem:[#allocation3 + $0x88] sm:$0xff] %v3591_v27 }
 0x60a   : > { %v3618_v41 = vld [vmem:[#allocation3 + $0x80] ss:$8 sm:$0x3] }
 0x60b   : > { %5012 = vrcp.f32 %v3618_v41 }
 0x615   : > { %v5013_v5 = vpop.eup %5012 }
 0x616   : > { %v3633_v57 = vrot.slane %v5013_v5, %v10533_v44  ;;  %v3637_v48 = vrot.slane %v5013_v5, %v10534_v29 }
 0x618   : > { %v8653_v35 = vmul.f32 %v3633_v57, %v3576_v9  ;;  %v8655_v30 = vmul.f32 %v3637_v48, %v3577_v45  ;;  %v3658_v52 = vmul.f32 %v3633_v57, %v3584_v26  ;;  %v3659_v14 = vmul.f32 %v3637_v48, %v3585_v23  ;;  %v3752_v45 = vld [vmem:[%s5714_s16 + $0x20] sm:$0xff] }
 0x619   : > { %v8659_v37 = vmul.f32 %v3633_v57, %v3574_v62  ;;  %v8661_v18 = vmul.f32 %v3637_v48, %v3575_v1  ;;  %v3656_v22 = vmul.f32 %v3633_v57, %v3582_v17  ;;  %v3657_v8 = vmul.f32 %v3637_v48, %v3583_v38  ;;  %v3764_v17 = vpop.permute.xlu0 %3763 }
 0x61a   : > { %v3666_v7 = vmul.f32 %v8653_v35, %v8653_v35  ;;  %v3667_v12 = vmul.f32 %v8655_v30, %v8655_v30  ;;  %v8667_v59 = vmul.f32 %v3633_v57, %v3578_v20  ;;  %v8669_v0 = vmul.f32 %v3637_v48, %v3579_v54  ;;  %v3790_v20 = vpop.permute.xlu1 %3789 }
 0x61b   : > { %v3664_v4 = vmul.f32 %v8659_v37, %v8659_v37  ;;  %v3665_v44 = vmul.f32 %v8661_v18, %v8661_v18  ;;  %v3660_v21 = vmul.f32 %v3633_v57, %v3586_v25  ;;  %v3661_v29 = vmul.f32 %v3637_v48, %v3587_v39 }
 0x61c   : > { %v3674_v51 = vsub.f32 %v3658_v52, %v3666_v7  ;;  %v3675_v24 = vsub.f32 %v3659_v14, %v3667_v12  ;;  %v3668_v3 = vmul.f32 %v8667_v59, %v8667_v59  ;;  %v3669_v6 = vmul.f32 %v8669_v0, %v8669_v0 }
 0x61d   : > { %v3672_v62 = vsub.f32 %v3656_v22, %v3664_v4  ;;  %v3673_v60 = vsub.f32 %v3657_v8, %v3665_v44  ;;  %v8694_v32 = vmul.f32 %v3633_v57, %v8641_v49  ;;  %v8697_v38 = vmul.f32 %v3637_v48, %v8643_v13  ;;  %v3786_v63 = vpop.permute.xlu0 %3785 }
 0x61e   : > { %v8679_v1 = vmax.f32 %v3674_v51, 0.0  ;;  %v8681_v53 = vmax.f32 %v3675_v24, 0.0  ;;  %v3676_v9 = vsub.f32 %v3660_v21, %v3668_v3  ;;  %v3677_v40 = vsub.f32 %v3661_v29, %v3669_v6  ;;  %v3794_v11 = vpop.permute.xlu1 %3793 }
 0x61f   : > { %v8685_v46 = vmax.f32 %v3672_v62, 0.0  ;;  %v8687_v54 = vmax.f32 %v3673_v60, 0.0  ;;  %v3780_v26 = vsub.f32 %v3752_v45, %v8649_v36  ;;  %v3777_v23 = vsub.f32 %v3749_v2, %v3759_v42 }
 0x620   : > { %5014 = vrsqrt.f32 %v8679_v1  ;;  %v3778_v25 = vsub.f32 %v3750_v50, %v3764_v17  ;;  %v3779_v47 = vsub.f32 %v3751_v56, %v3764_v17  ;;  %v8707_v49 = vmax.f32 %v3676_v9, 0.0 }
 0x621   : > { %5016 = vrsqrt.f32 %v8681_v53  ;;  %v8709_v39 = vmax.f32 %v3677_v40, 0.0  ;;  %v3670_v13 = vmul.f32 %v8694_v32, %v8694_v32  ;;  %v3671_v55 = vmul.f32 %v8697_v38, %v8697_v38 }
 0x622   : > { %5018 = vrsqrt.f32 %v8685_v46  ;;  %v3662_v27 = vmul.f32 %v3633_v57, %v8645_v10  ;;  %v3663_v19 = vmul.f32 %v3637_v48, %v8647_v34  ;;  %v3802_v15 = vmul.f32 %v3790_v20, %v3778_v25  ;;  %v3755_v25 = vld [vmem:[%s5714_s16 + $0x38] sm:$0xff]  ;;  %s10537_s16 = sld [smem:[#allocation31_spill]] }
 0x623   : > { %5020 = vrsqrt.f32 %v8687_v54  ;;  %v3803_v41 = vmul.f32 %v3790_v20, %v3779_v47  ;;  %v3800_v5 = vmul.f32 %v3786_v63, %v3776_v58  ;;  %v3801_v52 = vmul.f32 %v3786_v63, %v3777_v23 }
 0x624   : > { %5022 = vrsqrt.f32 %v8707_v49  ;;  %v8722_v14 = vmul.f32 %v3794_v11, %v3780_v26  ;;  %v3678_v36 = vsub.f32 %v3662_v27, %v3670_v13  ;;  %v3679_v22 = vsub.f32 %v3663_v19, %v3671_v55 }
 0x625   : > { %5024 = vrsqrt.f32 %v8709_v39  ;;  %vm3704_vm1 = vcmp.eq.f32.partialorder %v8679_v1, inf  ;;  %vm3706_vm2 = vcmp.eq.f32.partialorder %v8679_v1, 0.0  ;;  %v3707_v8 = vand.u32 2147483648, %v8679_v1 }
 0x626   : > { %v8727_v42 = vmul.f32 %v3794_v11, %v3781_v33  ;;  %vm3711_vm3 = vcmp.eq.f32.partialorder %v8681_v53, inf  ;;  %vm3713_vm4 = vcmp.eq.f32.partialorder %v8681_v53, 0.0  ;;  %v8731_v34 = vmax.f32 %v3678_v36, 0.0 }
 0x627   : > { %v8733_v57 = vmax.f32 %v3679_v22, 0.0  ;;  %v3714_v12 = vand.u32 2147483648, %v8681_v53  ;;  %vm3690_vm5 = vcmp.eq.f32.partialorder %v8685_v46, inf  ;;  %vm3692_vm6 = vcmp.eq.f32.partialorder %v8685_v46, 0.0 }
 0x628   : > { %v3693_v21 = vand.u32 2147483648, %v8685_v46  ;;  %vm3697_vm7 = vcmp.eq.f32.partialorder %v8687_v54, inf  ;;  %5026 = vrsqrt.f32 %v8731_v34  ;;  %vm3699_vm8 = vcmp.eq.f32.partialorder %v8687_v54, 0.0  ;;  %p10539_p11 = scmp.ne.s32.totalorder %s10537_s16, 0 }
 0x629   : > { %5028 = vrsqrt.f32 %v8733_v57  ;;  %v3700_v60 = vand.u32 2147483648, %v8687_v54  ;;  %vm3718_vm9 = vcmp.eq.f32.partialorder %v8707_v49, inf  ;;  %vm3720_vm10 = vcmp.eq.f32.partialorder %v8707_v49, 0.0 }
 0x62a   : > { %v5015_v10 = vpop.eup %5014  ;;  %vm3725_vm11 = vcmp.eq.f32.partialorder %v8709_v39, inf  ;;  %vm3727_vm12 = vcmp.eq.f32.partialorder %v8709_v39, 0.0  ;;  %v3783_v27 = vsub.f32 %v3755_v25, %v8657_v61  ;;  %vm3732_vm13 = vcmp.eq.f32.partialorder %v8731_v34, inf  ;;  %p5182_p7 = pnand %p5181_p4, %p10539_p11 }
 0x62b   : > { %v5017_v48 = vpop.eup %5016  ;;  %v3703_v7 = vmul.f32 %v5015_v10, %v8679_v1  ;;  %vm3734_vm14 = vcmp.eq.f32.partialorder %v8731_v34, 0.0  ;;  %vm3739_vm15 = vcmp.eq.f32.partialorder %v8733_v57, inf  ;;  %v3742_v61 = vand.u32 2147483648, %v8733_v57 }
 0x62c   : > { %v5019_v4 = vpop.eup %5018  ;;  %v3710_v44 = vmul.f32 %v5017_v48, %v8681_v53  ;;  %vm3741_vm0 = vcmp.eq.f32.partialorder %v8733_v57, 0.0  ;;  %p5183_p0 = pneg %p5182_p7 }
 0x62d   : > { %v5021_v29 = vpop.eup %5020  ;;  %v3705_v51 = vsel %vm3704_vm1, %v8679_v1, %v3703_v7  ;;  %v3689_v24 = vmul.f32 %v5019_v4, %v8685_v46 }
 0x62e   : > { %v3708_v3 = vsel %vm3706_vm2, %v3707_v8, %v3705_v51  ;;  %v3712_v6 = vsel %vm3711_vm3, %v8681_v53, %v3710_v44  ;;  %v3696_v62 = vmul.f32 %v5021_v29, %v8687_v54  ;;  %v5023_v1 = vpop.eup %5022  ;;  %p5190_p1 = pnand %p5189_p12, %p5183_p0 }
 0x62f   : > { %v3715_v9 = vsel %vm3713_vm4, %v3714_v12, %v3712_v6  ;;  %v3810_v40 = vmul.f32 %v3802_v15, %v3708_v3  ;;  %v3691_v45 = vsel %vm3690_vm5, %v8685_v46, %v3689_v24  ;;  %v5025_v53 = vpop.eup %5024  ;;  %v3717_v31 = vmul.f32 %v5023_v1, %v8707_v49 }
 0x630   : > { %v3811_v43 = vmul.f32 %v3803_v41, %v3715_v9  ;;  %v3694_v20 = vsel %vm3692_vm6, %v3693_v21, %v3691_v45  ;;  %v3698_v2 = vsel %vm3697_vm7, %v8687_v54, %v3696_v62  ;;  %v3721_v46 = vand.u32 2147483648, %v8707_v49 }
 0x631   : > { %v3818_v50 = vadd.f32 %v3810_v40, %v8653_v35  ;;  %v3701_v56 = vsel %vm3699_vm8, %v3700_v60, %v3698_v2  ;;  %v3808_v17 = vmul.f32 %v3800_v5, %v3694_v20  ;;  %v3724_v23 = vmul.f32 %v5025_v53, %v8709_v39 }
 0x632   : > { %v3819_v26 = vadd.f32 %v3811_v43, %v8655_v30  ;;  %v3809_v58 = vmul.f32 %v3801_v52, %v3701_v56  ;;  %v3719_v30 = vsel %vm3718_vm9, %v8707_v49, %v3717_v31  ;;  %v3728_v54 = vand.u32 2147483648, %v8709_v39  ;;  %v5027_v63 = vpop.eup %5026 }
 0x633   : > { %3826 = vst [vmem:[%s8778_s1 + $0x10] sm:$0xff] %v3818_v50  ;;  %v3816_v35 = vadd.f32 %v3808_v17, %v8659_v37  ;;  %v3722_v13 = vsel %vm3720_vm10, %v3721_v46, %v3719_v30  ;;  %v3726_v55 = vsel %vm3725_vm11, %v8709_v39, %v3724_v23  ;;  %v3798_v37 = vpop.permute.xlu0 %3797  ;;  %v5029_v49 = vpop.eup %5028  ;;  %v3731_v39 = vmul.f32 %v5027_v63, %v8731_v34 }
 0x634   : > { %3827 = vst [vmem:[%s8778_s1 + $0x18] sm:$0xff] %v3819_v26  ;;  %v3817_v47 = vadd.f32 %v3809_v58, %v8661_v18  ;;  %v3729_v33 = vsel %vm3727_vm12, %v3728_v54, %v3726_v55  ;;  %v3812_v11 = vmul.f32 %v8722_v14, %v3722_v13  ;;  %v3806_v15 = vmul.f32 %v3798_v37, %v3782_v16 }
 0x635   : > { %3824 = vst [vmem:[%s8778_s1] sm:$0xff] %v3816_v35  ;;  %v3813_v18 = vmul.f32 %v8727_v42, %v3729_v33  ;;  %v3735_v5 = vand.u32 2147483648, %v8731_v34  ;;  %v3738_v52 = vmul.f32 %v5029_v49, %v8733_v57  ;;  %v3733_v14 = vsel %vm3732_vm13, %v8731_v34, %v3731_v39 }
 0x636   : > { %3825 = vst [vmem:[%s8778_s1 + $0x8] sm:$0xff] %v3817_v47  ;;  %v3820_v19 = vadd.f32 %v3812_v11, %v8667_v59  ;;  %v3807_v28 = vmul.f32 %v3798_v37, %v3783_v27 }
 0x637   : > { %v3821_v41 = vadd.f32 %v3813_v18, %v8669_v0  ;;  %v3736_v59 = vsel %vm3734_vm14, %v3735_v5, %v3733_v14  ;;  %v3740_v0 = vsel %vm3739_vm15, %v8733_v57, %v3738_v52 }
 0x638   : > { %3828 = vst [vmem:[%s8778_s1 + $0x20] sm:$0xff] %v3820_v19  ;;  %v3743_v16 = vsel %vm3741_vm0, %v3742_v61, %v3740_v0  ;;  %v3814_v36 = vmul.f32 %v3806_v15, %v3736_v59 }
 0x639   : > { %3829 = vst [vmem:[%s8778_s1 + $0x28] sm:$0xff] %v3821_v41  ;;  %v3815_v22 = vmul.f32 %v3807_v28, %v3743_v16 }
 0x63a   : > { %v3822_v8 = vadd.f32 %v3814_v36, %v8694_v32 }
 0x63b   : > { %v3823_v42 = vadd.f32 %v3815_v22, %v8697_v38 }
 0x63c   : > { %3830 = vst [vmem:[%s8778_s1 + $0x30] sm:$0xff] %v3822_v8 }
 0x63d   : > { %3831 = vst [vmem:[%s8778_s1 + $0x38] sm:$0xff] %v3823_v42 }
 0x63e   : > { %5193 = shalt.err (!%p5190_p1)
}
 0x63f   : > { %s5194_s22 = scalar_lea.hbm %s8825_s3, 1024  ;;  %s5198_s19 = scalar_lea.hbm %s10538_s6, 4096 }
 0x640   : > { %p5195_p3 = scmp.ne.s32.totalorder %s8825_s3, %s5194_s22  ;;  %p5199_p10 = scmp.lt.u32.totalorder %s8825_s3, %s10538_s6 }
 0x641   : > { %p5200_p6 = scmp.lt.u32.totalorder %s5198_s19, %s5194_s22  ;;  %p5202_p4 = scmp.lt.u32.totalorder %s5194_s22, %s8825_s3 }
 0x642   : > { %p5196_p2 = pnand %p5195_p3, %p10539_p11 }
 0x643   : > { %p5201_p13 = por %p5200_p6, %p5199_p10 }
 0x644   : > { %p5197_p9 = pneg %p5196_p2 }
 0x645   : > { %p5203_p7 = por %p5202_p4, %p5201_p13 }
 0x647   : > { %p5204_p0 = pnand %p5203_p7, %p5197_p9 }
 0x649   : > { %5207 = shalt.err (!%p5204_p0)
}
 0x64a   : > { %s5334_s1 = smov 256   ;;  %s5335_s10 = smov 512  }
 0x64b   : > { %s5336_s23 = smov 16  }
 0x64c   : > { %4278 = dma.vmem_to_hbm [thread:$0]  (%p10539_p11), %s8818_s11, 1024, %s8825_s3, %s3833_s13, %s5334_s1, %s5335_s10, %s5336_s23  }
 0x64d PF: > { %s10540_s25 = sld [smem:[#allocation20_spill]]  ;;  %p4301_p5 = scmp.ge.s32.totalorder %s5314_s28, 2 }
 0x64e   : > { %s10541_s24 = sld [smem:[#allocation32_spill]] }
 0x653   : > { %s3863_s15 = sand.u32 1, %s10540_s25  }
 0x654   : > { %p10542_p8 = scmp.ne.s32.totalorder %s10541_s24, 0  ;;  %s3864_s30 = scalar_lea.sflag [#allocation6], %s3863_s15 }
 0x656   : > { %p4297_p12 = pnand %p4301_p5, %p10542_p8 }
 0x658   : > { %5269 = dma.done.wait (!%p4297_p12), %s3864_s30, 1024  }
 0x659   : > { %5271 = vsyncadd (!%p4297_p12), %s3864_s30, 4294966272  ;;  %s27_s28 = sadd.s32 1, %s5314_s28   ;;  %s10543_s18 = sld [smem:[#allocation19_spill]] }
 0x65a   : > { %p24_p1 = scmp.ge.s32.totalorder %s27_s28, 6   ;;  %s10544_s21 = sld [smem:[#allocation21_spill]] }
 0x65b   : > { %s10545_s22 = sld [smem:[#allocation22_spill]]  ;;  %s10546_s23 = sld [smem:[#allocation33_spill]] }
 0x65c   : > { %s10547_s7 = sld [smem:[#allocation28_spill]]  ;;  %s10548_s11 = sld [smem:[#allocation30_spill]] }
 0x65d   : > { %s10549_s19 = smov %s5282_s20  ;;  %s10550_s20 = smov %s5579_s14 }
 0x65e   : > { %s10551_s24 = smov %s5306_s26  ;;  %s10552_s25 = smov %s5310_s27 }
 0x65f   :  { %26 = sbr.rel (!%p24_p1) target bundleno = 18 (0x12), region = 142 }
 0x662   : > { %s10553_s26 = smov %s10547_s7  ;;  %s10554_s27 = smov %s10548_s11 }
 0x666   :  { %3869 = vsyncpa [#allocation5], 1 }
 0x667   :  { %3871 = vsyncpa [#allocation5 + $0x1], 1 }
 0x668   :  { %3872 = vsyncpa [#allocation8], 1 }
 0x669   :  { %3874 = vsyncpa [#allocation8 + $0x1], 1 }
 0x66a   :  { %3875 = vsyncpa [#allocation11], 1 }
 0x66b   :  { %3877 = vsyncpa [#allocation11 + $0x1], 1 }
 0x66c   :  { %3878 = vsyncpa [#allocation6], 1 }
 0x66d   :  { %3880 = vsyncpa [#allocation6 + $0x1], 1 }

</bundles_post_ra>
